<compile_context>
chip_gen: v7x
topology: tpu7x:2x2x1
jax: 0.10.0
libtpu: 0.0.40
codegen_flags: <defaults>
</compile_context>

<pallas_src>
import jax
import jax.numpy as jnp
from jax.experimental import pallas as pl
from jax.experimental.pallas import tpu as pltpu

STATE_DIM = 12
MID_DIM = 2 ** 10      # 1024
ACTION_DIM = 3

K_PAD = 16             # fc1 contraction padded 12 -> 16
OUT_PAD = 128          # fc_out width padded 3 -> 128 (lane-dense output)
MAX_TM = 512           # max batch-tile rows per grid step


def _round_up(n, m):
    return ((n + m - 1) // m) * m


def _hardswish(x):
    # PyTorch nn.Hardswish: x * relu6(x + 3) / 6
    return x * jnp.clip(x + 3.0, 0.0, 6.0) * (1.0 / 6.0)


def mlp_kernel(x_ref, w1_ref, b1_ref, w2_ref, b2_ref,
               w3_ref, b3_ref, w4_ref, b4_ref, o_ref):
    # x = x.float() (PyTorch); cast to bf16 only for the MXU inputs,
    # accumulate in fp32, bias add + activations in fp32 (VPU).
    x = x_ref[...].astype(jnp.float32)

    # fc1 + ReLU
    h = jnp.dot(x.astype(jnp.bfloat16), w1_ref[...],
                preferred_element_type=jnp.float32) + b1_ref[...]
    h = jnp.maximum(h, 0.0)

    # fc2 + ReLU
    h = jnp.dot(h.astype(jnp.bfloat16), w2_ref[...],
                preferred_element_type=jnp.float32) + b2_ref[...]
    h = jnp.maximum(h, 0.0)

    # fc3 + Hardswish
    h = jnp.dot(h.astype(jnp.bfloat16), w3_ref[...],
                preferred_element_type=jnp.float32) + b3_ref[...]
    h = _hardswish(h)

    # fc_out (padded to 128 lanes; padding columns of w4/b4 are zero)
    out = jnp.dot(h.astype(jnp.bfloat16), w4_ref[...],
                  preferred_element_type=jnp.float32) + b4_ref[...]
    o_ref[...] = out.astype(o_ref.dtype)


def net_forward(x, params):
    """x: (B, STATE_DIM) any float dtype. params: output of prepare_params.
    Returns (B, ACTION_DIM) float32."""
    w1, b1, w2, b2, w3, b3, w4, b4 = params
    B = x.shape[0]

    x = x.astype(jnp.float32)

    # Batch tile: multiple of 8 sublanes, capped at MAX_TM rows.
    tm = min(MAX_TM, _round_up(B, 8))
    Bp = _round_up(B, tm)
    xp = jnp.pad(x, ((0, Bp - B), (0, K_PAD - STATE_DIM)))

    grid = (Bp // tm,)

    # Weights/biases: same block every grid step -> stay VMEM-resident.
    def resident(arr):
        return pl.BlockSpec(arr.shape, lambda i: (0, 0))

    out_padded = pl.pallas_call(
        mlp_kernel,
        out_shape=jax.ShapeDtypeStruct((Bp, OUT_PAD), jnp.float32),
        grid=grid,
        in_specs=[
            pl.BlockSpec((tm, K_PAD), lambda i: (i, 0)),
            resident(w1), resident(b1),
            resident(w2), resident(b2),
            resident(w3), resident(b3),
            resident(w4), resident(b4),
        ],
        out_specs=pl.BlockSpec((tm, OUT_PAD), lambda i: (i, 0)),
        compiler_params=pltpu.CompilerParams(
            dimension_semantics=("parallel",),
            vmem_limit_bytes=32 << 20),
    )(xp, w1, b1, w2, b2, w3, b3, w4, b4)

    return out_padded[:B, :ACTION_DIM]


def init_params(key):
    """fp32 params mimicking PyTorch Linear default init (U(+/- 1/sqrt(fan_in))).
    Weights stored as (in_features, out_features) so y = x @ W + b."""
    dims = [(STATE_DIM, MID_DIM), (MID_DIM, MID_DIM),
            (MID_DIM, MID_DIM), (MID_DIM, ACTION_DIM)]
    params = []
    for fan_in, fan_out in dims:
        key, kw, kb = jax.random.split(key, 3)
        bound = 1.0 / (fan_in ** 0.5)
        w = jax.random.uniform(kw, (fan_in, fan_out), jnp.float32, -bound, bound)
        b = jax.random.uniform(kb, (1, fan_out), jnp.float32, -bound, bound)
        params.extend([w, b])
    return tuple(params)


def prepare_params(params_f32):
    """Pad + cast the fp32 params into the kernel layout:
    bf16 weights (w1 rows padded 12->16, w4 cols padded 3->128), fp32 biases."""
    w1, b1, w2, b2, w3, b3, w4, b4 = params_f32
    w1p = jnp.pad(w1, ((0, K_PAD - STATE_DIM), (0, 0))).astype(jnp.bfloat16)
    w4p = jnp.pad(w4, ((0, 0), (0, OUT_PAD - ACTION_DIM))).astype(jnp.bfloat16)
    b4p = jnp.pad(b4, ((0, 0), (0, OUT_PAD - ACTION_DIM)))
    return (w1p, b1,
            w2.astype(jnp.bfloat16), b2,
            w3.astype(jnp.bfloat16), b3,
            w4p, b4p)


if __name__ == "__main__":
    key = jax.random.PRNGKey(0)
    key, kx = jax.random.split(key)

    B = 8
    x = jax.random.normal(kx, (B, STATE_DIM), jnp.float32)

    params_f32 = init_params(key)
    kernel_params = prepare_params(params_f32)

    fwd = jax.jit(net_forward)
    out = fwd(x, kernel_params)
    jax.block_until_ready(out)
    assert out.shape == (B, ACTION_DIM)

    # Pure-JAX fp32 reference using the same bf16-quantized weights.
    w1, b1, w2, b2, w3, b3, w4, b4 = params_f32
    q = lambda w: w.astype(jnp.bfloat16).astype(jnp.float32)
    h = jnp.maximum(x @ q(w1) + b1, 0.0)
    h = jnp.maximum(h @ q(w2) + b2, 0.0)
    h = h @ q(w3) + b3
    h = h * jnp.clip(h + 3.0, 0.0, 6.0) / 6.0
    ref = h @ q(w4) + b4

    assert jnp.allclose(out, ref, atol=2e-2, rtol=2e-2), "mismatch vs reference"

    print("KERNEL_OK")
</pallas_src>

<mosaic_0001>
module attributes {stable_mosaic.version = 11 : i64} {
  func.func @mlp_kernel(%arg0: i32, %arg1: memref<8x16xf32, #tpu.memory_space<vmem>>, %arg2: memref<16x1024xbf16, #tpu.memory_space<vmem>>, %arg3: memref<1x1024xf32, #tpu.memory_space<vmem>>, %arg4: memref<1024x1024xbf16, #tpu.memory_space<vmem>>, %arg5: memref<1x1024xf32, #tpu.memory_space<vmem>>, %arg6: memref<1024x1024xbf16, #tpu.memory_space<vmem>>, %arg7: memref<1x1024xf32, #tpu.memory_space<vmem>>, %arg8: memref<1024x128xbf16, #tpu.memory_space<vmem>>, %arg9: memref<1x128xf32, #tpu.memory_space<vmem>>, %arg10: memref<8x128xf32, #tpu.memory_space<vmem>>) attributes {dimension_semantics = [#tpu.dimension_semantics<parallel>], iteration_bounds = array<i64: 1>, scalar_prefetch = 0 : i64, scratch_operands = 0 : i64, tpu.core_type = #tpu.core_type<tc>, window_params = [{transform_indices = @transform_0, window_bounds = array<i64: 8, 16>}, {pipeline_mode = #tpu.pipeline_mode<synchronous>, transform_indices = @transform_1, window_bounds = array<i64: 16, 1024>}, {pipeline_mode = #tpu.pipeline_mode<synchronous>, transform_indices = @transform_2, window_bounds = array<i64: 1, 1024>}, {pipeline_mode = #tpu.pipeline_mode<synchronous>, transform_indices = @transform_3, window_bounds = array<i64: 1024, 1024>}, {pipeline_mode = #tpu.pipeline_mode<synchronous>, transform_indices = @transform_4, window_bounds = array<i64: 1, 1024>}, {pipeline_mode = #tpu.pipeline_mode<synchronous>, transform_indices = @transform_5, window_bounds = array<i64: 1024, 1024>}, {pipeline_mode = #tpu.pipeline_mode<synchronous>, transform_indices = @transform_6, window_bounds = array<i64: 1, 1024>}, {pipeline_mode = #tpu.pipeline_mode<synchronous>, transform_indices = @transform_7, window_bounds = array<i64: 1024, 128>}, {pipeline_mode = #tpu.pipeline_mode<synchronous>, transform_indices = @transform_8, window_bounds = array<i64: 1, 128>}, {transform_indices = @transform_9, window_bounds = array<i64: 8, 128>}]} {
    %c0 = arith.constant 0 : index
    %c0_0 = arith.constant 0 : index
    %0 = vector.load %arg1[%c0, %c0_0] : memref<8x16xf32, #tpu.memory_space<vmem>>, vector<8x16xf32>
    %1 = arith.truncf %0 : vector<8x16xf32> to vector<8x16xbf16>
    %c0_1 = arith.constant 0 : index
    %c0_2 = arith.constant 0 : index
    %2 = vector.load %arg2[%c0_1, %c0_2] : memref<16x1024xbf16, #tpu.memory_space<vmem>>, vector<16x1024xbf16>
    %cst = arith.constant dense<0.000000e+00> : vector<8x1024xf32>
    %3 = tpu.matmul %1, %2, %cst {dimension_numbers = #tpu.dot_dimension_numbers<[1], [0], [0], [1], [0, 0, 1, 1], [], []>} : vector<8x16xbf16>, vector<16x1024xbf16>, vector<8x1024xf32> -> vector<8x1024xf32>
    %c0_3 = arith.constant 0 : index
    %c0_4 = arith.constant 0 : index
    %4 = vector.load %arg3[%c0_3, %c0_4] : memref<1x1024xf32, #tpu.memory_space<vmem>>, vector<1x1024xf32>
    %5 = vector.broadcast %4 : vector<1x1024xf32> to vector<8x1024xf32>
    %6 = arith.addf %3, %5 : vector<8x1024xf32>
    %cst_5 = arith.constant 0.000000e+00 : f32
    %7 = vector.broadcast %cst_5 : f32 to vector<8x1024xf32>
    %8 = arith.maximumf %6, %7 : vector<8x1024xf32>
    %9 = arith.truncf %8 : vector<8x1024xf32> to vector<8x1024xbf16>
    %c0_6 = arith.constant 0 : index
    %c0_7 = arith.constant 0 : index
    %10 = vector.load %arg4[%c0_6, %c0_7] : memref<1024x1024xbf16, #tpu.memory_space<vmem>>, vector<1024x1024xbf16>
    %cst_8 = arith.constant dense<0.000000e+00> : vector<8x1024xf32>
    %11 = tpu.matmul %9, %10, %cst_8 {dimension_numbers = #tpu.dot_dimension_numbers<[1], [0], [0], [1], [0, 0, 1, 1], [], []>} : vector<8x1024xbf16>, vector<1024x1024xbf16>, vector<8x1024xf32> -> vector<8x1024xf32>
    %c0_9 = arith.constant 0 : index
    %c0_10 = arith.constant 0 : index
    %12 = vector.load %arg5[%c0_9, %c0_10] : memref<1x1024xf32, #tpu.memory_space<vmem>>, vector<1x1024xf32>
    %13 = vector.broadcast %12 : vector<1x1024xf32> to vector<8x1024xf32>
    %14 = arith.addf %11, %13 : vector<8x1024xf32>
    %cst_11 = arith.constant 0.000000e+00 : f32
    %15 = vector.broadcast %cst_11 : f32 to vector<8x1024xf32>
    %16 = arith.maximumf %14, %15 : vector<8x1024xf32>
    %17 = arith.truncf %16 : vector<8x1024xf32> to vector<8x1024xbf16>
    %c0_12 = arith.constant 0 : index
    %c0_13 = arith.constant 0 : index
    %18 = vector.load %arg6[%c0_12, %c0_13] : memref<1024x1024xbf16, #tpu.memory_space<vmem>>, vector<1024x1024xbf16>
    %cst_14 = arith.constant dense<0.000000e+00> : vector<8x1024xf32>
    %19 = tpu.matmul %17, %18, %cst_14 {dimension_numbers = #tpu.dot_dimension_numbers<[1], [0], [0], [1], [0, 0, 1, 1], [], []>} : vector<8x1024xbf16>, vector<1024x1024xbf16>, vector<8x1024xf32> -> vector<8x1024xf32>
    %c0_15 = arith.constant 0 : index
    %c0_16 = arith.constant 0 : index
    %20 = vector.load %arg7[%c0_15, %c0_16] : memref<1x1024xf32, #tpu.memory_space<vmem>>, vector<1x1024xf32>
    %21 = vector.broadcast %20 : vector<1x1024xf32> to vector<8x1024xf32>
    %22 = arith.addf %19, %21 : vector<8x1024xf32>
    %cst_17 = arith.constant 3.000000e+00 : f32
    %23 = vector.broadcast %cst_17 : f32 to vector<8x1024xf32>
    %24 = arith.addf %22, %23 : vector<8x1024xf32>
    %cst_18 = arith.constant 0.000000e+00 : f32
    %cst_19 = arith.constant 6.000000e+00 : f32
    %25 = vector.broadcast %cst_18 : f32 to vector<8x1024xf32>
    %26 = arith.maximumf %25, %24 : vector<8x1024xf32>
    %27 = vector.broadcast %cst_19 : f32 to vector<8x1024xf32>
    %28 = arith.minimumf %27, %26 : vector<8x1024xf32>
    %29 = arith.mulf %22, %28 : vector<8x1024xf32>
    %cst_20 = arith.constant 0.166666672 : f32
    %30 = vector.broadcast %cst_20 : f32 to vector<8x1024xf32>
    %31 = arith.mulf %29, %30 : vector<8x1024xf32>
    %32 = arith.truncf %31 : vector<8x1024xf32> to vector<8x1024xbf16>
    %c0_21 = arith.constant 0 : index
    %c0_22 = arith.constant 0 : index
    %33 = vector.load %arg8[%c0_21, %c0_22] : memref<1024x128xbf16, #tpu.memory_space<vmem>>, vector<1024x128xbf16>
    %cst_23 = arith.constant dense<0.000000e+00> : vector<8x128xf32>
    %34 = tpu.matmul %32, %33, %cst_23 {dimension_numbers = #tpu.dot_dimension_numbers<[1], [0], [0], [1], [0, 0, 1, 1], [], []>} : vector<8x1024xbf16>, vector<1024x128xbf16>, vector<8x128xf32> -> vector<8x128xf32>
    %c0_24 = arith.constant 0 : index
    %c0_25 = arith.constant 0 : index
    %35 = vector.load %arg9[%c0_24, %c0_25] : memref<1x128xf32, #tpu.memory_space<vmem>>, vector<1x128xf32>
    %36 = vector.broadcast %35 : vector<1x128xf32> to vector<8x128xf32>
    %37 = arith.addf %34, %36 : vector<8x128xf32>
    %c0_26 = arith.constant 0 : index
    %c0_27 = arith.constant 0 : index
    %38 = vector.load %arg10[%c0_26, %c0_27] : memref<8x128xf32, #tpu.memory_space<vmem>>, vector<8x128xf32>
    tpu.vector_store %arg10[%c0_26, %c0_27], %37 {strides = array<i32>} : memref<8x128xf32, #tpu.memory_space<vmem>>, vector<8x128xf32>,
    return
  }
  func.func @transform_0(%arg0: i32) -> (i32, i32) {
    %c0_i32 = arith.constant 0 : i32
    %c0_i32_0 = arith.constant 0 : i32
    return %arg0, %c0_i32 : i32, i32
  }
  func.func @transform_1(%arg0: i32) -> (i32, i32) {
    %c0_i32 = arith.constant 0 : i32
    %c0_i32_0 = arith.constant 0 : i32
    %c0_i32_1 = arith.constant 0 : i32
    return %c0_i32, %c0_i32_0 : i32, i32
  }
  func.func @transform_2(%arg0: i32) -> (i32, i32) {
    %c0_i32 = arith.constant 0 : i32
    %c0_i32_0 = arith.constant 0 : i32
    %c0_i32_1 = arith.constant 0 : i32
    return %c0_i32, %c0_i32_0 : i32, i32
  }
  func.func @transform_3(%arg0: i32) -> (i32, i32) {
    %c0_i32 = arith.constant 0 : i32
    %c0_i32_0 = arith.constant 0 : i32
    %c0_i32_1 = arith.constant 0 : i32
    return %c0_i32, %c0_i32_0 : i32, i32
  }
  func.func @transform_4(%arg0: i32) -> (i32, i32) {
    %c0_i32 = arith.constant 0 : i32
    %c0_i32_0 = arith.constant 0 : i32
    %c0_i32_1 = arith.constant 0 : i32
    return %c0_i32, %c0_i32_0 : i32, i32
  }
  func.func @transform_5(%arg0: i32) -> (i32, i32) {
    %c0_i32 = arith.constant 0 : i32
    %c0_i32_0 = arith.constant 0 : i32
    %c0_i32_1 = arith.constant 0 : i32
    return %c0_i32, %c0_i32_0 : i32, i32
  }
  func.func @transform_6(%arg0: i32) -> (i32, i32) {
    %c0_i32 = arith.constant 0 : i32
    %c0_i32_0 = arith.constant 0 : i32
    %c0_i32_1 = arith.constant 0 : i32
    return %c0_i32, %c0_i32_0 : i32, i32
  }
  func.func @transform_7(%arg0: i32) -> (i32, i32) {
    %c0_i32 = arith.constant 0 : i32
    %c0_i32_0 = arith.constant 0 : i32
    %c0_i32_1 = arith.constant 0 : i32
    return %c0_i32, %c0_i32_0 : i32, i32
  }
  func.func @transform_8(%arg0: i32) -> (i32, i32) {
    %c0_i32 = arith.constant 0 : i32
    %c0_i32_0 = arith.constant 0 : i32
    %c0_i32_1 = arith.constant 0 : i32
    return %c0_i32, %c0_i32_0 : i32, i32
  }
  func.func @transform_9(%arg0: i32) -> (i32, i32) {
    %c0_i32 = arith.constant 0 : i32
    %c0_i32_0 = arith.constant 0 : i32
    return %arg0, %c0_i32 : i32, i32
  }
}

</mosaic_0001>

<bundles_post_ra>
// kernel: net_forward.1
= control target key start
LH: loop header
LB: loop body
LE: loop exit
PB: predicated region body
PF: predicated region fallthrough
CT: control target
= control target key end

     0   :  { %14 = vsyncpa [#allocation3], 0  ;;  %s10680_s0 = inlined_call_operand.vmem [shape: f32[8,16], index: 0, kind: input, shape index: {}]   ;;  %s10681_s1 = inlined_call_operand.hbm [shape: bf16[16,1024], index: 1, kind: input, shape index: {}]   ;;  %s10682_s2 = inlined_call_operand.hbm [shape: f32[1,1024], index: 2, kind: input, shape index: {}]   ;;  %s10683_s3 = inlined_call_operand.hbm [shape: bf16[1024,1024], index: 3, kind: input, shape index: {}]   ;;  %s10684_s4 = inlined_call_operand.hbm [shape: f32[1,1024], index: 4, kind: input, shape index: {}]   ;;  %s10685_s5 = inlined_call_operand.hbm [shape: bf16[1024,1024], index: 5, kind: input, shape index: {}]   ;;  %s10686_s6 = inlined_call_operand.hbm [shape: f32[1,1024], index: 6, kind: input, shape index: {}]   ;;  %s10687_s7 = inlined_call_operand.hbm [shape: bf16[1024,128], index: 7, kind: input, shape index: {}]   ;;  %s10688_s8 = inlined_call_operand.hbm [shape: f32[1,128], index: 8, kind: input, shape index: {}]   ;;  %s10689_s9 = inlined_call_operand.vmem [shape: f32[8,128], index: 9, kind: output, shape index: {}]  }
   0x1   :  { %15 = vsyncpa [#allocation5], 0 }
   0x2   :  { %16 = vsyncpa [#allocation8], 0 }
   0x3   :  { %17 = vsyncpa [#allocation11], 0 }
   0x4   :  { %18 = vsyncpa [#allocation14], 0  ;;  %s10269_s30 = smov [#allocation4]   ;;  %s10270_s11 = smov [#allocation7]  }
   0x5   :  { %s39_s10 = sshll.u32 %s10269_s30, 4  ;;  %s61_s12 = sshll.u32 %s10270_s11, 4  ;;  %s40_s10 = int_to_ptr.vmem [resolvable:$true] %s39_s10  ;;  %s62_s12 = int_to_ptr.vmem [resolvable:$true] %s61_s12 }
   0x6   :  { %s10083_s15 = scalar_lea.hbm %s10682_s2, 128 }
   0x7   :  { %p10084_p0 = scmp.ne.s32.totalorder %s10682_s2, %s10083_s15  ;;  %p10087_p1 = scmp.lt.u32.totalorder %s10083_s15, %s10682_s2 }
   0x9   :  { %p10089_p2 = pnand %p10087_p1, %p10084_p0 }
   0xb   :  { %10092 = shalt.err (!%p10089_p2)
}
   0xc   :  { %s10093_s20 = scalar_lea.vmem %s40_s10, 128  ;;  %p10098_p4 = scmp.lt.s32.totalorder %s40_s10, %s40_s10 }
   0xd   :  { %p10094_p3 = scmp.ne.s32.totalorder %s40_s10, %s10093_s20  ;;  %p10099_p5 = scmp.lt.s32.totalorder %s10093_s20, %s10093_s20 }
   0xf   :  { %p10100_p6 = por %p10099_p5, %p10098_p4 }
  0x11   :  { %p10101_p7 = pnand %p10100_p6, %p10094_p3 }
  0x13   :  { %10104 = shalt.err (!%p10101_p7)
}
  0x14   :  { %42 = dma.hbm_to_vmem [thread:$0]  %s10682_s2, 128, %s40_s10, [#allocation5]  }
  0x15   :  { %s10105_s25 = scalar_lea.hbm %s10684_s4, 128 }
  0x16   :  { %p10106_p8 = scmp.ne.s32.totalorder %s10684_s4, %s10105_s25  ;;  %p10109_p9 = scmp.lt.u32.totalorder %s10105_s25, %s10684_s4 }
  0x18   :  { %p10111_p10 = pnand %p10109_p9, %p10106_p8 }
  0x1a   :  { %10114 = shalt.err (!%p10111_p10)
}
  0x1b   :  { %s10115_s30 = scalar_lea.vmem %s62_s12, 128  ;;  %p10120_p12 = scmp.lt.s32.totalorder %s62_s12, %s62_s12 }
  0x1c   :  { %p10116_p11 = scmp.ne.s32.totalorder %s62_s12, %s10115_s30  ;;  %p10121_p13 = scmp.lt.s32.totalorder %s10115_s30, %s10115_s30 }
  0x1e   :  { %p10122_p0 = por %p10121_p13, %p10120_p12 }
  0x20   :  { %p10123_p1 = pnand %p10122_p0, %p10116_p11 }
  0x22   :  { %10126 = shalt.err (!%p10123_p1)
}
  0x23   :  { %64 = dma.hbm_to_vmem [thread:$0]  %s10684_s4, 128, %s62_s12, [#allocation8]  }
  0x24   :  { %s10271_s11 = smov [#allocation10]   ;;  %s10272_s14 = smov [#allocation2]  }
  0x25   :  { %s83_s13 = sshll.u32 %s10271_s11, 4  ;;  %s26_s15 = sshll.u32 %s10272_s14, 4  ;;  %s84_s13 = int_to_ptr.vmem [resolvable:$true] %s83_s13  ;;  %s10356_s15 = int_to_ptr.vmem [resolvable:$true] %s26_s15 }
  0x26   :  { %s10127_s18 = scalar_lea.hbm %s10686_s6, 128 }
  0x27   :  { %p10128_p2 = scmp.ne.s32.totalorder %s10686_s6, %s10127_s18  ;;  %p10131_p3 = scmp.lt.u32.totalorder %s10127_s18, %s10686_s6 }
  0x29   :  { %p10133_p4 = pnand %p10131_p3, %p10128_p2 }
  0x2b   :  { %10136 = shalt.err (!%p10133_p4)
}
  0x2c   :  { %s10137_s4 = scalar_lea.vmem %s84_s13, 128  ;;  %p10142_p6 = scmp.lt.s32.totalorder %s84_s13, %s84_s13 }
  0x2d   :  { %p10138_p5 = scmp.ne.s32.totalorder %s84_s13, %s10137_s4  ;;  %p10143_p7 = scmp.lt.s32.totalorder %s10137_s4, %s10137_s4 }
  0x2f   :  { %p10144_p8 = por %p10143_p7, %p10142_p6 }
  0x31   :  { %p10145_p9 = pnand %p10144_p8, %p10138_p5 }
  0x33   :  { %10148 = shalt.err (!%p10145_p9)
}
  0x34   :  { %86 = dma.hbm_to_vmem [thread:$0]  %s10686_s6, 128, %s84_s13, [#allocation11]  }
  0x35   :  { %s10149_s26 = scalar_lea.hbm %s10681_s1, 1024 }
  0x36   :  { %p10150_p10 = scmp.ne.s32.totalorder %s10681_s1, %s10149_s26  ;;  %p10153_p11 = scmp.lt.u32.totalorder %s10149_s26, %s10681_s1 }
  0x38   :  { %p10155_p12 = pnand %p10153_p11, %p10150_p10 }
  0x3a   :  { %10158 = shalt.err (!%p10155_p12)
}
  0x3b   :  { %s10159_s2 = scalar_lea.vmem %s10356_s15, 1024  ;;  %p10164_p0 = scmp.lt.s32.totalorder %s10356_s15, %s10356_s15 }
  0x3c   :  { %p10160_p13 = scmp.ne.s32.totalorder %s10356_s15, %s10159_s2  ;;  %p10165_p1 = scmp.lt.s32.totalorder %s10159_s2, %s10159_s2 }
  0x3e   :  { %p10166_p2 = por %p10165_p1, %p10164_p0 }
  0x40   :  { %p10167_p3 = pnand %p10166_p2, %p10160_p13 }
  0x42   :  { %10170 = shalt.err (!%p10167_p3)
}
  0x43   :  { %s10273_s6 = smov 512   ;;  %s10274_s10 = smov 32  }
  0x44   :  { %32 = dma.hbm_to_vmem [thread:$0]  %s10681_s1, 1024, %s10356_s15, [#allocation3], %s10273_s6, %s10273_s6, %s10274_s10  }
  0x45   :  { %s10275_s14 = smov [#allocation6]   ;;  %s10276_s17 = smov [#allocation9]  }
  0x46   :  { %s48_s16 = sshll.u32 %s10275_s14, 4  ;;  %s70_s18 = sshll.u32 %s10276_s17, 4  ;;  %s49_s16 = int_to_ptr.vmem [resolvable:$true] %s48_s16  ;;  %s10390_s18 = int_to_ptr.vmem [resolvable:$true] %s70_s18 }
  0x47   :  { %s10171_s21 = scalar_lea.hbm %s10683_s3, 65536 }
  0x48   :  { %p10172_p4 = scmp.ne.s32.totalorder %s10683_s3, %s10171_s21  ;;  %p10175_p5 = scmp.lt.u32.totalorder %s10171_s21, %s10683_s3 }
  0x4a   :  { %p10177_p6 = pnand %p10175_p5, %p10172_p4 }
  0x4c   :  { %10180 = shalt.err (!%p10177_p6)
}
  0x4d   :  { %s10181_s1 = scalar_lea.vmem %s49_s16, 65536  ;;  %p10186_p8 = scmp.lt.s32.totalorder %s49_s16, %s49_s16 }
  0x4e   :  { %p10182_p7 = scmp.ne.s32.totalorder %s49_s16, %s10181_s1  ;;  %p10187_p9 = scmp.lt.s32.totalorder %s10181_s1, %s10181_s1 }
  0x50   :  { %p10188_p10 = por %p10187_p9, %p10186_p8 }
  0x52   :  { %p10189_p11 = pnand %p10188_p10, %p10182_p7 }
  0x54   :  { %10192 = shalt.err (!%p10189_p11)
}
  0x55   :  { %54 = dma.hbm_to_vmem [thread:$0]  %s10683_s3, 65536, %s49_s16, [#allocation5], %s10273_s6, %s10273_s6, %s10274_s10  }
  0x56   :  { %s10193_s27 = scalar_lea.hbm %s10685_s5, 65536 }
  0x57   :  { %p10194_p12 = scmp.ne.s32.totalorder %s10685_s5, %s10193_s27  ;;  %p10197_p13 = scmp.lt.u32.totalorder %s10193_s27, %s10685_s5 }
  0x59   :  { %p10199_p0 = pnand %p10197_p13, %p10194_p12 }
  0x5b   :  { %10202 = shalt.err (!%p10199_p0)
}
  0x5c   :  { %s10203_s11 = scalar_lea.vmem %s10390_s18, 65536  ;;  %p10208_p2 = scmp.lt.s32.totalorder %s10390_s18, %s10390_s18 }
  0x5d   :  { %p10204_p1 = scmp.ne.s32.totalorder %s10390_s18, %s10203_s11  ;;  %p10209_p3 = scmp.lt.s32.totalorder %s10203_s11, %s10203_s11 }
  0x5f   :  { %p10210_p4 = por %p10209_p3, %p10208_p2 }
  0x61   :  { %p10211_p5 = pnand %p10210_p4, %p10204_p1 }
  0x63   :  { %10214 = shalt.err (!%p10211_p5)
}
  0x64   :  { %76 = dma.hbm_to_vmem [thread:$0]  %s10685_s5, 65536, %s10390_s18, [#allocation8], %s10273_s6, %s10273_s6, %s10274_s10  }
  0x65   :  { %s10277_s14 = smov [#allocation12]   ;;  %s10215_s20 = scalar_lea.hbm %s10687_s7, 8192 }
  0x66   :  { %s92_s16 = sshll.u32 %s10277_s14, 4  ;;  %p10216_p6 = scmp.ne.s32.totalorder %s10687_s7, %s10215_s20  ;;  %s93_s16 = int_to_ptr.vmem [resolvable:$true] %s92_s16 }
  0x67   :  { %p10219_p7 = scmp.lt.u32.totalorder %s10215_s20, %s10687_s7 }
  0x69   :  { %p10221_p8 = pnand %p10219_p7, %p10216_p6 }
  0x6b   :  { %10224 = shalt.err (!%p10221_p8)
}
  0x6c   :  { %s10225_s23 = scalar_lea.vmem %s93_s16, 8192  ;;  %p10230_p10 = scmp.lt.s32.totalorder %s93_s16, %s93_s16 }
  0x6d   :  { %p10226_p9 = scmp.ne.s32.totalorder %s93_s16, %s10225_s23  ;;  %p10231_p11 = scmp.lt.s32.totalorder %s10225_s23, %s10225_s23 }
  0x6f   :  { %p10232_p12 = por %p10231_p11, %p10230_p10 }
  0x71   :  { %p10233_p13 = pnand %p10232_p12, %p10226_p9 }
  0x73   :  { %10236 = shalt.err (!%p10233_p13)
}
  0x74   :  { %s10278_s5 = smov 64   ;;  %s10279_s6 = smov 4  }
  0x75   :  { %98 = dma.hbm_to_vmem [thread:$0]  %s10687_s7, 8192, %s93_s16, [#allocation11], %s10278_s5, %s10278_s5, %s10279_s6  }
  0x76   :  { %s10280_s1 = smov [#allocation13]   ;;  %s10237_s26 = scalar_lea.hbm %s10688_s8, 16 }
  0x77   :  { %s105_s15 = sshll.u32 %s10280_s1, 4  ;;  %p10238_p0 = scmp.ne.s32.totalorder %s10688_s8, %s10237_s26  ;;  %s106_s15 = int_to_ptr.vmem [resolvable:$true] %s105_s15 }
  0x78   :  { %p10241_p1 = scmp.lt.u32.totalorder %s10237_s26, %s10688_s8 }
  0x7a   :  { %p10243_p2 = pnand %p10241_p1, %p10238_p0 }
  0x7c   :  { %10246 = shalt.err (!%p10243_p2)
}
  0x7d   :  { %s10247_s2 = scalar_lea.vmem %s106_s15, 16  ;;  %s10251_s7 = scalar_lea.vmem %s106_s15, 32 }
  0x7e   :  { %p10248_p3 = scmp.ne.s32.totalorder %s106_s15, %s10247_s2  ;;  %p10252_p4 = scmp.lt.s32.totalorder %s106_s15, %s106_s15 }
  0x7f   :  { %p10253_p5 = scmp.lt.s32.totalorder %s10251_s7, %s10247_s2 }
  0x81   :  { %p10254_p6 = por %p10253_p5, %p10252_p4 }
  0x83   :  { %p10255_p7 = pnand %p10254_p6, %p10248_p3 }
  0x85   :  { %10258 = shalt.err (!%p10255_p7)
}
  0x86   :  { %108 = dma.hbm_to_vmem [thread:$0]  %s10688_s8, 16, %s106_s15, [#allocation14]  }
  0x87   :  { %10259 = dma.done.wait [#allocation3], 1024  }
  0x88   :  { %10260 = vsyncadd [#allocation3], 4294966272 }
  0x89   :  { %10261 = dma.done.wait [#allocation5], 65664  }
  0x8a   :  { %10262 = vsyncadd [#allocation5], 4294901632 }
  0x8b   :  { %10263 = dma.done.wait [#allocation8], 65664  }
  0x8c   :  { %10264 = vsyncadd [#allocation8], 4294901632 }
  0x8d   :  { %10265 = dma.done.wait [#allocation11], 8320  }
  0x8e   :  { %10266 = vsyncadd [#allocation11], 4294958976 }
  0x8f   :  { %10267 = dma.done.wait [#allocation14], 16  }
  0x90   :  { %10268 = vsyncadd [#allocation14], 4294967280  ;;  %v10281_v0 = vmov 0   ;;  %v136_v1 = vld [vmem:[#allocation2] sm:$0xff]  ;;  %v137_v6 = vld [vmem:[#allocation2 + $0x8] sm:$0xff]  ;;  %vm226_vm0 = vcmask 130048  }
  0x91   :  { %262 = vmatprep.mubr.bf16.mxu0 %v10281_v0  ;;  %303 = vmatprep.mubr.bf16.mxu1 %v10281_v0  ;;  %v140_v2 = vld [vmem:[#allocation2 + $0x20] sm:$0xff]  ;;  %v141_v7 = vld [vmem:[#allocation2 + $0x28] sm:$0xff]  ;;  %v138_v8 = vld [vmem:[#allocation2 + $0x10] sm:$0xff] }
  0x92   :  { %v134_v3 = vld [vmem:[%s10680_s0] sm:$0xff]  ;;  %v8704_v4 = vcombine.high %v136_v1, %v140_v2  ;;  %v8703_v5 = vcombine.low %v136_v1, %v140_v2  ;;  %v8706_v9 = vcombine.high %v137_v6, %v141_v7  ;;  %v8705_v10 = vcombine.low %v137_v6, %v141_v7  ;;  %v142_v11 = vld [vmem:[#allocation2 + $0x30] sm:$0xff]  ;;  %v139_v12 = vld [vmem:[#allocation2 + $0x18] sm:$0xff] }
  0x93   :  { %v143_v13 = vld [vmem:[#allocation2 + $0x38] sm:$0xff]  ;;  %v135_v14 = vpack.c.bf16 %v134_v3, %v134_v3  ;;  %v8708_v15 = vcombine.high %v138_v8, %v142_v11  ;;  %v410_v17 = vld [vmem:[#allocation6] sm:$0xff]  ;;  %v8707_v19 = vcombine.low %v138_v8, %v142_v11  ;;  %v411_v20 = vld [vmem:[#allocation6 + $0x8] sm:$0xff] }
  0x94   :  { %230 = vmatprep.subr.bf16.mxu0 %v8704_v4  ;;  %v8710_v16 = vcombine.high %v139_v12, %v143_v13  ;;  %v414_v18 = vld [vmem:[#allocation6 + $0x20] sm:$0xff]  ;;  %271 = vmatprep.subr.bf16.mxu1 %v8706_v9  ;;  %v415_v21 = vld [vmem:[#allocation6 + $0x28] sm:$0xff]  ;;  %v8709_v22 = vcombine.low %v139_v12, %v143_v13 }
  0x95   :  { %231 = vmatpush1.bf16.msra.mxu0 %v8703_v5  ;;  %272 = vmatpush1.bf16.msra.mxu1 %v8705_v10  ;;  %v8716_v23 = vcombine.high %v410_v17, %v414_v18  ;;  %v8718_v24 = vcombine.high %v411_v20, %v415_v21  ;;  %v418_v25 = vld [vmem:[#allocation6 + $0x40] sm:$0xff]  ;;  %v419_v27 = vld [vmem:[#allocation6 + $0x48] sm:$0xff]  ;;  %v8715_v29 = vcombine.low %v410_v17, %v414_v18 }
  0x96   :  { %312 = vmatprep.subr.bf16.mxu0 %v8708_v15  ;;  %353 = vmatprep.subr.bf16.mxu1 %v8710_v16  ;;  %v422_v26 = vld [vmem:[#allocation6 + $0x60] sm:$0xff]  ;;  %v423_v28 = vld [vmem:[#allocation6 + $0x68] sm:$0xff]  ;;  %v8717_v30 = vcombine.low %v411_v20, %v415_v21 }
  0x97   :  { %v8724_v31 = vcombine.high %v418_v25, %v422_v26  ;;  %v8726_v32 = vcombine.high %v419_v27, %v423_v28  ;;  %v426_v33 = vld [vmem:[#allocation6 + $0x80] sm:$0xff]  ;;  %v427_v35 = vld [vmem:[#allocation6 + $0x88] sm:$0xff]  ;;  %v8723_v37 = vcombine.low %v418_v25, %v422_v26  ;;  %v8725_v38 = vcombine.low %v419_v27, %v423_v28 }
  0x98   :  { %8711 = vmatmul.mubr.msk.bf16.vlgmr.msra.gmra.mrb[0].mxu0 %vm226_vm0, %v135_v14  ;;  %8712 = vmatmul.mubr.msk.bf16.vlgmr.msra.gmra.mrb[0].mxu1 %vm226_vm0, %v135_v14  ;;  %v430_v34 = vld [vmem:[#allocation6 + $0xa0] sm:$0xff]  ;;  %v431_v36 = vld [vmem:[#allocation6 + $0xa8] sm:$0xff] }
  0x99   :  { %313 = vmatpush1.bf16.msra.mxu0 %v8707_v19  ;;  %344 = vmatprep.mubr.bf16.mxu0 %v10281_v0  ;;  %v8732_v39 = vcombine.high %v426_v33, %v430_v34  ;;  %v8734_v40 = vcombine.high %v427_v35, %v431_v36  ;;  %v434_v41 = vld [vmem:[#allocation6 + $0xc0] sm:$0xff]  ;;  %v435_v43 = vld [vmem:[#allocation6 + $0xc8] sm:$0xff]  ;;  %v8731_v45 = vcombine.low %v426_v33, %v430_v34 }
  0x9a   :  { %354 = vmatpush1.bf16.msra.mxu1 %v8709_v22  ;;  %385 = vmatprep.mubr.bf16.mxu1 %v10281_v0  ;;  %v438_v42 = vld [vmem:[#allocation6 + $0xe0] sm:$0xff]  ;;  %v439_v44 = vld [vmem:[#allocation6 + $0xe8] sm:$0xff]  ;;  %v8733_v47 = vcombine.low %v427_v35, %v431_v36 }
  0x9b   :  { %3524 = vmatprep.subr.bf16.mxu0 %v8716_v23  ;;  %3688 = vmatprep.subr.bf16.mxu1 %v8718_v24  ;;  %v442_v46 = vld [vmem:[#allocation6 + $0x100] sm:$0xff]  ;;  %v8740_v48 = vcombine.high %v434_v41, %v438_v42  ;;  %v443_v50 = vld [vmem:[#allocation6 + $0x108] sm:$0xff]  ;;  %v8742_v52 = vcombine.high %v435_v43, %v439_v44  ;;  %v8739_v53 = vcombine.low %v434_v41, %v438_v42 }
  0x9c   :  { %v446_v49 = vld [vmem:[#allocation6 + $0x120] sm:$0xff]  ;;  %v447_v51 = vld [vmem:[#allocation6 + $0x128] sm:$0xff]  ;;  %v8741_v56 = vcombine.low %v435_v43, %v439_v44 }
  0x9d   :  { %v450_v54 = vld [vmem:[#allocation6 + $0x140] sm:$0xff]  ;;  %v8748_v57 = vcombine.high %v442_v46, %v446_v49  ;;  %v451_v58 = vld [vmem:[#allocation6 + $0x148] sm:$0xff]  ;;  %v8750_v60 = vcombine.high %v443_v50, %v447_v51  ;;  %v8747_v61 = vcombine.low %v442_v46, %v446_v49  ;;  %v8749_v0 = vcombine.low %v443_v50, %v447_v51 }
  0x9e   :  { %v454_v55 = vld [vmem:[#allocation6 + $0x160] sm:$0xff]  ;;  %v455_v59 = vld [vmem:[#allocation6 + $0x168] sm:$0xff] }
  0x9f   :  { %v458_v62 = vld [vmem:[#allocation6 + $0x180] sm:$0xff]  ;;  %v8756_v1 = vcombine.high %v450_v54, %v454_v55  ;;  %v459_v2 = vld [vmem:[#allocation6 + $0x188] sm:$0xff]  ;;  %v8758_v4 = vcombine.high %v451_v58, %v455_v59  ;;  %v8755_v5 = vcombine.low %v450_v54, %v454_v55  ;;  %v8757_v8 = vcombine.low %v451_v58, %v455_v59 }
  0xa0   :  { %8713 = vmatmul.mubr.msk.bf16.vlgmr.msra.gmra.mrb[4].mxu0 %vm226_vm0, %v135_v14  ;;  %8714 = vmatmul.mubr.msk.bf16.vlgmr.msra.gmra.mrb[4].mxu1 %vm226_vm0, %v135_v14  ;;  %v462_v63 = vld [vmem:[#allocation6 + $0x1a0] sm:$0xff]  ;;  %v463_v3 = vld [vmem:[#allocation6 + $0x1a8] sm:$0xff] }
  0xa1   :  { %3525 = vmatpush1.bf16.msra.mxu0 %v8715_v29  ;;  %3689 = vmatpush1.bf16.msra.mxu1 %v8717_v30  ;;  %v466_v6 = vld [vmem:[#allocation6 + $0x1c0] sm:$0xff]  ;;  %v8764_v9 = vcombine.high %v458_v62, %v462_v63  ;;  %v467_v10 = vld [vmem:[#allocation6 + $0x1c8] sm:$0xff]  ;;  %v8766_v12 = vcombine.high %v459_v2, %v463_v3  ;;  %v8763_v13 = vcombine.low %v458_v62, %v462_v63 }
  0xa2   :  { %3526 = vmatprep.subr.bf16.mxu0 %v8724_v31  ;;  %3690 = vmatprep.subr.bf16.mxu1 %v8726_v32  ;;  %v470_v7 = vld [vmem:[#allocation6 + $0x1e0] sm:$0xff]  ;;  %v471_v11 = vld [vmem:[#allocation6 + $0x1e8] sm:$0xff]  ;;  %v8765_v16 = vcombine.low %v459_v2, %v463_v3 }
  0xa3   :  { %v474_v14 = vld [vmem:[#allocation6 + $0x200] sm:$0xff]  ;;  %v8772_v17 = vcombine.high %v466_v6, %v470_v7  ;;  %v475_v18 = vld [vmem:[#allocation6 + $0x208] sm:$0xff]  ;;  %v8774_v20 = vcombine.high %v467_v10, %v471_v11  ;;  %v8771_v21 = vcombine.low %v466_v6, %v470_v7  ;;  %v8773_v24 = vcombine.low %v467_v10, %v471_v11 }
  0xa4   :  { %v478_v15 = vld [vmem:[#allocation6 + $0x220] sm:$0xff]  ;;  %v479_v19 = vld [vmem:[#allocation6 + $0x228] sm:$0xff] }
  0xa5   :  { %3527 = vmatpush1.bf16.msra.mxu0 %v8723_v37  ;;  %3691 = vmatpush1.bf16.msra.mxu1 %v8725_v38  ;;  %v482_v22 = vld [vmem:[#allocation6 + $0x240] sm:$0xff]  ;;  %v8780_v25 = vcombine.high %v474_v14, %v478_v15  ;;  %v483_v26 = vld [vmem:[#allocation6 + $0x248] sm:$0xff]  ;;  %v8782_v28 = vcombine.high %v475_v18, %v479_v19  ;;  %v8779_v29 = vcombine.low %v474_v14, %v478_v15 }
  0xa6   :  { %3528 = vmatprep.subr.bf16.mxu0 %v8732_v39  ;;  %3692 = vmatprep.subr.bf16.mxu1 %v8734_v40  ;;  %v486_v23 = vld [vmem:[#allocation6 + $0x260] sm:$0xff]  ;;  %v487_v27 = vld [vmem:[#allocation6 + $0x268] sm:$0xff]  ;;  %v8781_v32 = vcombine.low %v475_v18, %v479_v19 }
  0xa7   :  { %v490_v30 = vld [vmem:[#allocation6 + $0x280] sm:$0xff]  ;;  %v8788_v33 = vcombine.high %v482_v22, %v486_v23  ;;  %v491_v34 = vld [vmem:[#allocation6 + $0x288] sm:$0xff]  ;;  %v8790_v36 = vcombine.high %v483_v26, %v487_v27  ;;  %v8787_v37 = vcombine.low %v482_v22, %v486_v23  ;;  %v8789_v40 = vcombine.low %v483_v26, %v487_v27 }
  0xa8   :  { %v494_v31 = vld [vmem:[#allocation6 + $0x2a0] sm:$0xff]  ;;  %v495_v35 = vld [vmem:[#allocation6 + $0x2a8] sm:$0xff]  ;;  %v146_v27 = vlaneseq }
  0xa9   :  { %3529 = vmatpush1.bf16.msra.mxu0 %v8731_v45  ;;  %3693 = vmatpush1.bf16.msra.mxu1 %v8733_v47  ;;  %v498_v38 = vld [vmem:[#allocation6 + $0x2c0] sm:$0xff]  ;;  %v8796_v41 = vcombine.high %v490_v30, %v494_v31  ;;  %v499_v42 = vld [vmem:[#allocation6 + $0x2c8] sm:$0xff]  ;;  %v8798_v44 = vcombine.high %v491_v34, %v495_v35  ;;  %v8795_v45 = vcombine.low %v490_v30, %v494_v31  ;;  %v10463_v30 = vld [vmem:[#allocation4] sm:$0xff] }
  0xaa   :  { %3530 = vmatprep.subr.bf16.mxu0 %v8740_v48  ;;  %3694 = vmatprep.subr.bf16.mxu1 %v8742_v52  ;;  %v502_v39 = vld [vmem:[#allocation6 + $0x2e0] sm:$0xff]  ;;  %v503_v43 = vld [vmem:[#allocation6 + $0x2e8] sm:$0xff]  ;;  %v8797_v48 = vcombine.low %v491_v34, %v495_v35 }
  0xab   :  { %v506_v46 = vld [vmem:[#allocation6 + $0x300] sm:$0xff]  ;;  %v8804_v49 = vcombine.high %v498_v38, %v502_v39  ;;  %v507_v50 = vld [vmem:[#allocation6 + $0x308] sm:$0xff]  ;;  %v8806_v52 = vcombine.high %v499_v42, %v503_v43 }
  0xac   :  { %v510_v47 = vld [vmem:[#allocation6 + $0x320] sm:$0xff]  ;;  %v511_v51 = vld [vmem:[#allocation6 + $0x328] sm:$0xff] }
  0xad   :  { %3531 = vmatpush1.bf16.msra.mxu0 %v8739_v53  ;;  %3695 = vmatpush1.bf16.msra.mxu1 %v8741_v56  ;;  %v8803_v53 = vcombine.low %v498_v38, %v502_v39  ;;  %v514_v54 = vld [vmem:[#allocation6 + $0x340] sm:$0xff]  ;;  %v8805_v56 = vcombine.low %v499_v42, %v503_v43  ;;  %v515_v58 = vld [vmem:[#allocation6 + $0x348] sm:$0xff]  ;;  %v8813_v62 = vcombine.low %v507_v50, %v511_v51 }
  0xae   :  { %3532 = vmatprep.subr.bf16.mxu0 %v8748_v57  ;;  %3696 = vmatprep.subr.bf16.mxu1 %v8750_v60  ;;  %v518_v55 = vld [vmem:[#allocation6 + $0x360] sm:$0xff]  ;;  %v8812_v57 = vcombine.high %v506_v46, %v510_v47  ;;  %v519_v59 = vld [vmem:[#allocation6 + $0x368] sm:$0xff]  ;;  %v8814_v60 = vcombine.high %v507_v50, %v511_v51 }
  0xaf   :  { %v8820_v63 = vcombine.high %v514_v54, %v518_v55  ;;  %v8821_v2 = vcombine.low %v515_v58, %v519_v59  ;;  %v522_v3 = vld [vmem:[#allocation6 + $0x380] sm:$0xff]  ;;  %v527_v7 = vld [vmem:[#allocation6 + $0x3a8] sm:$0xff] }
  0xb0   :  { %v530_v11 = vld [vmem:[#allocation6 + $0x3c0] sm:$0xff]  ;;  %v535_v15 = vld [vmem:[#allocation6 + $0x3e8] sm:$0xff] }
  0xb1   :  { %3533 = vmatpush1.bf16.msra.mxu0 %v8747_v61  ;;  %3697 = vmatpush1.bf16.msra.mxu1 %v8749_v0  ;;  %v8811_v61 = vcombine.low %v506_v46, %v510_v47  ;;  %v8822_v0 = vcombine.high %v515_v58, %v519_v59  ;;  %v538_v19 = vld [vmem:[#allocation6 + $0x400] sm:$0xff]  ;;  %v543_v23 = vld [vmem:[#allocation6 + $0x428] sm:$0xff] }
  0xb2   :  { %3534 = vmatprep.subr.bf16.mxu0 %v8756_v1  ;;  %3698 = vmatprep.subr.bf16.mxu1 %v8758_v4  ;;  %v8819_v1 = vcombine.low %v514_v54, %v518_v55  ;;  %v526_v4 = vld [vmem:[#allocation6 + $0x3a0] sm:$0xff]  ;;  %v547_v50 = vld [vmem:[#allocation6 + $0x448] sm:$0xff] }
  0xb3   :  { %v8828_v6 = vcombine.high %v522_v3, %v526_v4  ;;  %v551_v51 = vld [vmem:[#allocation6 + $0x468] sm:$0xff]  ;;  %v554_v58 = vld [vmem:[#allocation6 + $0x480] sm:$0xff] }
  0xb4   :  { %v558_v59 = vld [vmem:[#allocation6 + $0x4a0] sm:$0xff] }
  0xb5   :  { %3535 = vmatpush1.bf16.msra.mxu0 %v8755_v5  ;;  %3699 = vmatpush1.bf16.msra.mxu1 %v8757_v8  ;;  %v523_v5 = vld [vmem:[#allocation6 + $0x388] sm:$0xff]  ;;  %v8827_v8 = vcombine.low %v522_v3, %v526_v4  ;;  %v8860_v4 = vcombine.high %v554_v58, %v558_v59 }
  0xb6   :  { %3536 = vmatprep.subr.bf16.mxu0 %v8764_v9  ;;  %3700 = vmatprep.subr.bf16.mxu1 %v8766_v12  ;;  %v8829_v9 = vcombine.low %v523_v5, %v527_v7  ;;  %v8830_v10 = vcombine.high %v523_v5, %v527_v7  ;;  %v534_v12 = vld [vmem:[#allocation6 + $0x3e0] sm:$0xff] }
  0xb7   :  { %v8836_v14 = vcombine.high %v530_v11, %v534_v12 }
  0xb9   :  { %3537 = vmatpush1.bf16.msra.mxu0 %v8763_v13  ;;  %3701 = vmatpush1.bf16.msra.mxu1 %v8765_v16  ;;  %v531_v13 = vld [vmem:[#allocation6 + $0x3c8] sm:$0xff]  ;;  %v8835_v16 = vcombine.low %v530_v11, %v534_v12  ;;  %v8859_v11 = vcombine.low %v554_v58, %v558_v59 }
  0xba   :  { %3538 = vmatprep.subr.bf16.mxu0 %v8772_v17  ;;  %3702 = vmatprep.subr.bf16.mxu1 %v8774_v20  ;;  %v8837_v17 = vcombine.low %v531_v13, %v535_v15  ;;  %v8838_v18 = vcombine.high %v531_v13, %v535_v15  ;;  %v542_v20 = vld [vmem:[#allocation6 + $0x420] sm:$0xff]  ;;  %v607_v58 = vld [vmem:[#allocation6 + $0x628] sm:$0xff] }
  0xbb   :  { %v8844_v22 = vcombine.high %v538_v19, %v542_v20  ;;  %v570_v15 = vld [vmem:[#allocation6 + $0x500] sm:$0xff] }
  0xbd   :  { %3539 = vmatpush1.bf16.msra.mxu0 %v8771_v21  ;;  %3703 = vmatpush1.bf16.msra.mxu1 %v8773_v24  ;;  %v539_v21 = vld [vmem:[#allocation6 + $0x408] sm:$0xff]  ;;  %v8843_v24 = vcombine.low %v538_v19, %v542_v20 }
  0xbe   :  { %3540 = vmatprep.subr.bf16.mxu0 %v8780_v25  ;;  %3704 = vmatprep.subr.bf16.mxu1 %v8782_v28  ;;  %v8845_v25 = vcombine.low %v539_v21, %v543_v23  ;;  %v8846_v26 = vcombine.high %v539_v21, %v543_v23  ;;  %v10458_v28 = vshrl.u32 %v146_v27, 7  ;;  %v578_v23 = vld [vmem:[#allocation6 + $0x540] sm:$0xff] }
  0xc0   :  { %v10466_v31 = vsub.s32 1, %v10458_v28 }
  0xc1   :  { %3541 = vmatpush1.bf16.msra.mxu0 %v8779_v29  ;;  %3705 = vmatpush1.bf16.msra.mxu1 %v8781_v32  ;;  %v10461_v29 = vsub.s32 0, %v10458_v28  ;;  %v10469_v32 = vsub.s32 3, %v10458_v28 }
  0xc2   :  { %3542 = vmatprep.subr.bf16.mxu0 %v8788_v33  ;;  %3706 = vmatprep.subr.bf16.mxu1 %v8790_v36  ;;  %v153_v34 = vrot.slane %v10463_v30, %v10466_v31 }
  0xc3   :  { %v149_v33 = vrot.slane %v10463_v30, %v10461_v29  ;;  %v161_v35 = vrot.slane %v10463_v30, %v10469_v32 }
  0xc5   :  { %3543 = vmatpush1.bf16.msra.mxu0 %v8787_v37  ;;  %3707 = vmatpush1.bf16.msra.mxu1 %v8789_v40 }
  0xc6   :  { %3544 = vmatprep.subr.bf16.mxu0 %v8796_v41  ;;  %3708 = vmatprep.subr.bf16.mxu1 %v8798_v44 }
  0xc9   :  { %3545 = vmatpush1.bf16.msra.mxu0 %v8795_v45  ;;  %3709 = vmatpush1.bf16.msra.mxu1 %v8797_v48  ;;  %v546_v45 = vld [vmem:[#allocation6 + $0x440] sm:$0xff] }
  0xca   :  { %3546 = vmatprep.subr.bf16.mxu0 %v8804_v49  ;;  %3710 = vmatprep.subr.bf16.mxu1 %v8806_v52  ;;  %v550_v49 = vld [vmem:[#allocation6 + $0x460] sm:$0xff] }
  0xcd   :  { %3547 = vmatpush1.bf16.msra.mxu0 %v8803_v53  ;;  %3711 = vmatpush1.bf16.msra.mxu1 %v8805_v56  ;;  %v8852_v56 = vcombine.high %v546_v45, %v550_v49 }
  0xce   :  { %3548 = vmatprep.subr.bf16.mxu0 %v8812_v57  ;;  %3712 = vmatprep.subr.bf16.mxu1 %v8814_v60  ;;  %v8854_v57 = vcombine.high %v547_v50, %v551_v51  ;;  %v555_v60 = vld [vmem:[#allocation6 + $0x488] sm:$0xff] }
  0xd1   :  { %3549 = vmatpush1.bf16.msra.mxu0 %v8811_v61  ;;  %3713 = vmatpush1.bf16.msra.mxu1 %v8813_v62  ;;  %v559_v61 = vld [vmem:[#allocation6 + $0x4a8] sm:$0xff] }
  0xd2   :  { %3550 = vmatprep.subr.bf16.mxu0 %v8820_v63  ;;  %3714 = vmatprep.subr.bf16.mxu1 %v8822_v0  ;;  %v8862_v5 = vcombine.high %v555_v60, %v559_v61  ;;  %v8861_v12 = vcombine.low %v555_v60, %v559_v61 }
  0xd5   :  { %3551 = vmatpush1.bf16.msra.mxu0 %v8819_v1  ;;  %3715 = vmatpush1.bf16.msra.mxu1 %v8821_v2  ;;  %v8851_v1 = vcombine.low %v546_v45, %v550_v49  ;;  %v8853_v2 = vcombine.low %v547_v50, %v551_v51  ;;  %v594_v45 = vld [vmem:[#allocation6 + $0x5c0] sm:$0xff] }
  0xd6   :  { %3552 = vmatprep.subr.bf16.mxu0 %v8828_v6  ;;  %3716 = vmatprep.subr.bf16.mxu1 %v8830_v10  ;;  %v562_v6 = vld [vmem:[#allocation6 + $0x4c0] sm:$0xff]  ;;  %v567_v10 = vld [vmem:[#allocation6 + $0x4e8] sm:$0xff] }
  0xd9   :  { %3553 = vmatpush1.bf16.msra.mxu0 %v8827_v8  ;;  %3717 = vmatpush1.bf16.msra.mxu1 %v8829_v9  ;;  %v566_v8 = vld [vmem:[#allocation6 + $0x4e0] sm:$0xff]  ;;  %v563_v9 = vld [vmem:[#allocation6 + $0x4c8] sm:$0xff] }
  0xda   :  { %3554 = vmatprep.subr.bf16.mxu0 %v8836_v14  ;;  %3718 = vmatprep.subr.bf16.mxu1 %v8838_v18  ;;  %v8868_v13 = vcombine.high %v562_v6, %v566_v8  ;;  %v8870_v14 = vcombine.high %v563_v9, %v567_v10  ;;  %v575_v18 = vld [vmem:[#allocation6 + $0x528] sm:$0xff]  ;;  %v8867_v19 = vcombine.low %v562_v6, %v566_v8 }
  0xdb   :  { %v8869_v20 = vcombine.low %v563_v9, %v567_v10  ;;  %v618_v10 = vld [vmem:[#allocation6 + $0x680] sm:$0xff] }
  0xdd   :  { %3555 = vmatpush1.bf16.msra.mxu0 %v8835_v16  ;;  %3719 = vmatpush1.bf16.msra.mxu1 %v8837_v17  ;;  %v574_v16 = vld [vmem:[#allocation6 + $0x520] sm:$0xff]  ;;  %v571_v17 = vld [vmem:[#allocation6 + $0x508] sm:$0xff] }
  0xde   :  { %3565 = vmatprep.subr.bf16.mxu0 %v8844_v22  ;;  %3729 = vmatprep.subr.bf16.mxu1 %v8846_v26  ;;  %v8876_v21 = vcombine.high %v570_v15, %v574_v16  ;;  %v8878_v22 = vcombine.high %v571_v17, %v575_v18  ;;  %v583_v26 = vld [vmem:[#allocation6 + $0x568] sm:$0xff]  ;;  %v8875_v27 = vcombine.low %v570_v15, %v574_v16 }
 0x16b   :  { %v264_v36 = vpop.f32.mrb[0].mxu0  ;;  %v10477_v39 = vpop.f32.mrb[0].mxu1 }
 0x16c   :  { %v265_v37 = vadd.f32 %v264_v36, %v149_v33  ;;  %v266_v38 = vpop.f32.mrb[1].mxu0  ;;  %v307_v42 = vpop.f32.mrb[1].mxu1  ;;  %v8877_v33 = vcombine.low %v571_v17, %v575_v18  ;;  %v586_v36 = vld [vmem:[#allocation6 + $0x580] sm:$0xff] }
 0x16d   :  { %v267_v40 = vadd.f32 %v266_v38, %v153_v34  ;;  %v268_v41 = vpop.f32.mrb[2].mxu0  ;;  %v308_v46 = vadd.f32 %v307_v42, %v161_v35  ;;  %v309_v47 = vpop.f32.mrb[2].mxu1  ;;  %v587_v38 = vld [vmem:[#allocation6 + $0x588] sm:$0xff]  ;;  %v626_v18 = vld [vmem:[#allocation6 + $0x6c0] sm:$0xff] }
 0x16e   :  { %v394_v43 = vmax.f32 %v265_v37, 0.0  ;;  %v269_v44 = vpop.f32.mrb[3].mxu0  ;;  %v310_v52 = vpop.f32.mrb[3].mxu1  ;;  %v590_v37 = vld [vmem:[#allocation6 + $0x5a0] sm:$0xff]  ;;  %v595_v47 = vld [vmem:[#allocation6 + $0x5c8] sm:$0xff] }
 0x16f   :  { %v395_v48 = vmax.f32 %v267_v40, 0.0  ;;  %v397_v53 = vmax.f32 %v308_v46, 0.0  ;;  %v591_v40 = vld [vmem:[#allocation6 + $0x5a8] sm:$0xff]  ;;  %v598_v46 = vld [vmem:[#allocation6 + $0x5e0] sm:$0xff]  ;;  %v8891_v49 = vcombine.low %v586_v36, %v590_v37 }
 0x170   :  { %v10481_v55 = vpack.c.bf16 %v394_v43, %v394_v43  ;;  %v8892_v43 = vcombine.high %v586_v36, %v590_v37  ;;  %v8894_v44 = vcombine.high %v587_v38, %v591_v40  ;;  %v8893_v50 = vcombine.low %v587_v38, %v591_v40  ;;  %v642_v40 = vld [vmem:[#allocation6 + $0x740] sm:$0xff] }
 0x171   :  { %v10479_v54 = vpack.c.bf16 %v395_v48, %v395_v48  ;;  %v10485_v62 = vpack.c.bf16 %v397_v53, %v397_v53  ;;  %v599_v48 = vld [vmem:[#allocation6 + $0x5e8] sm:$0xff]  ;;  %v8900_v51 = vcombine.high %v594_v45, %v598_v46  ;;  %v602_v53 = vld [vmem:[#allocation6 + $0x600] sm:$0xff]  ;;  %v8899_v59 = vcombine.low %v594_v45, %v598_v46 }
 0x172   :  { %v8902_v52 = vcombine.high %v595_v47, %v599_v48  ;;  %v8901_v60 = vcombine.low %v595_v47, %v599_v48 }
 0x173   :  { %3556 = vmatprep.mubr.bf16.mxu0 %v10479_v54  ;;  %3720 = vmatprep.mubr.bf16.mxu1 %v10479_v54  ;;  %v10487_v63 = vpop.f32.mrb[4].mxu0  ;;  %v10498_v47 = vpop.f32.mrb[4].mxu1 }
 0x174   :  { %3557 = vmatmul.mubr.bf16.vlgmr.msra.gmra.mrb[8].mxu0 %v10481_v55  ;;  %3721 = vmatmul.mubr.bf16.vlgmr.msra.gmra.mrb[8].mxu1 %v10481_v55  ;;  %v10491_v0 = vpop.f32.mrb[5].mxu0 }
 0x175   :  { %3566 = vmatpush1.bf16.msra.mxu0 %v8843_v24  ;;  %3730 = vmatpush1.bf16.msra.mxu1 %v8845_v25  ;;  %v350_v3 = vpop.f32.mrb[6].mxu0  ;;  %v582_v24 = vld [vmem:[#allocation6 + $0x560] sm:$0xff]  ;;  %v579_v25 = vld [vmem:[#allocation6 + $0x548] sm:$0xff] }
 0x176   :  { %3567 = vmatprep.subr.bf16.mxu0 %v8852_v56  ;;  %3731 = vmatprep.subr.bf16.mxu1 %v8854_v57  ;;  %v351_v7 = vpop.f32.mrb[7].mxu0  ;;  %v8884_v34 = vcombine.high %v578_v23, %v582_v24  ;;  %v8886_v35 = vcombine.high %v579_v25, %v583_v26  ;;  %v8883_v41 = vcombine.low %v578_v23, %v582_v24  ;;  %v606_v56 = vld [vmem:[#allocation6 + $0x620] sm:$0xff]  ;;  %v603_v57 = vld [vmem:[#allocation6 + $0x608] sm:$0xff] }
 0x177   :  { %3597 = vmatprep.mubr.bf16.mxu0 %v10485_v62  ;;  %3761 = vmatprep.mubr.bf16.mxu1 %v10485_v62  ;;  %v8885_v42 = vcombine.low %v579_v25, %v583_v26  ;;  %v8908_v61 = vcombine.high %v602_v53, %v606_v56  ;;  %v614_v3 = vld [vmem:[#allocation6 + $0x660] sm:$0xff]  ;;  %v8907_v6 = vcombine.low %v602_v53, %v606_v56  ;;  %v651_v53 = vld [vmem:[#allocation6 + $0x788] sm:$0xff] }
 0x178   :  { %v8909_v7 = vcombine.low %v603_v57, %v607_v58  ;;  %v634_v26 = vld [vmem:[#allocation6 + $0x700] sm:$0xff]  ;;  %v655_v56 = vld [vmem:[#allocation6 + $0x7a8] sm:$0xff] }
 0x179   :  { %3568 = vmatpush1.bf16.msra.mxu0 %v8851_v1  ;;  %3732 = vmatpush1.bf16.msra.mxu1 %v8853_v2  ;;  %v8910_v1 = vcombine.high %v603_v57, %v607_v58  ;;  %v610_v2 = vld [vmem:[#allocation6 + $0x640] sm:$0xff]  ;;  %v10503_v57 = vsub.s32 5, %v10458_v28 }
 0x17a   :  { %3569 = vmatprep.subr.bf16.mxu0 %v8860_v4  ;;  %3733 = vmatprep.subr.bf16.mxu1 %v8862_v5  ;;  %v611_v4 = vld [vmem:[#allocation6 + $0x648] sm:$0xff]  ;;  %v8916_v8 = vcombine.high %v610_v2, %v614_v3 }
 0x17b   :  { %v615_v5 = vld [vmem:[#allocation6 + $0x668] sm:$0xff] }
 0x17c   :  { %v8918_v9 = vcombine.high %v611_v4, %v615_v5  ;;  %v8917_v15 = vcombine.low %v611_v4, %v615_v5  ;;  %v658_v4 = vld [vmem:[#allocation6 + $0x7c0] sm:$0xff] }
 0x17d   :  { %3570 = vmatpush1.bf16.msra.mxu0 %v8859_v11  ;;  %3734 = vmatpush1.bf16.msra.mxu1 %v8861_v12  ;;  %v622_v11 = vld [vmem:[#allocation6 + $0x6a0] sm:$0xff]  ;;  %v619_v12 = vld [vmem:[#allocation6 + $0x688] sm:$0xff] }
 0x17e   :  { %3571 = vmatprep.subr.bf16.mxu0 %v8868_v13  ;;  %3735 = vmatprep.subr.bf16.mxu1 %v8870_v14  ;;  %v623_v13 = vld [vmem:[#allocation6 + $0x6a8] sm:$0xff]  ;;  %v8915_v14 = vcombine.low %v610_v2, %v614_v3  ;;  %v8924_v16 = vcombine.high %v618_v10, %v622_v11  ;;  %v8958_v3 = vcombine.high %v651_v53, %v655_v56  ;;  %v662_v5 = vld [vmem:[#allocation6 + $0x7e0] sm:$0xff] }
 0x17f   :  { %v8926_v17 = vcombine.high %v619_v12, %v623_v13  ;;  %v8925_v23 = vcombine.low %v619_v12, %v623_v13  ;;  %v8964_v12 = vcombine.high %v658_v4, %v662_v5 }
 0x181   :  { %3572 = vmatpush1.bf16.msra.mxu0 %v8867_v19  ;;  %3736 = vmatpush1.bf16.msra.mxu1 %v8869_v20  ;;  %v630_v19 = vld [vmem:[#allocation6 + $0x6e0] sm:$0xff]  ;;  %v627_v20 = vld [vmem:[#allocation6 + $0x6c8] sm:$0xff] }
 0x182   :  { %3573 = vmatprep.subr.bf16.mxu0 %v8876_v21  ;;  %3737 = vmatprep.subr.bf16.mxu1 %v8878_v22  ;;  %v631_v21 = vld [vmem:[#allocation6 + $0x6e8] sm:$0xff]  ;;  %v8923_v22 = vcombine.low %v618_v10, %v622_v11  ;;  %v8932_v24 = vcombine.high %v626_v18, %v630_v19  ;;  %v8957_v11 = vcombine.low %v651_v53, %v655_v56 }
 0x183   :  { %v8934_v25 = vcombine.high %v627_v20, %v631_v21  ;;  %v8933_v36 = vcombine.low %v627_v20, %v631_v21  ;;  %v8963_v20 = vcombine.low %v658_v4, %v662_v5  ;;  %v695_v53 = vld [vmem:[#allocation6 + $0x8e8] sm:$0xff] }
 0x185   :  { %3574 = vmatpush1.bf16.msra.mxu0 %v8875_v27  ;;  %3738 = vmatpush1.bf16.msra.mxu1 %v8877_v33  ;;  %v638_v27 = vld [vmem:[#allocation6 + $0x720] sm:$0xff]  ;;  %v635_v33 = vld [vmem:[#allocation6 + $0x708] sm:$0xff] }
 0x186   :  { %3575 = vmatprep.subr.bf16.mxu0 %v8884_v34  ;;  %3739 = vmatprep.subr.bf16.mxu1 %v8886_v35  ;;  %v639_v34 = vld [vmem:[#allocation6 + $0x728] sm:$0xff]  ;;  %v8931_v35 = vcombine.low %v626_v18, %v630_v19  ;;  %v8940_v37 = vcombine.high %v634_v26, %v638_v27  ;;  %v8939_v45 = vcombine.low %v634_v26, %v638_v27 }
 0x187   :  { %v8942_v38 = vcombine.high %v635_v33, %v639_v34  ;;  %v8941_v46 = vcombine.low %v635_v33, %v639_v34  ;;  %v679_v26 = vld [vmem:[#allocation6 + $0x868] sm:$0xff] }
 0x189   :  { %3576 = vmatpush1.bf16.msra.mxu0 %v8883_v41  ;;  %3740 = vmatpush1.bf16.msra.mxu1 %v8885_v42  ;;  %v646_v41 = vld [vmem:[#allocation6 + $0x760] sm:$0xff]  ;;  %v643_v42 = vld [vmem:[#allocation6 + $0x748] sm:$0xff] }
 0x18a   :  { %3577 = vmatprep.subr.bf16.mxu0 %v8892_v43  ;;  %3741 = vmatprep.subr.bf16.mxu1 %v8894_v44  ;;  %v647_v43 = vld [vmem:[#allocation6 + $0x768] sm:$0xff]  ;;  %v10496_v44 = vsub.s32 2, %v10458_v28  ;;  %v8948_v48 = vcombine.high %v642_v40, %v646_v41 }
 0x18d   :  { %3578 = vmatpush1.bf16.msra.mxu0 %v8891_v49  ;;  %3742 = vmatpush1.bf16.msra.mxu1 %v8893_v50  ;;  %v8950_v49 = vcombine.high %v643_v42, %v647_v43  ;;  %v650_v50 = vld [vmem:[#allocation6 + $0x780] sm:$0xff] }
 0x18e   :  { %3579 = vmatprep.subr.bf16.mxu0 %v8900_v51  ;;  %3743 = vmatprep.subr.bf16.mxu1 %v8902_v52  ;;  %v10500_v51 = vpop.f32.mrb[5].mxu1  ;;  %v654_v52 = vld [vmem:[#allocation6 + $0x7a0] sm:$0xff] }
 0x18f   :  { %v391_v58 = vpop.f32.mrb[6].mxu1  ;;  %v8956_v2 = vcombine.high %v650_v50, %v654_v52  ;;  %v8955_v10 = vcombine.low %v650_v50, %v654_v52  ;;  %v694_v50 = vld [vmem:[#allocation6 + $0x8e0] sm:$0xff]  ;;  %v691_v52 = vld [vmem:[#allocation6 + $0x8c8] sm:$0xff] }
 0x190   :  { %v8997_v5 = vcombine.low %v691_v52, %v695_v53 }
 0x191   :  { %3580 = vmatpush1.bf16.msra.mxu0 %v8899_v59  ;;  %3744 = vmatpush1.bf16.msra.mxu1 %v8901_v60  ;;  %v157_v59 = vrot.slane %v10463_v30, %v10496_v44  ;;  %v392_v60 = vpop.f32.mrb[7].mxu1 }
 0x192   :  { %3581 = vmatprep.subr.bf16.mxu0 %v8908_v61  ;;  %3745 = vmatprep.subr.bf16.mxu1 %v8910_v1  ;;  %v8947_v61 = vcombine.low %v642_v40, %v646_v41  ;;  %v8949_v1 = vcombine.low %v643_v42, %v647_v43  ;;  %v683_v40 = vld [vmem:[#allocation6 + $0x888] sm:$0xff]  ;;  %v8998_v60 = vcombine.high %v691_v52, %v695_v53 }
 0x193   :  { %v687_v41 = vld [vmem:[#allocation6 + $0x8a8] sm:$0xff] }
 0x194   :  { %v8989_v58 = vcombine.low %v683_v40, %v687_v41  ;;  %v743_v52 = vld [vmem:[#allocation6 + $0xa68] sm:$0xff] }
 0x195   :  { %3582 = vmatpush1.bf16.msra.mxu0 %v8907_v6  ;;  %3746 = vmatpush1.bf16.msra.mxu1 %v8909_v7  ;;  %v659_v6 = vld [vmem:[#allocation6 + $0x7c8] sm:$0xff] }
 0x196   :  { %3583 = vmatprep.subr.bf16.mxu0 %v8916_v8  ;;  %3747 = vmatprep.subr.bf16.mxu1 %v8918_v9  ;;  %v663_v7 = vld [vmem:[#allocation6 + $0x7e8] sm:$0xff]  ;;  %v169_v8 = vrot.slane %v10463_v30, %v10503_v57  ;;  %v306_v9 = vadd.f32 %v10477_v39, %v157_v59 }
 0x197   :  { %v8966_v13 = vcombine.high %v659_v6, %v663_v7  ;;  %v8965_v21 = vcombine.low %v659_v6, %v663_v7 }
 0x198   :  { %v349_v18 = vadd.f32 %v10491_v0, %v169_v8  ;;  %v396_v19 = vmax.f32 %v306_v9, 0.0  ;;  %v706_v8 = vld [vmem:[#allocation6 + $0x940] sm:$0xff] }
 0x199   :  { %3584 = vmatpush1.bf16.msra.mxu0 %v8915_v14  ;;  %3748 = vmatpush1.bf16.msra.mxu1 %v8917_v15  ;;  %v666_v14 = vld [vmem:[#allocation6 + $0x800] sm:$0xff] }
 0x19a   :  { %3585 = vmatprep.subr.bf16.mxu0 %v8924_v16  ;;  %3749 = vmatprep.subr.bf16.mxu1 %v8926_v17  ;;  %v670_v15 = vld [vmem:[#allocation6 + $0x820] sm:$0xff]  ;;  %v667_v16 = vld [vmem:[#allocation6 + $0x808] sm:$0xff]  ;;  %v399_v27 = vmax.f32 %v349_v18, 0.0  ;;  %v10511_v33 = vpack.c.bf16 %v396_v19, %v396_v19 }
 0x19b   :  { %v671_v17 = vld [vmem:[#allocation6 + $0x828] sm:$0xff]  ;;  %v8972_v39 = vcombine.high %v666_v14, %v670_v15  ;;  %v8971_v34 = vcombine.low %v666_v14, %v670_v15  ;;  %v710_v9 = vld [vmem:[#allocation6 + $0x960] sm:$0xff] }
 0x19c   :  { %v8973_v0 = vcombine.low %v667_v16, %v671_v17  ;;  %v10513_v42 = vpack.c.bf16 %v399_v27, %v399_v27  ;;  %v9012_v14 = vcombine.high %v706_v8, %v710_v9  ;;  %v715_v18 = vld [vmem:[#allocation6 + $0x988] sm:$0xff] }
 0x19d   :  { %3586 = vmatpush1.bf16.msra.mxu0 %v8923_v22  ;;  %3750 = vmatpush1.bf16.msra.mxu1 %v8925_v23  ;;  %v8974_v22 = vcombine.high %v667_v16, %v671_v17  ;;  %v674_v23 = vld [vmem:[#allocation6 + $0x840] sm:$0xff]  ;;  %v719_v19 = vld [vmem:[#allocation6 + $0x9a8] sm:$0xff] }
 0x19e   :  { %3587 = vmatprep.subr.bf16.mxu0 %v8932_v24  ;;  %3751 = vmatprep.subr.bf16.mxu1 %v8934_v25  ;;  %v678_v24 = vld [vmem:[#allocation6 + $0x860] sm:$0xff]  ;;  %v675_v25 = vld [vmem:[#allocation6 + $0x848] sm:$0xff] }
 0x19f   :  { %v8979_v43 = vcombine.low %v674_v23, %v678_v24  ;;  %v714_v16 = vld [vmem:[#allocation6 + $0x980] sm:$0xff] }
 0x1a0   :  { %v718_v17 = vld [vmem:[#allocation6 + $0x9a0] sm:$0xff] }
 0x1a1   :  { %3588 = vmatpush1.bf16.msra.mxu0 %v8931_v35  ;;  %3752 = vmatpush1.bf16.msra.mxu1 %v8933_v36  ;;  %v8980_v35 = vcombine.high %v674_v23, %v678_v24  ;;  %v8982_v36 = vcombine.high %v675_v25, %v679_v26  ;;  %v722_v23 = vld [vmem:[#allocation6 + $0x9c0] sm:$0xff]  ;;  %v9019_v27 = vcombine.low %v714_v16, %v718_v17 }
 0x1a2   :  { %3589 = vmatprep.subr.bf16.mxu0 %v8940_v37  ;;  %3753 = vmatprep.subr.bf16.mxu1 %v8942_v38  ;;  %v682_v37 = vld [vmem:[#allocation6 + $0x880] sm:$0xff] }
 0x1a3   :  { %v686_v38 = vld [vmem:[#allocation6 + $0x8a0] sm:$0xff] }
 0x1a4   :  { %v8987_v56 = vcombine.low %v682_v37, %v686_v38  ;;  %v726_v24 = vld [vmem:[#allocation6 + $0x9e0] sm:$0xff] }
 0x1a5   :  { %3590 = vmatpush1.bf16.msra.mxu0 %v8939_v45  ;;  %3754 = vmatpush1.bf16.msra.mxu1 %v8941_v46  ;;  %v8981_v45 = vcombine.low %v675_v25, %v679_v26  ;;  %v8988_v46 = vcombine.high %v682_v37, %v686_v38  ;;  %v723_v25 = vld [vmem:[#allocation6 + $0x9c8] sm:$0xff]  ;;  %v734_v37 = vld [vmem:[#allocation6 + $0xa20] sm:$0xff] }
 0x1a6   :  { %3591 = vmatprep.subr.bf16.mxu0 %v8948_v48  ;;  %3755 = vmatprep.subr.bf16.mxu1 %v8950_v49  ;;  %v8990_v48 = vcombine.high %v683_v40, %v687_v41  ;;  %v690_v49 = vld [vmem:[#allocation6 + $0x8c0] sm:$0xff]  ;;  %v727_v26 = vld [vmem:[#allocation6 + $0x9e8] sm:$0xff]  ;;  %v9027_v41 = vcombine.low %v722_v23, %v726_v24 }
 0x1a7   :  { %v8996_v59 = vcombine.high %v690_v49, %v694_v50  ;;  %v8995_v4 = vcombine.low %v690_v49, %v694_v50  ;;  %v731_v38 = vld [vmem:[#allocation6 + $0xa08] sm:$0xff]  ;;  %v742_v49 = vld [vmem:[#allocation6 + $0xa60] sm:$0xff] }
 0x1a8   :  { %v735_v40 = vld [vmem:[#allocation6 + $0xa28] sm:$0xff] }
 0x1a9   :  { %3592 = vmatpush1.bf16.msra.mxu0 %v8947_v61  ;;  %3756 = vmatpush1.bf16.msra.mxu1 %v8949_v1  ;;  %v698_v61 = vld [vmem:[#allocation6 + $0x900] sm:$0xff]  ;;  %v739_v50 = vld [vmem:[#allocation6 + $0xa48] sm:$0xff] }
 0x1aa   :  { %3593 = vmatprep.subr.bf16.mxu0 %v8956_v2  ;;  %3757 = vmatprep.subr.bf16.mxu1 %v8958_v3  ;;  %v702_v1 = vld [vmem:[#allocation6 + $0x920] sm:$0xff]  ;;  %v699_v2 = vld [vmem:[#allocation6 + $0x908] sm:$0xff] }
 0x1ab   :  { %v703_v3 = vld [vmem:[#allocation6 + $0x928] sm:$0xff]  ;;  %v9004_v6 = vcombine.high %v698_v61, %v702_v1 }
 0x1ac   :  { %v9006_v7 = vcombine.high %v699_v2, %v703_v3 }
 0x1ad   :  { %3594 = vmatpush1.bf16.msra.mxu0 %v8955_v10  ;;  %3758 = vmatpush1.bf16.msra.mxu1 %v8957_v11  ;;  %v707_v10 = vld [vmem:[#allocation6 + $0x948] sm:$0xff] }
 0x1ae   :  { %3595 = vmatprep.subr.bf16.mxu0 %v8964_v12  ;;  %3759 = vmatprep.subr.bf16.mxu1 %v8966_v13  ;;  %v711_v11 = vld [vmem:[#allocation6 + $0x968] sm:$0xff]  ;;  %v9003_v12 = vcombine.low %v698_v61, %v702_v1  ;;  %v9005_v13 = vcombine.low %v699_v2, %v703_v3  ;;  %v750_v61 = vld [vmem:[#allocation6 + $0xaa0] sm:$0xff] }
 0x1af   :  { %v9014_v15 = vcombine.high %v707_v10, %v711_v11  ;;  %v747_v1 = vld [vmem:[#allocation6 + $0xa88] sm:$0xff] }
 0x1b0   :  { %v751_v2 = vld [vmem:[#allocation6 + $0xaa8] sm:$0xff] }
 0x1b1   :  { %3596 = vmatpush1.bf16.msra.mxu0 %v8963_v20  ;;  %3760 = vmatpush1.bf16.msra.mxu1 %v8965_v21  ;;  %v9011_v20 = vcombine.low %v706_v8, %v710_v9  ;;  %v9013_v21 = vcombine.low %v707_v10, %v711_v11  ;;  %v758_v8 = vld [vmem:[#allocation6 + $0xae0] sm:$0xff]  ;;  %v755_v9 = vld [vmem:[#allocation6 + $0xac8] sm:$0xff] }
 0x1b2   :  { %3606 = vmatprep.subr.bf16.mxu0 %v8972_v39  ;;  %3770 = vmatprep.subr.bf16.mxu1 %v8974_v22  ;;  %v9020_v39 = vcombine.high %v714_v16, %v718_v17  ;;  %v9022_v22 = vcombine.high %v715_v18, %v719_v19  ;;  %v759_v10 = vld [vmem:[#allocation6 + $0xae8] sm:$0xff]  ;;  %v766_v16 = vld [vmem:[#allocation6 + $0xb20] sm:$0xff] }
 0x1b3   :  { %v763_v17 = vld [vmem:[#allocation6 + $0xb08] sm:$0xff] }
 0x1b4   :  { %3598 = vmatmul.mubr.bf16.vlgmr.msra.gmra.mrb[8].mxu0 %v10511_v33  ;;  %3762 = vmatmul.mubr.bf16.vlgmr.msra.gmra.mrb[8].mxu1 %v10511_v33 }
 0x1b5   :  { %3607 = vmatpush1.bf16.msra.mxu0 %v8971_v34  ;;  %3771 = vmatpush1.bf16.msra.mxu1 %v8973_v0  ;;  %v9021_v34 = vcombine.low %v715_v18, %v719_v19  ;;  %v9028_v0 = vcombine.high %v722_v23, %v726_v24  ;;  %v767_v18 = vld [vmem:[#allocation6 + $0xb28] sm:$0xff]  ;;  %v774_v23 = vld [vmem:[#allocation6 + $0xb60] sm:$0xff] }
 0x1b6   :  { %3608 = vmatprep.subr.bf16.mxu0 %v8980_v35  ;;  %3772 = vmatprep.subr.bf16.mxu1 %v8982_v36  ;;  %v9030_v35 = vcombine.high %v723_v25, %v727_v26  ;;  %v730_v36 = vld [vmem:[#allocation6 + $0xa00] sm:$0xff]  ;;  %v771_v24 = vld [vmem:[#allocation6 + $0xb48] sm:$0xff] }
 0x1b7   :  { %3638 = vmatprep.mubr.bf16.mxu0 %v10513_v42  ;;  %3802 = vmatprep.mubr.bf16.mxu1 %v10513_v42  ;;  %v9035_v53 = vcombine.low %v730_v36, %v734_v37 }
 0x1b9   :  { %3609 = vmatpush1.bf16.msra.mxu0 %v8979_v43  ;;  %3773 = vmatpush1.bf16.msra.mxu1 %v8981_v45  ;;  %v9029_v43 = vcombine.low %v723_v25, %v727_v26  ;;  %v9036_v45 = vcombine.high %v730_v36, %v734_v37  ;;  %v775_v25 = vld [vmem:[#allocation6 + $0xb68] sm:$0xff]  ;;  %v10520_v26 = vsub.s32 4, %v10458_v28  ;;  %v778_v36 = vld [vmem:[#allocation6 + $0xb80] sm:$0xff] }
 0x1ba   :  { %3610 = vmatprep.subr.bf16.mxu0 %v8988_v46  ;;  %3774 = vmatprep.subr.bf16.mxu1 %v8990_v48  ;;  %v9038_v46 = vcombine.high %v731_v38, %v735_v40  ;;  %v738_v48 = vld [vmem:[#allocation6 + $0xa40] sm:$0xff] }
 0x1bb   :  { %v9043_v3 = vcombine.low %v738_v48, %v742_v49  ;;  %v782_v37 = vld [vmem:[#allocation6 + $0xba0] sm:$0xff] }
 0x1bd   :  { %3611 = vmatpush1.bf16.msra.mxu0 %v8987_v56  ;;  %3775 = vmatpush1.bf16.msra.mxu1 %v8989_v58  ;;  %v9037_v56 = vcombine.low %v731_v38, %v735_v40  ;;  %v9044_v58 = vcombine.high %v738_v48, %v742_v49  ;;  %v779_v38 = vld [vmem:[#allocation6 + $0xb88] sm:$0xff]  ;;  %v9084_v48 = vcombine.high %v778_v36, %v782_v37 }
 0x1be   :  { %3612 = vmatprep.subr.bf16.mxu0 %v8996_v59  ;;  %3776 = vmatprep.subr.bf16.mxu1 %v8998_v60  ;;  %v9046_v59 = vcombine.high %v739_v50, %v743_v52  ;;  %v746_v60 = vld [vmem:[#allocation6 + $0xa80] sm:$0xff]  ;;  %v783_v40 = vld [vmem:[#allocation6 + $0xba8] sm:$0xff] }
 0x1bf   :  { %v9051_v11 = vcombine.low %v746_v60, %v750_v61  ;;  %v9086_v49 = vcombine.high %v779_v38, %v783_v40 }
 0x1c1   :  { %3613 = vmatpush1.bf16.msra.mxu0 %v8995_v4  ;;  %3777 = vmatpush1.bf16.msra.mxu1 %v8997_v5  ;;  %v9045_v4 = vcombine.low %v739_v50, %v743_v52  ;;  %v9052_v5 = vcombine.high %v746_v60, %v750_v61  ;;  %v786_v50 = vld [vmem:[#allocation6 + $0xbc0] sm:$0xff]  ;;  %v9083_v60 = vcombine.low %v778_v36, %v782_v37  ;;  %v819_v36 = vld [vmem:[#allocation6 + $0xcc8] sm:$0xff] }
 0x1c2   :  { %3614 = vmatprep.subr.bf16.mxu0 %v9004_v6  ;;  %3778 = vmatprep.subr.bf16.mxu1 %v9006_v7  ;;  %v9054_v6 = vcombine.high %v747_v1, %v751_v2  ;;  %v754_v7 = vld [vmem:[#allocation6 + $0xac0] sm:$0xff]  ;;  %v9085_v61 = vcombine.low %v779_v38, %v783_v40  ;;  %v823_v37 = vld [vmem:[#allocation6 + $0xce8] sm:$0xff] }
 0x1c3   :  { %v9059_v19 = vcombine.low %v754_v7, %v758_v8  ;;  %v790_v52 = vld [vmem:[#allocation6 + $0xbe0] sm:$0xff] }
 0x1c5   :  { %3615 = vmatpush1.bf16.msra.mxu0 %v9003_v12  ;;  %3779 = vmatpush1.bf16.msra.mxu1 %v9005_v13  ;;  %v9053_v12 = vcombine.low %v747_v1, %v751_v2  ;;  %v9060_v13 = vcombine.high %v754_v7, %v758_v8  ;;  %v9092_v1 = vcombine.high %v786_v50, %v790_v52 }
 0x1c6   :  { %3616 = vmatprep.subr.bf16.mxu0 %v9012_v14  ;;  %3780 = vmatprep.subr.bf16.mxu1 %v9014_v15  ;;  %v9062_v14 = vcombine.high %v755_v9, %v759_v10  ;;  %v762_v15 = vld [vmem:[#allocation6 + $0xb00] sm:$0xff] }
 0x1c9   :  { %3617 = vmatpush1.bf16.msra.mxu0 %v9011_v20  ;;  %3781 = vmatpush1.bf16.msra.mxu1 %v9013_v21  ;;  %v9061_v20 = vcombine.low %v755_v9, %v759_v10  ;;  %v9068_v21 = vcombine.high %v762_v15, %v766_v16 }
 0x1ca   :  { %3618 = vmatprep.subr.bf16.mxu0 %v9020_v39  ;;  %3782 = vmatprep.subr.bf16.mxu1 %v9022_v22  ;;  %v9070_v39 = vcombine.high %v763_v17, %v767_v18  ;;  %v770_v22 = vld [vmem:[#allocation6 + $0xb40] sm:$0xff] }
 0x1cd   :  { %3619 = vmatpush1.bf16.msra.mxu0 %v9019_v27  ;;  %3783 = vmatpush1.bf16.msra.mxu1 %v9021_v34  ;;  %v9067_v27 = vcombine.low %v762_v15, %v766_v16  ;;  %v9069_v34 = vcombine.low %v763_v17, %v767_v18 }
 0x1ce   :  { %3620 = vmatprep.subr.bf16.mxu0 %v9028_v0  ;;  %3784 = vmatprep.subr.bf16.mxu1 %v9030_v35  ;;  %v9076_v0 = vcombine.high %v770_v22, %v774_v23  ;;  %v9078_v35 = vcombine.high %v771_v24, %v775_v25 }
 0x1d1   :  { %3621 = vmatpush1.bf16.msra.mxu0 %v9027_v41  ;;  %3785 = vmatpush1.bf16.msra.mxu1 %v9029_v43  ;;  %v10523_v41 = vsub.s32 7, %v10458_v28  ;;  %v165_v43 = vrot.slane %v10463_v30, %v10520_v26 }
 0x1d2   :  { %3622 = vmatprep.subr.bf16.mxu0 %v9036_v45  ;;  %3786 = vmatprep.subr.bf16.mxu1 %v9038_v46  ;;  %v9075_v45 = vcombine.low %v770_v22, %v774_v23  ;;  %v9077_v46 = vcombine.low %v771_v24, %v775_v25  ;;  %v815_v22 = vld [vmem:[#allocation6 + $0xca8] sm:$0xff] }
 0x1d5   :  { %3623 = vmatpush1.bf16.msra.mxu0 %v9035_v53  ;;  %3787 = vmatpush1.bf16.msra.mxu1 %v9037_v56  ;;  %v787_v53 = vld [vmem:[#allocation6 + $0xbc8] sm:$0xff] }
 0x1d6   :  { %3624 = vmatprep.subr.bf16.mxu0 %v9044_v58  ;;  %3788 = vmatprep.subr.bf16.mxu1 %v9046_v59  ;;  %v791_v56 = vld [vmem:[#allocation6 + $0xbe8] sm:$0xff]  ;;  %v177_v58 = vrot.slane %v10463_v30, %v10523_v41  ;;  %v347_v59 = vadd.f32 %v10487_v63, %v165_v43  ;;  %v9091_v30 = vcombine.low %v786_v50, %v790_v52 }
 0x1d7   :  { %v9094_v2 = vcombine.high %v787_v53, %v791_v56  ;;  %v9093_v9 = vcombine.low %v787_v53, %v791_v56  ;;  %v831_v50 = vld [vmem:[#allocation6 + $0xd28] sm:$0xff]  ;;  %v9125_v53 = vcombine.low %v819_v36, %v823_v37 }
 0x1d8   :  { %v390_v7 = vadd.f32 %v10500_v51, %v177_v58  ;;  %v398_v8 = vmax.f32 %v347_v59, 0.0  ;;  %v834_v59 = vld [vmem:[#allocation6 + $0xd40] sm:$0xff] }
 0x1d9   :  { %3625 = vmatpush1.bf16.msra.mxu0 %v9043_v3  ;;  %3789 = vmatpush1.bf16.msra.mxu1 %v9045_v4  ;;  %v794_v3 = vld [vmem:[#allocation6 + $0xc00] sm:$0xff] }
 0x1da   :  { %3626 = vmatprep.subr.bf16.mxu0 %v9052_v5  ;;  %3790 = vmatprep.subr.bf16.mxu1 %v9054_v6  ;;  %v798_v4 = vld [vmem:[#allocation6 + $0xc20] sm:$0xff]  ;;  %v795_v5 = vld [vmem:[#allocation6 + $0xc08] sm:$0xff]  ;;  %v401_v15 = vmax.f32 %v390_v7, 0.0  ;;  %v10531_v16 = vpack.c.bf16 %v398_v8, %v398_v8 }
 0x1db   :  { %v799_v6 = vld [vmem:[#allocation6 + $0xc28] sm:$0xff]  ;;  %v9100_v63 = vcombine.high %v794_v3, %v798_v4  ;;  %v9099_v17 = vcombine.low %v794_v3, %v798_v4  ;;  %v846_v7 = vld [vmem:[#allocation6 + $0xda0] sm:$0xff] }
 0x1dc   :  { %v9102_v10 = vcombine.high %v795_v5, %v799_v6  ;;  %v9101_v51 = vcombine.low %v795_v5, %v799_v6  ;;  %v10533_v23 = vpack.c.bf16 %v401_v15, %v401_v15  ;;  %v842_v6 = vld [vmem:[#allocation6 + $0xd80] sm:$0xff]  ;;  %v843_v8 = vld [vmem:[#allocation6 + $0xd88] sm:$0xff] }
 0x1dd   :  { %3627 = vmatpush1.bf16.msra.mxu0 %v9051_v11  ;;  %3791 = vmatpush1.bf16.msra.mxu1 %v9053_v12  ;;  %v802_v11 = vld [vmem:[#allocation6 + $0xc40] sm:$0xff]  ;;  %v855_v15 = vld [vmem:[#allocation6 + $0xde8] sm:$0xff] }
 0x1de   :  { %3628 = vmatprep.subr.bf16.mxu0 %v9060_v13  ;;  %3792 = vmatprep.subr.bf16.mxu1 %v9062_v14  ;;  %v806_v12 = vld [vmem:[#allocation6 + $0xc60] sm:$0xff]  ;;  %v803_v13 = vld [vmem:[#allocation6 + $0xc48] sm:$0xff] }
 0x1df   :  { %v807_v14 = vld [vmem:[#allocation6 + $0xc68] sm:$0xff]  ;;  %v9108_v18 = vcombine.high %v802_v11, %v806_v12  ;;  %v9107_v24 = vcombine.low %v802_v11, %v806_v12  ;;  %v850_v12 = vld [vmem:[#allocation6 + $0xdc0] sm:$0xff] }
 0x1e0   :  { %v9109_v25 = vcombine.low %v803_v13, %v807_v14 }
 0x1e1   :  { %3629 = vmatpush1.bf16.msra.mxu0 %v9059_v19  ;;  %3793 = vmatpush1.bf16.msra.mxu1 %v9061_v20  ;;  %v9110_v19 = vcombine.high %v803_v13, %v807_v14  ;;  %v810_v20 = vld [vmem:[#allocation6 + $0xc80] sm:$0xff]  ;;  %v851_v14 = vld [vmem:[#allocation6 + $0xdc8] sm:$0xff] }
 0x1e2   :  { %3630 = vmatprep.subr.bf16.mxu0 %v9068_v21  ;;  %3794 = vmatprep.subr.bf16.mxu1 %v9070_v39  ;;  %v814_v21 = vld [vmem:[#allocation6 + $0xca0] sm:$0xff]  ;;  %v811_v39 = vld [vmem:[#allocation6 + $0xc88] sm:$0xff] }
 0x1e3   :  { %v9115_v38 = vcombine.low %v810_v20, %v814_v21  ;;  %v9117_v40 = vcombine.low %v811_v39, %v815_v22  ;;  %v854_v13 = vld [vmem:[#allocation6 + $0xde0] sm:$0xff] }
 0x1e5   :  { %3631 = vmatpush1.bf16.msra.mxu0 %v9067_v27  ;;  %3795 = vmatpush1.bf16.msra.mxu1 %v9069_v34  ;;  %v9116_v27 = vcombine.high %v810_v20, %v814_v21  ;;  %v9118_v34 = vcombine.high %v811_v39, %v815_v22  ;;  %v858_v20 = vld [vmem:[#allocation6 + $0xe00] sm:$0xff]  ;;  %v859_v39 = vld [vmem:[#allocation6 + $0xe08] sm:$0xff] }
 0x1e6   :  { %3632 = vmatprep.subr.bf16.mxu0 %v9076_v0  ;;  %3796 = vmatprep.subr.bf16.mxu1 %v9078_v35  ;;  %v818_v0 = vld [vmem:[#allocation6 + $0xcc0] sm:$0xff]  ;;  %v863_v22 = vld [vmem:[#allocation6 + $0xe28] sm:$0xff] }
 0x1e7   :  { %v822_v35 = vld [vmem:[#allocation6 + $0xce0] sm:$0xff] }
 0x1e8   :  { %v9124_v43 = vcombine.high %v818_v0, %v822_v35  ;;  %v9123_v52 = vcombine.low %v818_v0, %v822_v35  ;;  %v862_v21 = vld [vmem:[#allocation6 + $0xe20] sm:$0xff] }
 0x1e9   :  { %3633 = vmatpush1.bf16.msra.mxu0 %v9075_v45  ;;  %3797 = vmatpush1.bf16.msra.mxu1 %v9077_v46  ;;  %v9126_v45 = vcombine.high %v819_v36, %v823_v37  ;;  %v826_v46 = vld [vmem:[#allocation6 + $0xd00] sm:$0xff]  ;;  %v867_v36 = vld [vmem:[#allocation6 + $0xe48] sm:$0xff] }
 0x1ea   :  { %3634 = vmatprep.subr.bf16.mxu0 %v9084_v48  ;;  %3798 = vmatprep.subr.bf16.mxu1 %v9086_v49  ;;  %v830_v48 = vld [vmem:[#allocation6 + $0xd20] sm:$0xff]  ;;  %v827_v49 = vld [vmem:[#allocation6 + $0xd08] sm:$0xff] }
 0x1eb   :  { %v9132_v56 = vcombine.high %v826_v46, %v830_v48  ;;  %v9134_v58 = vcombine.high %v827_v49, %v831_v50  ;;  %v9133_v3 = vcombine.low %v827_v49, %v831_v50  ;;  %v866_v0 = vld [vmem:[#allocation6 + $0xe40] sm:$0xff]  ;;  %v871_v37 = vld [vmem:[#allocation6 + $0xe68] sm:$0xff] }
 0x1ec   :  { %v870_v35 = vld [vmem:[#allocation6 + $0xe60] sm:$0xff]  ;;  %v875_v49 = vld [vmem:[#allocation6 + $0xe88] sm:$0xff] }
 0x1ed   :  { %3635 = vmatpush1.bf16.msra.mxu0 %v9083_v60  ;;  %3799 = vmatpush1.bf16.msra.mxu1 %v9085_v61  ;;  %v838_v60 = vld [vmem:[#allocation6 + $0xd60] sm:$0xff]  ;;  %v835_v61 = vld [vmem:[#allocation6 + $0xd48] sm:$0xff] }
 0x1ee   :  { %3636 = vmatprep.subr.bf16.mxu0 %v9092_v1  ;;  %3800 = vmatprep.subr.bf16.mxu1 %v9094_v2  ;;  %v839_v1 = vld [vmem:[#allocation6 + $0xd68] sm:$0xff]  ;;  %v9131_v2 = vcombine.low %v826_v46, %v830_v48  ;;  %v9140_v4 = vcombine.high %v834_v59, %v838_v60  ;;  %v874_v46 = vld [vmem:[#allocation6 + $0xe80] sm:$0xff] }
 0x1ef   :  { %v9142_v5 = vcombine.high %v835_v61, %v839_v1  ;;  %v878_v48 = vld [vmem:[#allocation6 + $0xea0] sm:$0xff]  ;;  %v879_v50 = vld [vmem:[#allocation6 + $0xea8] sm:$0xff] }
 0x1f1   :  { %3637 = vmatpush1.bf16.msra.mxu0 %v9091_v30  ;;  %3801 = vmatpush1.bf16.msra.mxu1 %v9093_v9  ;;  %v847_v30 = vld [vmem:[#allocation6 + $0xda8] sm:$0xff]  ;;  %v9139_v9 = vcombine.low %v834_v59, %v838_v60  ;;  %v882_v59 = vld [vmem:[#allocation6 + $0xec0] sm:$0xff] }
 0x1f2   :  { %3647 = vmatprep.subr.bf16.mxu0 %v9100_v63  ;;  %3811 = vmatprep.subr.bf16.mxu1 %v9102_v10  ;;  %v9141_v63 = vcombine.low %v835_v61, %v839_v1  ;;  %v9148_v10 = vcombine.high %v842_v6, %v846_v7  ;;  %v9150_v11 = vcombine.high %v843_v8, %v847_v30  ;;  %v886_v60 = vld [vmem:[#allocation6 + $0xee0] sm:$0xff]  ;;  %v883_v61 = vld [vmem:[#allocation6 + $0xec8] sm:$0xff] }
 0x1f3   :  { %v887_v1 = vld [vmem:[#allocation6 + $0xee8] sm:$0xff] }
 0x1f4   :  { %3639 = vmatmul.mubr.bf16.vlgmr.msra.gmra.mrb[8].mxu0 %v10531_v16  ;;  %3803 = vmatmul.mubr.bf16.vlgmr.msra.gmra.mrb[8].mxu1 %v10531_v16 }
 0x1f5   :  { %3648 = vmatpush1.bf16.msra.mxu0 %v9099_v17  ;;  %3812 = vmatpush1.bf16.msra.mxu1 %v9101_v51  ;;  %v9147_v17 = vcombine.low %v842_v6, %v846_v7  ;;  %v9149_v51 = vcombine.low %v843_v8, %v847_v30  ;;  %v890_v6 = vld [vmem:[#allocation6 + $0xf00] sm:$0xff]  ;;  %v891_v8 = vld [vmem:[#allocation6 + $0xf08] sm:$0xff] }
 0x1f6   :  { %3649 = vmatprep.subr.bf16.mxu0 %v9108_v18  ;;  %3813 = vmatprep.subr.bf16.mxu1 %v9110_v19  ;;  %v9156_v18 = vcombine.high %v850_v12, %v854_v13  ;;  %v9158_v19 = vcombine.high %v851_v14, %v855_v15  ;;  %v894_v7 = vld [vmem:[#allocation6 + $0xf20] sm:$0xff]  ;;  %v895_v30 = vld [vmem:[#allocation6 + $0xf28] sm:$0xff] }
 0x1f7   :  { %3679 = vmatprep.mubr.bf16.mxu0 %v10533_v23  ;;  %3843 = vmatprep.mubr.bf16.mxu1 %v10533_v23 }
 0x1f9   :  { %3650 = vmatpush1.bf16.msra.mxu0 %v9107_v24  ;;  %3814 = vmatpush1.bf16.msra.mxu1 %v9109_v25  ;;  %v9155_v24 = vcombine.low %v850_v12, %v854_v13  ;;  %v9157_v25 = vcombine.low %v851_v14, %v855_v15  ;;  %v898_v12 = vld [vmem:[#allocation6 + $0xf40] sm:$0xff]  ;;  %v899_v14 = vld [vmem:[#allocation6 + $0xf48] sm:$0xff] }
 0x1fa   :  { %3651 = vmatprep.subr.bf16.mxu0 %v9116_v27  ;;  %3815 = vmatprep.subr.bf16.mxu1 %v9118_v34  ;;  %v9164_v27 = vcombine.high %v858_v20, %v862_v21  ;;  %v9166_v34 = vcombine.high %v859_v39, %v863_v22  ;;  %v902_v13 = vld [vmem:[#allocation6 + $0xf60] sm:$0xff]  ;;  %v903_v15 = vld [vmem:[#allocation6 + $0xf68] sm:$0xff] }
 0x1fd   :  { %3652 = vmatpush1.bf16.msra.mxu0 %v9115_v38  ;;  %3816 = vmatpush1.bf16.msra.mxu1 %v9117_v40  ;;  %v9163_v38 = vcombine.low %v858_v20, %v862_v21  ;;  %v9165_v40 = vcombine.low %v859_v39, %v863_v22  ;;  %v9206_v20 = vcombine.high %v899_v14, %v903_v15  ;;  %v906_v21 = vld [vmem:[#allocation6 + $0xf80] sm:$0xff]  ;;  %v907_v22 = vld [vmem:[#allocation6 + $0xf88] sm:$0xff] }
 0x1fe   :  { %3653 = vmatprep.subr.bf16.mxu0 %v9124_v43  ;;  %3817 = vmatprep.subr.bf16.mxu1 %v9126_v45  ;;  %v9172_v43 = vcombine.high %v866_v0, %v870_v35  ;;  %v9174_v45 = vcombine.high %v867_v36, %v871_v37  ;;  %v910_v39 = vld [vmem:[#allocation6 + $0xfa0] sm:$0xff] }
 0x201   :  { %3654 = vmatpush1.bf16.msra.mxu0 %v9123_v52  ;;  %3818 = vmatpush1.bf16.msra.mxu1 %v9125_v53  ;;  %v9171_v52 = vcombine.low %v866_v0, %v870_v35  ;;  %v9173_v53 = vcombine.low %v867_v36, %v871_v37  ;;  %v9212_v35 = vcombine.high %v906_v21, %v910_v39  ;;  %v914_v36 = vld [vmem:[#allocation6 + $0xfc0] sm:$0xff] }
 0x202   :  { %3655 = vmatprep.subr.bf16.mxu0 %v9132_v56  ;;  %3819 = vmatprep.subr.bf16.mxu1 %v9134_v58  ;;  %v9180_v56 = vcombine.high %v874_v46, %v878_v48  ;;  %v9182_v58 = vcombine.high %v875_v49, %v879_v50  ;;  %v918_v37 = vld [vmem:[#allocation6 + $0xfe0] sm:$0xff] }
 0x205   :  { %3656 = vmatpush1.bf16.msra.mxu0 %v9131_v2  ;;  %3820 = vmatpush1.bf16.msra.mxu1 %v9133_v3  ;;  %v9179_v2 = vcombine.low %v874_v46, %v878_v48  ;;  %v9181_v3 = vcombine.low %v875_v49, %v879_v50  ;;  %v9220_v48 = vcombine.high %v914_v36, %v918_v37  ;;  %v412_v50 = vld [vmem:[#allocation6 + $0x10] sm:$0xff] }
 0x206   :  { %3657 = vmatprep.subr.bf16.mxu0 %v9140_v4  ;;  %3821 = vmatprep.subr.bf16.mxu1 %v9142_v5  ;;  %v9188_v4 = vcombine.high %v882_v59, %v886_v60  ;;  %v9190_v5 = vcombine.high %v883_v61, %v887_v1 }
 0x209   :  { %3658 = vmatpush1.bf16.msra.mxu0 %v9139_v9  ;;  %3822 = vmatpush1.bf16.msra.mxu1 %v9141_v63  ;;  %v9187_v9 = vcombine.low %v882_v59, %v886_v60  ;;  %v9189_v63 = vcombine.low %v883_v61, %v887_v1 }
 0x20a   :  { %3659 = vmatprep.subr.bf16.mxu0 %v9148_v10  ;;  %3823 = vmatprep.subr.bf16.mxu1 %v9150_v11  ;;  %v9196_v10 = vcombine.high %v890_v6, %v894_v7  ;;  %v9198_v11 = vcombine.high %v891_v8, %v895_v30 }
 0x20d   :  { %3660 = vmatpush1.bf16.msra.mxu0 %v9147_v17  ;;  %3824 = vmatpush1.bf16.msra.mxu1 %v9149_v51  ;;  %v9195_v17 = vcombine.low %v890_v6, %v894_v7  ;;  %v9197_v51 = vcombine.low %v891_v8, %v895_v30 }
 0x20e   :  { %3661 = vmatprep.subr.bf16.mxu0 %v9156_v18  ;;  %3825 = vmatprep.subr.bf16.mxu1 %v9158_v19  ;;  %v10540_v18 = vsub.s32 6, %v10458_v28  ;;  %v9204_v19 = vcombine.high %v898_v12, %v902_v13 }
 0x211   :  { %3662 = vmatpush1.bf16.msra.mxu0 %v9155_v24  ;;  %3826 = vmatpush1.bf16.msra.mxu1 %v9157_v25  ;;  %v911_v24 = vld [vmem:[#allocation6 + $0xfa8] sm:$0xff]  ;;  %v9203_v25 = vcombine.low %v898_v12, %v902_v13 }
 0x212   :  { %3663 = vmatprep.subr.bf16.mxu0 %v9164_v27  ;;  %3827 = vmatprep.subr.bf16.mxu1 %v9166_v34  ;;  %v9205_v27 = vcombine.low %v899_v14, %v903_v15  ;;  %v10081_v34 = vld [vmem:[#allocation4] sm:$0xff]  ;;  %v9214_v28 = vcombine.high %v907_v22, %v911_v24 }
 0x213   :  { %v173_v0 = vrot.slane %v10081_v34, %v10540_v18  ;;  %v449_v34 = vld [vmem:[#allocation6 + $0x138] sm:$0xff] }
 0x215   :  { %3664 = vmatpush1.bf16.msra.mxu0 %v9163_v38  ;;  %3828 = vmatpush1.bf16.msra.mxu1 %v9165_v40  ;;  %v915_v38 = vld [vmem:[#allocation6 + $0xfc8] sm:$0xff]  ;;  %v388_v46 = vadd.f32 %v10498_v47, %v173_v0  ;;  %v421_v47 = vld [vmem:[#allocation6 + $0x58] sm:$0xff] }
 0x216   :  { %3665 = vmatprep.subr.bf16.mxu0 %v9172_v43  ;;  %3829 = vmatprep.subr.bf16.mxu1 %v9174_v45  ;;  %v919_v40 = vld [vmem:[#allocation6 + $0xfe8] sm:$0xff]  ;;  %v9211_v43 = vcombine.low %v906_v21, %v910_v39  ;;  %v9213_v45 = vcombine.low %v907_v22, %v911_v24 }
 0x217   :  { %v9222_v49 = vcombine.high %v915_v38, %v919_v40  ;;  %v9221_v59 = vcombine.low %v915_v38, %v919_v40  ;;  %v400_v60 = vmax.f32 %v388_v46, 0.0  ;;  %v456_v38 = vld [vmem:[#allocation6 + $0x170] sm:$0xff]  ;;  %v453_v40 = vld [vmem:[#allocation6 + $0x158] sm:$0xff] }
 0x219   :  { %3666 = vmatpush1.bf16.msra.mxu0 %v9171_v52  ;;  %3830 = vmatpush1.bf16.msra.mxu1 %v9173_v53  ;;  %v416_v52 = vld [vmem:[#allocation6 + $0x30] sm:$0xff]  ;;  %v413_v53 = vld [vmem:[#allocation6 + $0x18] sm:$0xff]  ;;  %v10544_v6 = vpack.c.bf16 %v400_v60, %v400_v60 }
 0x21a   :  { %3667 = vmatprep.subr.bf16.mxu0 %v9180_v56  ;;  %3831 = vmatprep.subr.bf16.mxu1 %v9182_v58  ;;  %v417_v56 = vld [vmem:[#allocation6 + $0x38] sm:$0xff]  ;;  %v9219_v58 = vcombine.low %v914_v36, %v918_v37  ;;  %v8720_v61 = vcombine.high %v412_v50, %v416_v52  ;;  %v452_v37 = vld [vmem:[#allocation6 + $0x150] sm:$0xff] }
 0x21b   :  { %v8722_v1 = vcombine.high %v413_v53, %v417_v56  ;;  %v8721_v7 = vcombine.low %v413_v53, %v417_v56  ;;  %v461_v53 = vld [vmem:[#allocation6 + $0x198] sm:$0xff] }
 0x21c   :  { %v465_v56 = vld [vmem:[#allocation6 + $0x1b8] sm:$0xff] }
 0x21d   :  { %3668 = vmatpush1.bf16.msra.mxu0 %v9179_v2  ;;  %3832 = vmatpush1.bf16.msra.mxu1 %v9181_v3  ;;  %v420_v2 = vld [vmem:[#allocation6 + $0x50] sm:$0xff] }
 0x21e   :  { %3669 = vmatprep.subr.bf16.mxu0 %v9188_v4  ;;  %3833 = vmatprep.subr.bf16.mxu1 %v9190_v5  ;;  %v424_v3 = vld [vmem:[#allocation6 + $0x70] sm:$0xff]  ;;  %v425_v4 = vld [vmem:[#allocation6 + $0x78] sm:$0xff]  ;;  %v8719_v5 = vcombine.low %v412_v50, %v416_v52 }
 0x21f   :  { %v8728_v8 = vcombine.high %v420_v2, %v424_v3  ;;  %v8730_v30 = vcombine.high %v421_v47, %v425_v4  ;;  %v8727_v12 = vcombine.low %v420_v2, %v424_v3  ;;  %v8729_v13 = vcombine.low %v421_v47, %v425_v4  ;;  %v460_v50 = vld [vmem:[#allocation6 + $0x190] sm:$0xff]  ;;  %v469_v3 = vld [vmem:[#allocation6 + $0x1d8] sm:$0xff] }
 0x220   :  { %v464_v52 = vld [vmem:[#allocation6 + $0x1b0] sm:$0xff]  ;;  %v473_v47 = vld [vmem:[#allocation6 + $0x1f8] sm:$0xff] }
 0x221   :  { %3670 = vmatpush1.bf16.msra.mxu0 %v9187_v9  ;;  %3834 = vmatpush1.bf16.msra.mxu1 %v9189_v63  ;;  %v428_v9 = vld [vmem:[#allocation6 + $0x90] sm:$0xff]  ;;  %v8768_v60 = vcombine.high %v460_v50, %v464_v52  ;;  %v8767_v4 = vcombine.low %v460_v50, %v464_v52  ;;  %v509_v52 = vld [vmem:[#allocation6 + $0x318] sm:$0xff] }
 0x222   :  { %3671 = vmatprep.subr.bf16.mxu0 %v9196_v10  ;;  %3835 = vmatprep.subr.bf16.mxu1 %v9198_v11  ;;  %v432_v63 = vld [vmem:[#allocation6 + $0xb0] sm:$0xff]  ;;  %v429_v10 = vld [vmem:[#allocation6 + $0x98] sm:$0xff] }
 0x223   :  { %v433_v11 = vld [vmem:[#allocation6 + $0xb8] sm:$0xff]  ;;  %v8736_v14 = vcombine.high %v428_v9, %v432_v63  ;;  %v8735_v21 = vcombine.low %v428_v9, %v432_v63  ;;  %v472_v2 = vld [vmem:[#allocation6 + $0x1f0] sm:$0xff] }
 0x224   :  { %v8738_v15 = vcombine.high %v429_v10, %v433_v11  ;;  %v8737_v39 = vcombine.low %v429_v10, %v433_v11  ;;  %v480_v9 = vld [vmem:[#allocation6 + $0x230] sm:$0xff]  ;;  %v477_v63 = vld [vmem:[#allocation6 + $0x218] sm:$0xff] }
 0x225   :  { %3672 = vmatpush1.bf16.msra.mxu0 %v9195_v17  ;;  %3836 = vmatpush1.bf16.msra.mxu1 %v9197_v51  ;;  %v436_v17 = vld [vmem:[#allocation6 + $0xd0] sm:$0xff]  ;;  %v481_v10 = vld [vmem:[#allocation6 + $0x238] sm:$0xff] }
 0x226   :  { %3673 = vmatprep.subr.bf16.mxu0 %v9204_v19  ;;  %3837 = vmatprep.subr.bf16.mxu1 %v9206_v20  ;;  %v440_v51 = vld [vmem:[#allocation6 + $0xf0] sm:$0xff]  ;;  %v437_v19 = vld [vmem:[#allocation6 + $0xd8] sm:$0xff] }
 0x227   :  { %v441_v20 = vld [vmem:[#allocation6 + $0xf8] sm:$0xff]  ;;  %v8744_v22 = vcombine.high %v436_v17, %v440_v51  ;;  %v8743_v0 = vcombine.low %v436_v17, %v440_v51  ;;  %v488_v17 = vld [vmem:[#allocation6 + $0x270] sm:$0xff] }
 0x228   :  { %v8746_v24 = vcombine.high %v437_v19, %v441_v20  ;;  %v485_v51 = vld [vmem:[#allocation6 + $0x258] sm:$0xff]  ;;  %v512_v50 = vld [vmem:[#allocation6 + $0x330] sm:$0xff] }
 0x229   :  { %3674 = vmatpush1.bf16.msra.mxu0 %v9203_v25  ;;  %3838 = vmatpush1.bf16.msra.mxu1 %v9205_v27  ;;  %v444_v25 = vld [vmem:[#allocation6 + $0x110] sm:$0xff] }
 0x22a   :  { %3675 = vmatprep.subr.bf16.mxu0 %v9212_v35  ;;  %3839 = vmatprep.subr.bf16.mxu1 %v9214_v28  ;;  %v448_v27 = vld [vmem:[#allocation6 + $0x130] sm:$0xff]  ;;  %v8745_v35 = vcombine.low %v437_v19, %v441_v20  ;;  %v489_v19 = vld [vmem:[#allocation6 + $0x278] sm:$0xff] }
 0x22b   :  { %v8752_v28 = vcombine.high %v444_v25, %v448_v27 }
 0x22d   :  { %3676 = vmatpush1.bf16.msra.mxu0 %v9211_v43  ;;  %3840 = vmatpush1.bf16.msra.mxu1 %v9213_v45  ;;  %v457_v43 = vld [vmem:[#allocation6 + $0x178] sm:$0xff]  ;;  %v8751_v45 = vcombine.low %v444_v25, %v448_v27  ;;  %v496_v25 = vld [vmem:[#allocation6 + $0x2b0] sm:$0xff] }
 0x22e   :  { %3677 = vmatprep.subr.bf16.mxu0 %v9220_v48  ;;  %3841 = vmatprep.subr.bf16.mxu1 %v9222_v49  ;;  %v8760_v48 = vcombine.high %v452_v37, %v456_v38  ;;  %v8762_v49 = vcombine.high %v453_v40, %v457_v43  ;;  %v493_v27 = vld [vmem:[#allocation6 + $0x298] sm:$0xff] }
 0x231   :  { %3678 = vmatpush1.bf16.msra.mxu0 %v9219_v58  ;;  %3842 = vmatpush1.bf16.msra.mxu1 %v9221_v59  ;;  %v8759_v58 = vcombine.low %v452_v37, %v456_v38  ;;  %v8761_v59 = vcombine.low %v453_v40, %v457_v43  ;;  %v504_v37 = vld [vmem:[#allocation6 + $0x2f0] sm:$0xff]  ;;  %v501_v38 = vld [vmem:[#allocation6 + $0x2d8] sm:$0xff] }
 0x232   :  { %3852 = vmatprep.subr.bf16.mxu0 %v8720_v61  ;;  %4016 = vmatprep.subr.bf16.mxu1 %v8722_v1  ;;  %v8770_v61 = vcombine.high %v461_v53, %v465_v56  ;;  %v468_v1 = vld [vmem:[#allocation6 + $0x1d0] sm:$0xff]  ;;  %v505_v40 = vld [vmem:[#allocation6 + $0x2f8] sm:$0xff] }
 0x233   :  { %v8775_v11 = vcombine.low %v468_v1, %v472_v2 }
 0x234   :  { %3680 = vmatmul.mubr.bf16.vlgmr.msra.gmra.mrb[8].mxu0 %v10544_v6  ;;  %3844 = vmatmul.mubr.bf16.vlgmr.msra.gmra.mrb[8].mxu1 %v10544_v6 }
 0x235   :  { %3853 = vmatpush1.bf16.msra.mxu0 %v8719_v5  ;;  %3884 = vmatprep.mubr.bf16.mxu0 %v10479_v54  ;;  %v8769_v5 = vcombine.low %v461_v53, %v465_v56  ;;  %v513_v53 = vld [vmem:[#allocation6 + $0x338] sm:$0xff] }
 0x236   :  { %4017 = vmatpush1.bf16.msra.mxu1 %v8721_v7  ;;  %4048 = vmatprep.mubr.bf16.mxu1 %v10479_v54  ;;  %v445_v54 = vld [vmem:[#allocation6 + $0x118] sm:$0xff]  ;;  %v8776_v7 = vcombine.high %v468_v1, %v472_v2  ;;  %v520_v1 = vld [vmem:[#allocation6 + $0x370] sm:$0xff] }
 0x237   :  { %3854 = vmatprep.subr.bf16.mxu0 %v8728_v8  ;;  %4018 = vmatprep.subr.bf16.mxu1 %v8730_v30  ;;  %v8754_v36 = vcombine.high %v445_v54, %v449_v34  ;;  %v8753_v46 = vcombine.low %v445_v54, %v449_v34  ;;  %v8778_v8 = vcombine.high %v469_v3, %v473_v47  ;;  %v476_v30 = vld [vmem:[#allocation6 + $0x210] sm:$0xff]  ;;  %v497_v54 = vld [vmem:[#allocation6 + $0x2b8] sm:$0xff] }
 0x238   :  { %v8783_v20 = vcombine.low %v476_v30, %v480_v9  ;;  %v517_v2 = vld [vmem:[#allocation6 + $0x358] sm:$0xff] }
 0x239   :  { %3855 = vmatpush1.bf16.msra.mxu0 %v8727_v12  ;;  %v8777_v12 = vcombine.low %v469_v3, %v473_v47  ;;  %v521_v3 = vld [vmem:[#allocation6 + $0x378] sm:$0xff] }
 0x23a   :  { %4019 = vmatpush1.bf16.msra.mxu1 %v8729_v13  ;;  %3856 = vmatprep.subr.bf16.mxu0 %v8736_v14  ;;  %v8784_v13 = vcombine.high %v476_v30, %v480_v9  ;;  %v8786_v14 = vcombine.high %v477_v63, %v481_v10  ;;  %v528_v30 = vld [vmem:[#allocation6 + $0x3b0] sm:$0xff]  ;;  %v525_v9 = vld [vmem:[#allocation6 + $0x398] sm:$0xff] }
 0x23b   :  { %4020 = vmatprep.subr.bf16.mxu1 %v8738_v15  ;;  %v484_v15 = vld [vmem:[#allocation6 + $0x250] sm:$0xff] }
 0x23c   :  { %v8791_v34 = vcombine.low %v484_v15, %v488_v17 }
 0x23d   :  { %3857 = vmatpush1.bf16.msra.mxu0 %v8735_v21  ;;  %v8785_v21 = vcombine.low %v477_v63, %v481_v10  ;;  %v529_v63 = vld [vmem:[#allocation6 + $0x3b8] sm:$0xff] }
 0x23e   :  { %4021 = vmatpush1.bf16.msra.mxu1 %v8737_v39  ;;  %3858 = vmatprep.subr.bf16.mxu0 %v8744_v22  ;;  %v8792_v39 = vcombine.high %v484_v15, %v488_v17  ;;  %v8794_v22 = vcombine.high %v485_v51, %v489_v19  ;;  %v536_v15 = vld [vmem:[#allocation6 + $0x3f0] sm:$0xff]  ;;  %v533_v17 = vld [vmem:[#allocation6 + $0x3d8] sm:$0xff] }
 0x23f   :  { %4022 = vmatprep.subr.bf16.mxu1 %v8746_v24  ;;  %v492_v24 = vld [vmem:[#allocation6 + $0x290] sm:$0xff] }
 0x240   :  { %v8799_v43 = vcombine.low %v492_v24, %v496_v25 }
 0x241   :  { %3859 = vmatpush1.bf16.msra.mxu0 %v8743_v0  ;;  %v8793_v0 = vcombine.low %v485_v51, %v489_v19  ;;  %v537_v51 = vld [vmem:[#allocation6 + $0x3f8] sm:$0xff] }
 0x242   :  { %4023 = vmatpush1.bf16.msra.mxu1 %v8745_v35  ;;  %3860 = vmatprep.subr.bf16.mxu0 %v8752_v28  ;;  %v8800_v35 = vcombine.high %v492_v24, %v496_v25  ;;  %v8802_v28 = vcombine.high %v493_v27, %v497_v54  ;;  %v544_v24 = vld [vmem:[#allocation6 + $0x430] sm:$0xff]  ;;  %v541_v25 = vld [vmem:[#allocation6 + $0x418] sm:$0xff] }
 0x243   :  { %4024 = vmatprep.subr.bf16.mxu1 %v8754_v36  ;;  %v500_v36 = vld [vmem:[#allocation6 + $0x2d0] sm:$0xff] }
 0x244   :  { %v8807_v56 = vcombine.low %v500_v36, %v504_v37 }
 0x245   :  { %3861 = vmatpush1.bf16.msra.mxu0 %v8751_v45  ;;  %v8801_v45 = vcombine.low %v493_v27, %v497_v54  ;;  %v545_v27 = vld [vmem:[#allocation6 + $0x438] sm:$0xff] }
 0x246   :  { %4025 = vmatpush1.bf16.msra.mxu1 %v8753_v46  ;;  %3862 = vmatprep.subr.bf16.mxu0 %v8760_v48  ;;  %v8808_v46 = vcombine.high %v500_v36, %v504_v37  ;;  %v8810_v48 = vcombine.high %v501_v38, %v505_v40  ;;  %v552_v36 = vld [vmem:[#allocation6 + $0x470] sm:$0xff] }
 0x247   :  { %4026 = vmatprep.subr.bf16.mxu1 %v8762_v49  ;;  %v508_v49 = vld [vmem:[#allocation6 + $0x310] sm:$0xff] }
 0x248   :  { %v8815_v47 = vcombine.low %v508_v49, %v512_v50 }
 0x249   :  { %3863 = vmatpush1.bf16.msra.mxu0 %v8759_v58  ;;  %v8809_v58 = vcombine.low %v501_v38, %v505_v40  ;;  %v549_v38 = vld [vmem:[#allocation6 + $0x458] sm:$0xff] }
 0x24a   :  { %4027 = vmatpush1.bf16.msra.mxu1 %v8761_v59  ;;  %3864 = vmatprep.subr.bf16.mxu0 %v8768_v60  ;;  %v8816_v59 = vcombine.high %v508_v49, %v512_v50  ;;  %v8818_v60 = vcombine.high %v509_v52, %v513_v53  ;;  %v553_v40 = vld [vmem:[#allocation6 + $0x478] sm:$0xff] }
 0x24b   :  { %4028 = vmatprep.subr.bf16.mxu1 %v8770_v61  ;;  %v516_v61 = vld [vmem:[#allocation6 + $0x350] sm:$0xff]  ;;  %v8858_v49 = vcombine.high %v549_v38, %v553_v40  ;;  %v557_v50 = vld [vmem:[#allocation6 + $0x498] sm:$0xff] }
 0x24c   :  { %v8823_v10 = vcombine.low %v516_v61, %v520_v1 }
 0x24d   :  { %3865 = vmatpush1.bf16.msra.mxu0 %v8767_v4  ;;  %v8817_v4 = vcombine.low %v509_v52, %v513_v53  ;;  %v561_v52 = vld [vmem:[#allocation6 + $0x4b8] sm:$0xff] }
 0x24e   :  { %4029 = vmatpush1.bf16.msra.mxu1 %v8769_v5  ;;  %3866 = vmatprep.subr.bf16.mxu0 %v8776_v7  ;;  %v8824_v5 = vcombine.high %v516_v61, %v520_v1  ;;  %v8826_v7 = vcombine.high %v517_v2, %v521_v3  ;;  %v568_v61 = vld [vmem:[#allocation6 + $0x4f0] sm:$0xff]  ;;  %v565_v1 = vld [vmem:[#allocation6 + $0x4d8] sm:$0xff] }
 0x24f   :  { %4030 = vmatprep.subr.bf16.mxu1 %v8778_v8  ;;  %v524_v8 = vld [vmem:[#allocation6 + $0x390] sm:$0xff] }
 0x250   :  { %v8831_v19 = vcombine.low %v524_v8, %v528_v30 }
 0x251   :  { %3867 = vmatpush1.bf16.msra.mxu0 %v8775_v11  ;;  %v8825_v11 = vcombine.low %v517_v2, %v521_v3  ;;  %v569_v2 = vld [vmem:[#allocation6 + $0x4f8] sm:$0xff] }
 0x252   :  { %4031 = vmatpush1.bf16.msra.mxu1 %v8777_v12  ;;  %3868 = vmatprep.subr.bf16.mxu0 %v8784_v13  ;;  %v8832_v12 = vcombine.high %v524_v8, %v528_v30  ;;  %v8834_v13 = vcombine.high %v525_v9, %v529_v63  ;;  %v573_v8 = vld [vmem:[#allocation6 + $0x518] sm:$0xff] }
 0x253   :  { %4032 = vmatprep.subr.bf16.mxu1 %v8786_v14  ;;  %v532_v14 = vld [vmem:[#allocation6 + $0x3d0] sm:$0xff]  ;;  %v577_v30 = vld [vmem:[#allocation6 + $0x538] sm:$0xff] }
 0x254   :  { %v8839_v54 = vcombine.low %v532_v14, %v536_v15 }
 0x255   :  { %3869 = vmatpush1.bf16.msra.mxu0 %v8783_v20  ;;  %v8833_v20 = vcombine.low %v525_v9, %v529_v63  ;;  %v8873_v9 = vcombine.low %v565_v1, %v569_v2 }
 0x256   :  { %4033 = vmatpush1.bf16.msra.mxu1 %v8785_v21  ;;  %3870 = vmatprep.subr.bf16.mxu0 %v8792_v39  ;;  %v8840_v21 = vcombine.high %v532_v14, %v536_v15  ;;  %v8842_v39 = vcombine.high %v533_v17, %v537_v51  ;;  %v585_v14 = vld [vmem:[#allocation6 + $0x578] sm:$0xff] }
 0x257   :  { %4034 = vmatprep.subr.bf16.mxu1 %v8794_v22  ;;  %v540_v22 = vld [vmem:[#allocation6 + $0x410] sm:$0xff] }
 0x258   :  { %v8847_v37 = vcombine.low %v540_v22, %v544_v24 }
 0x259   :  { %3871 = vmatpush1.bf16.msra.mxu0 %v8791_v34  ;;  %v8841_v34 = vcombine.low %v533_v17, %v537_v51  ;;  %v8881_v17 = vcombine.low %v573_v8, %v577_v30 }
 0x25a   :  { %4035 = vmatpush1.bf16.msra.mxu1 %v8793_v0  ;;  %3872 = vmatprep.subr.bf16.mxu0 %v8800_v35  ;;  %v8848_v0 = vcombine.high %v540_v22, %v544_v24  ;;  %v8850_v35 = vcombine.high %v541_v25, %v545_v27  ;;  %v593_v22 = vld [vmem:[#allocation6 + $0x5b8] sm:$0xff] }
 0x25b   :  { %4036 = vmatprep.subr.bf16.mxu1 %v8802_v28  ;;  %v548_v28 = vld [vmem:[#allocation6 + $0x450] sm:$0xff] }
 0x25c   :  { %v8855_v53 = vcombine.low %v548_v28, %v552_v36 }
 0x25d   :  { %3873 = vmatpush1.bf16.msra.mxu0 %v8799_v43  ;;  %v8849_v43 = vcombine.low %v541_v25, %v545_v27 }
 0x25e   :  { %4037 = vmatpush1.bf16.msra.mxu1 %v8801_v45  ;;  %3874 = vmatprep.subr.bf16.mxu0 %v8808_v46  ;;  %v8856_v45 = vcombine.high %v548_v28, %v552_v36  ;;  %v556_v46 = vld [vmem:[#allocation6 + $0x490] sm:$0xff]  ;;  %v601_v28 = vld [vmem:[#allocation6 + $0x5f8] sm:$0xff] }
 0x25f   :  { %4038 = vmatprep.subr.bf16.mxu1 %v8810_v48  ;;  %v560_v48 = vld [vmem:[#allocation6 + $0x4b0] sm:$0xff] }
 0x260   :  { %v8863_v3 = vcombine.low %v556_v46, %v560_v48 }
 0x261   :  { %3875 = vmatpush1.bf16.msra.mxu0 %v8807_v56  ;;  %v8857_v56 = vcombine.low %v549_v38, %v553_v40 }
 0x262   :  { %4039 = vmatpush1.bf16.msra.mxu1 %v8809_v58  ;;  %3876 = vmatprep.subr.bf16.mxu0 %v8816_v59  ;;  %v8864_v58 = vcombine.high %v556_v46, %v560_v48  ;;  %v8866_v59 = vcombine.high %v557_v50, %v561_v52  ;;  %v605_v46 = vld [vmem:[#allocation6 + $0x618] sm:$0xff] }
 0x263   :  { %4040 = vmatprep.subr.bf16.mxu1 %v8818_v60  ;;  %v564_v60 = vld [vmem:[#allocation6 + $0x4d0] sm:$0xff]  ;;  %v609_v48 = vld [vmem:[#allocation6 + $0x638] sm:$0xff] }
 0x265   :  { %3877 = vmatpush1.bf16.msra.mxu0 %v8815_v47  ;;  %v8872_v47 = vcombine.high %v564_v60, %v568_v61 }
 0x266   :  { %4041 = vmatpush1.bf16.msra.mxu1 %v8817_v4  ;;  %3878 = vmatprep.subr.bf16.mxu0 %v8824_v5  ;;  %v8874_v4 = vcombine.high %v565_v1, %v569_v2  ;;  %v572_v5 = vld [vmem:[#allocation6 + $0x510] sm:$0xff]  ;;  %v8913_v1 = vcombine.low %v605_v46, %v609_v48 }
 0x267   :  { %4042 = vmatprep.subr.bf16.mxu1 %v8826_v7  ;;  %v576_v7 = vld [vmem:[#allocation6 + $0x530] sm:$0xff] }
 0x268   :  { %v8880_v63 = vcombine.high %v572_v5, %v576_v7  ;;  %v8879_v15 = vcombine.low %v572_v5, %v576_v7  ;;  %v625_v5 = vld [vmem:[#allocation6 + $0x6b8] sm:$0xff] }
 0x269   :  { %3879 = vmatpush1.bf16.msra.mxu0 %v8823_v10  ;;  %v8882_v10 = vcombine.high %v573_v8, %v577_v30 }
 0x26a   :  { %4043 = vmatpush1.bf16.msra.mxu1 %v8825_v11  ;;  %3880 = vmatprep.subr.bf16.mxu0 %v8832_v12  ;;  %v580_v11 = vld [vmem:[#allocation6 + $0x550] sm:$0xff] }
 0x26b   :  { %4044 = vmatprep.subr.bf16.mxu1 %v8834_v13  ;;  %v584_v12 = vld [vmem:[#allocation6 + $0x570] sm:$0xff]  ;;  %v581_v13 = vld [vmem:[#allocation6 + $0x558] sm:$0xff] }
 0x26c   :  { %v8888_v51 = vcombine.high %v580_v11, %v584_v12  ;;  %v8887_v24 = vcombine.low %v580_v11, %v584_v12  ;;  %v8889_v25 = vcombine.low %v581_v13, %v585_v14  ;;  %v633_v11 = vld [vmem:[#allocation6 + $0x6f8] sm:$0xff] }
 0x26d   :  { %3881 = vmatpush1.bf16.msra.mxu0 %v8831_v19  ;;  %v8890_v19 = vcombine.high %v581_v13, %v585_v14 }
 0x26e   :  { %4045 = vmatpush1.bf16.msra.mxu1 %v8833_v20  ;;  %3882 = vmatprep.subr.bf16.mxu0 %v8840_v21  ;;  %v588_v20 = vld [vmem:[#allocation6 + $0x590] sm:$0xff] }
 0x26f   :  { %4046 = vmatprep.subr.bf16.mxu1 %v8842_v39  ;;  %v592_v21 = vld [vmem:[#allocation6 + $0x5b0] sm:$0xff]  ;;  %v589_v39 = vld [vmem:[#allocation6 + $0x598] sm:$0xff] }
 0x270   :  { %v8896_v27 = vcombine.high %v588_v20, %v592_v21  ;;  %v8895_v36 = vcombine.low %v588_v20, %v592_v21  ;;  %v641_v20 = vld [vmem:[#allocation6 + $0x738] sm:$0xff] }
 0x271   :  { %3883 = vmatpush1.bf16.msra.mxu0 %v8839_v54  ;;  %v8898_v54 = vcombine.high %v589_v39, %v593_v22 }
 0x272   :  { %4047 = vmatpush1.bf16.msra.mxu1 %v8841_v34  ;;  %3893 = vmatprep.subr.bf16.mxu0 %v8848_v0  ;;  %v596_v34 = vld [vmem:[#allocation6 + $0x5d0] sm:$0xff] }
 0x273   :  { %4057 = vmatprep.subr.bf16.mxu1 %v8850_v35  ;;  %v600_v0 = vld [vmem:[#allocation6 + $0x5f0] sm:$0xff]  ;;  %v597_v35 = vld [vmem:[#allocation6 + $0x5d8] sm:$0xff] }
 0x274   :  { %3885 = vmatmul.mubr.bf16.vlgmr.msra.gmra.mrb[12].mxu0 %v10481_v55  ;;  %v8904_v38 = vcombine.high %v596_v34, %v600_v0  ;;  %v8906_v40 = vcombine.high %v597_v35, %v601_v28 }
 0x275   :  { %4049 = vmatmul.mubr.bf16.vlgmr.msra.gmra.mrb[12].mxu1 %v10481_v55  ;;  %3894 = vmatpush1.bf16.msra.mxu0 %v8847_v37  ;;  %v8865_v55 = vcombine.low %v557_v50, %v561_v52  ;;  %v8897_v37 = vcombine.low %v589_v39, %v593_v22  ;;  %v8905_v50 = vcombine.low %v597_v35, %v601_v28 }
 0x276   :  { %3925 = vmatprep.mubr.bf16.mxu0 %v10485_v62  ;;  %4058 = vmatpush1.bf16.msra.mxu1 %v8849_v43  ;;  %v604_v43 = vld [vmem:[#allocation6 + $0x610] sm:$0xff] }
 0x277   :  { %4089 = vmatprep.mubr.bf16.mxu1 %v10485_v62  ;;  %3895 = vmatprep.subr.bf16.mxu0 %v8856_v45  ;;  %v8871_v62 = vcombine.low %v564_v60, %v568_v61  ;;  %v608_v45 = vld [vmem:[#allocation6 + $0x630] sm:$0xff]  ;;  %v617_v60 = vld [vmem:[#allocation6 + $0x678] sm:$0xff] }
 0x278   :  { %4059 = vmatprep.subr.bf16.mxu1 %v8858_v49  ;;  %v8903_v49 = vcombine.low %v596_v34, %v600_v0  ;;  %v8912_v52 = vcombine.high %v604_v43, %v608_v45  ;;  %v8911_v61 = vcombine.low %v604_v43, %v608_v45  ;;  %v649_v34 = vld [vmem:[#allocation6 + $0x778] sm:$0xff] }
 0x279   :  { %3896 = vmatpush1.bf16.msra.mxu0 %v8855_v53  ;;  %v8914_v53 = vcombine.high %v605_v46, %v609_v48  ;;  %v657_v43 = vld [vmem:[#allocation6 + $0x7b8] sm:$0xff] }
 0x27a   :  { %4060 = vmatpush1.bf16.msra.mxu1 %v8857_v56  ;;  %3897 = vmatprep.subr.bf16.mxu0 %v8864_v58  ;;  %v612_v56 = vld [vmem:[#allocation6 + $0x650] sm:$0xff] }
 0x27b   :  { %4061 = vmatprep.subr.bf16.mxu1 %v8866_v59  ;;  %v616_v58 = vld [vmem:[#allocation6 + $0x670] sm:$0xff]  ;;  %v613_v59 = vld [vmem:[#allocation6 + $0x658] sm:$0xff] }
 0x27c   :  { %v8920_v2 = vcombine.high %v612_v56, %v616_v58  ;;  %v8919_v7 = vcombine.low %v612_v56, %v616_v58  ;;  %v8921_v8 = vcombine.low %v613_v59, %v617_v60  ;;  %v665_v56 = vld [vmem:[#allocation6 + $0x7f8] sm:$0xff] }
 0x27d   :  { %3898 = vmatpush1.bf16.msra.mxu0 %v8863_v3  ;;  %v8922_v3 = vcombine.high %v613_v59, %v617_v60 }
 0x27e   :  { %4062 = vmatpush1.bf16.msra.mxu1 %v8865_v55  ;;  %3899 = vmatprep.subr.bf16.mxu0 %v8872_v47  ;;  %v620_v55 = vld [vmem:[#allocation6 + $0x690] sm:$0xff] }
 0x27f   :  { %4063 = vmatprep.subr.bf16.mxu1 %v8874_v4  ;;  %v624_v47 = vld [vmem:[#allocation6 + $0x6b0] sm:$0xff]  ;;  %v621_v4 = vld [vmem:[#allocation6 + $0x698] sm:$0xff] }
 0x280   :  { %v8928_v30 = vcombine.high %v620_v55, %v624_v47  ;;  %v8927_v12 = vcombine.low %v620_v55, %v624_v47  ;;  %v8929_v13 = vcombine.low %v621_v4, %v625_v5  ;;  %v673_v55 = vld [vmem:[#allocation6 + $0x838] sm:$0xff] }
 0x281   :  { %3900 = vmatpush1.bf16.msra.mxu0 %v8871_v62  ;;  %v8930_v62 = vcombine.high %v621_v4, %v625_v5 }
 0x282   :  { %4064 = vmatpush1.bf16.msra.mxu1 %v8873_v9  ;;  %3901 = vmatprep.subr.bf16.mxu0 %v8880_v63  ;;  %v628_v9 = vld [vmem:[#allocation6 + $0x6d0] sm:$0xff] }
 0x283   :  { %4065 = vmatprep.subr.bf16.mxu1 %v8882_v10  ;;  %v632_v63 = vld [vmem:[#allocation6 + $0x6f0] sm:$0xff]  ;;  %v629_v10 = vld [vmem:[#allocation6 + $0x6d8] sm:$0xff] }
 0x284   :  { %v8936_v14 = vcombine.high %v628_v9, %v632_v63  ;;  %v8935_v21 = vcombine.low %v628_v9, %v632_v63  ;;  %v8937_v39 = vcombine.low %v629_v10, %v633_v11  ;;  %v677_v9 = vld [vmem:[#allocation6 + $0x858] sm:$0xff] }
 0x285   :  { %3902 = vmatpush1.bf16.msra.mxu0 %v8879_v15  ;;  %v8938_v15 = vcombine.high %v629_v10, %v633_v11  ;;  %v681_v63 = vld [vmem:[#allocation6 + $0x878] sm:$0xff] }
 0x286   :  { %4066 = vmatpush1.bf16.msra.mxu1 %v8881_v17  ;;  %3903 = vmatprep.subr.bf16.mxu0 %v8888_v51  ;;  %v636_v17 = vld [vmem:[#allocation6 + $0x710] sm:$0xff] }
 0x287   :  { %4067 = vmatprep.subr.bf16.mxu1 %v8890_v19  ;;  %v640_v51 = vld [vmem:[#allocation6 + $0x730] sm:$0xff]  ;;  %v637_v19 = vld [vmem:[#allocation6 + $0x718] sm:$0xff] }
 0x288   :  { %v8944_v22 = vcombine.high %v636_v17, %v640_v51  ;;  %v8943_v0 = vcombine.low %v636_v17, %v640_v51  ;;  %v8945_v35 = vcombine.low %v637_v19, %v641_v20  ;;  %v689_v17 = vld [vmem:[#allocation6 + $0x8b8] sm:$0xff] }
 0x289   :  { %3904 = vmatpush1.bf16.msra.mxu0 %v8887_v24  ;;  %v8946_v24 = vcombine.high %v637_v19, %v641_v20  ;;  %v8985_v19 = vcombine.low %v677_v9, %v681_v63 }
 0x28a   :  { %4068 = vmatpush1.bf16.msra.mxu1 %v8889_v25  ;;  %3905 = vmatprep.subr.bf16.mxu0 %v8896_v27  ;;  %v644_v25 = vld [vmem:[#allocation6 + $0x750] sm:$0xff] }
 0x28b   :  { %4069 = vmatprep.subr.bf16.mxu1 %v8898_v54  ;;  %v648_v27 = vld [vmem:[#allocation6 + $0x770] sm:$0xff]  ;;  %v645_v54 = vld [vmem:[#allocation6 + $0x758] sm:$0xff] }
 0x28c   :  { %v8952_v28 = vcombine.high %v644_v25, %v648_v27  ;;  %v8951_v45 = vcombine.low %v644_v25, %v648_v27  ;;  %v8953_v46 = vcombine.low %v645_v54, %v649_v34  ;;  %v697_v25 = vld [vmem:[#allocation6 + $0x8f8] sm:$0xff] }
 0x28d   :  { %3906 = vmatpush1.bf16.msra.mxu0 %v8895_v36  ;;  %v8954_v36 = vcombine.high %v645_v54, %v649_v34 }
 0x28e   :  { %4070 = vmatpush1.bf16.msra.mxu1 %v8897_v37  ;;  %3907 = vmatprep.subr.bf16.mxu0 %v8904_v38  ;;  %v652_v37 = vld [vmem:[#allocation6 + $0x790] sm:$0xff] }
 0x28f   :  { %4071 = vmatprep.subr.bf16.mxu1 %v8906_v40  ;;  %v656_v38 = vld [vmem:[#allocation6 + $0x7b0] sm:$0xff]  ;;  %v653_v40 = vld [vmem:[#allocation6 + $0x798] sm:$0xff] }
 0x290   :  { %v8960_v48 = vcombine.high %v652_v37, %v656_v38  ;;  %v8959_v58 = vcombine.low %v652_v37, %v656_v38  ;;  %v8961_v59 = vcombine.low %v653_v40, %v657_v43 }
 0x291   :  { %3908 = vmatpush1.bf16.msra.mxu0 %v8903_v49  ;;  %v8962_v49 = vcombine.high %v653_v40, %v657_v43  ;;  %v708_v43 = vld [vmem:[#allocation6 + $0x950] sm:$0xff] }
 0x292   :  { %4072 = vmatpush1.bf16.msra.mxu1 %v8905_v50  ;;  %3909 = vmatprep.subr.bf16.mxu0 %v8912_v52  ;;  %v660_v50 = vld [vmem:[#allocation6 + $0x7d0] sm:$0xff] }
 0x293   :  { %4073 = vmatprep.subr.bf16.mxu1 %v8914_v53  ;;  %v664_v52 = vld [vmem:[#allocation6 + $0x7f0] sm:$0xff]  ;;  %v661_v53 = vld [vmem:[#allocation6 + $0x7d8] sm:$0xff] }
 0x294   :  { %v8968_v60 = vcombine.high %v660_v50, %v664_v52  ;;  %v8967_v47 = vcombine.low %v660_v50, %v664_v52  ;;  %v8969_v4 = vcombine.low %v661_v53, %v665_v56 }
 0x295   :  { %3910 = vmatpush1.bf16.msra.mxu0 %v8911_v61  ;;  %v8970_v61 = vcombine.high %v661_v53, %v665_v56  ;;  %v716_v56 = vld [vmem:[#allocation6 + $0x990] sm:$0xff] }
 0x296   :  { %4074 = vmatpush1.bf16.msra.mxu1 %v8913_v1  ;;  %3911 = vmatprep.subr.bf16.mxu0 %v8920_v2  ;;  %v668_v1 = vld [vmem:[#allocation6 + $0x810] sm:$0xff] }
 0x297   :  { %4075 = vmatprep.subr.bf16.mxu1 %v8922_v3  ;;  %v672_v2 = vld [vmem:[#allocation6 + $0x830] sm:$0xff]  ;;  %v669_v3 = vld [vmem:[#allocation6 + $0x818] sm:$0xff] }
 0x298   :  { %v8976_v5 = vcombine.high %v668_v1, %v672_v2  ;;  %v8977_v10 = vcombine.low %v669_v3, %v673_v55 }
 0x299   :  { %3912 = vmatpush1.bf16.msra.mxu0 %v8919_v7  ;;  %v8978_v7 = vcombine.high %v669_v3, %v673_v55  ;;  %v724_v55 = vld [vmem:[#allocation6 + $0x9d0] sm:$0xff] }
 0x29a   :  { %4076 = vmatpush1.bf16.msra.mxu1 %v8921_v8  ;;  %3913 = vmatprep.subr.bf16.mxu0 %v8928_v30  ;;  %v676_v8 = vld [vmem:[#allocation6 + $0x850] sm:$0xff] }
 0x29b   :  { %4077 = vmatprep.subr.bf16.mxu1 %v8930_v62  ;;  %v680_v30 = vld [vmem:[#allocation6 + $0x870] sm:$0xff]  ;;  %v8975_v62 = vcombine.low %v668_v1, %v672_v2 }
 0x29c   :  { %v8984_v11 = vcombine.high %v676_v8, %v680_v30  ;;  %v8983_v51 = vcombine.low %v676_v8, %v680_v30 }
 0x29d   :  { %3914 = vmatpush1.bf16.msra.mxu0 %v8927_v12  ;;  %v684_v12 = vld [vmem:[#allocation6 + $0x890] sm:$0xff] }
 0x29e   :  { %4078 = vmatpush1.bf16.msra.mxu1 %v8929_v13  ;;  %3915 = vmatprep.subr.bf16.mxu0 %v8936_v14  ;;  %v688_v13 = vld [vmem:[#allocation6 + $0x8b0] sm:$0xff]  ;;  %v8986_v14 = vcombine.high %v677_v9, %v681_v63 }
 0x29f   :  { %4079 = vmatprep.subr.bf16.mxu1 %v8938_v15  ;;  %v685_v15 = vld [vmem:[#allocation6 + $0x898] sm:$0xff]  ;;  %v8992_v20 = vcombine.high %v684_v12, %v688_v13  ;;  %v8991_v27 = vcombine.low %v684_v12, %v688_v13  ;;  %v732_v9 = vld [vmem:[#allocation6 + $0xa10] sm:$0xff] }
 0x2a0   :  { %v736_v63 = vld [vmem:[#allocation6 + $0xa30] sm:$0xff] }
 0x2a1   :  { %3916 = vmatpush1.bf16.msra.mxu0 %v8935_v21  ;;  %v8994_v21 = vcombine.high %v685_v15, %v689_v17 }
 0x2a2   :  { %4080 = vmatpush1.bf16.msra.mxu1 %v8937_v39  ;;  %3917 = vmatprep.subr.bf16.mxu0 %v8944_v22  ;;  %v692_v39 = vld [vmem:[#allocation6 + $0x8d0] sm:$0xff] }
 0x2a3   :  { %4081 = vmatprep.subr.bf16.mxu1 %v8946_v24  ;;  %v696_v22 = vld [vmem:[#allocation6 + $0x8f0] sm:$0xff]  ;;  %v693_v24 = vld [vmem:[#allocation6 + $0x8d8] sm:$0xff] }
 0x2a4   :  { %v9000_v54 = vcombine.high %v692_v39, %v696_v22  ;;  %v9002_v34 = vcombine.high %v693_v24, %v697_v25  ;;  %v9001_v37 = vcombine.low %v693_v24, %v697_v25  ;;  %v748_v25 = vld [vmem:[#allocation6 + $0xa90] sm:$0xff] }
 0x2a5   :  { %3918 = vmatpush1.bf16.msra.mxu0 %v8943_v0  ;;  %v700_v0 = vld [vmem:[#allocation6 + $0x910] sm:$0xff] }
 0x2a6   :  { %4082 = vmatpush1.bf16.msra.mxu1 %v8945_v35  ;;  %3919 = vmatprep.subr.bf16.mxu0 %v8952_v28  ;;  %v704_v35 = vld [vmem:[#allocation6 + $0x930] sm:$0xff]  ;;  %v701_v28 = vld [vmem:[#allocation6 + $0x918] sm:$0xff] }
 0x2a7   :  { %4083 = vmatprep.subr.bf16.mxu1 %v8954_v36  ;;  %v705_v36 = vld [vmem:[#allocation6 + $0x938] sm:$0xff]  ;;  %v9008_v38 = vcombine.high %v700_v0, %v704_v35 }
 0x2a8   :  { %v9010_v40 = vcombine.high %v701_v28, %v705_v36  ;;  %v9009_v50 = vcombine.low %v701_v28, %v705_v36  ;;  %v756_v36 = vld [vmem:[#allocation6 + $0xad0] sm:$0xff] }
 0x2a9   :  { %3920 = vmatpush1.bf16.msra.mxu0 %v8951_v45  ;;  %v712_v45 = vld [vmem:[#allocation6 + $0x970] sm:$0xff] }
 0x2aa   :  { %4084 = vmatpush1.bf16.msra.mxu1 %v8953_v46  ;;  %3921 = vmatprep.subr.bf16.mxu0 %v8960_v48  ;;  %v709_v46 = vld [vmem:[#allocation6 + $0x958] sm:$0xff]  ;;  %v9016_v52 = vcombine.high %v708_v43, %v712_v45 }
 0x2ab   :  { %4085 = vmatprep.subr.bf16.mxu1 %v8962_v49  ;;  %v713_v48 = vld [vmem:[#allocation6 + $0x978] sm:$0xff]  ;;  %v9007_v49 = vcombine.low %v700_v0, %v704_v35 }
 0x2ac   :  { %v9018_v53 = vcombine.high %v709_v46, %v713_v48  ;;  %v9017_v1 = vcombine.low %v709_v46, %v713_v48  ;;  %v764_v48 = vld [vmem:[#allocation6 + $0xb10] sm:$0xff] }
 0x2ad   :  { %3922 = vmatpush1.bf16.msra.mxu0 %v8959_v58  ;;  %v720_v58 = vld [vmem:[#allocation6 + $0x9b0] sm:$0xff] }
 0x2ae   :  { %4086 = vmatpush1.bf16.msra.mxu1 %v8961_v59  ;;  %3923 = vmatprep.subr.bf16.mxu0 %v8968_v60  ;;  %v717_v59 = vld [vmem:[#allocation6 + $0x998] sm:$0xff]  ;;  %v9024_v2 = vcombine.high %v716_v56, %v720_v58 }
 0x2af   :  { %4087 = vmatprep.subr.bf16.mxu1 %v8970_v61  ;;  %v721_v60 = vld [vmem:[#allocation6 + $0x9b8] sm:$0xff]  ;;  %v9015_v61 = vcombine.low %v708_v43, %v712_v45 }
 0x2b0   :  { %v9026_v3 = vcombine.high %v717_v59, %v721_v60  ;;  %v9025_v8 = vcombine.low %v717_v59, %v721_v60  ;;  %v772_v60 = vld [vmem:[#allocation6 + $0xb50] sm:$0xff] }
 0x2b1   :  { %3924 = vmatpush1.bf16.msra.mxu0 %v8967_v47  ;;  %v728_v47 = vld [vmem:[#allocation6 + $0x9f0] sm:$0xff] }
 0x2b2   :  { %4088 = vmatpush1.bf16.msra.mxu1 %v8969_v4  ;;  %3934 = vmatprep.subr.bf16.mxu0 %v8976_v5  ;;  %v725_v4 = vld [vmem:[#allocation6 + $0x9d8] sm:$0xff]  ;;  %v9032_v30 = vcombine.high %v724_v55, %v728_v47  ;;  %v9031_v12 = vcombine.low %v724_v55, %v728_v47 }
 0x2b3   :  { %4098 = vmatprep.subr.bf16.mxu1 %v8978_v7  ;;  %v729_v5 = vld [vmem:[#allocation6 + $0x9f8] sm:$0xff]  ;;  %v9023_v7 = vcombine.low %v716_v56, %v720_v58 }
 0x2b4   :  { %3926 = vmatmul.mubr.bf16.vlgmr.msra.gmra.mrb[12].mxu0 %v10511_v33  ;;  %v9033_v13 = vcombine.low %v725_v4, %v729_v5 }
 0x2b5   :  { %4090 = vmatmul.mubr.bf16.vlgmr.msra.gmra.mrb[12].mxu1 %v10511_v33  ;;  %3935 = vmatpush1.bf16.msra.mxu0 %v8975_v62  ;;  %v8993_v33 = vcombine.low %v685_v15, %v689_v17  ;;  %v9034_v62 = vcombine.high %v725_v4, %v729_v5  ;;  %v740_v17 = vld [vmem:[#allocation6 + $0xa50] sm:$0xff] }
 0x2b6   :  { %3966 = vmatprep.mubr.bf16.mxu0 %v10513_v42  ;;  %4099 = vmatpush1.bf16.msra.mxu1 %v8977_v10  ;;  %v733_v10 = vld [vmem:[#allocation6 + $0xa18] sm:$0xff]  ;;  %v780_v5 = vld [vmem:[#allocation6 + $0xb90] sm:$0xff] }
 0x2b7   :  { %4130 = vmatprep.mubr.bf16.mxu1 %v10513_v42  ;;  %3936 = vmatprep.subr.bf16.mxu0 %v8984_v11  ;;  %v8999_v42 = vcombine.low %v692_v39, %v696_v22  ;;  %v737_v11 = vld [vmem:[#allocation6 + $0xa38] sm:$0xff] }
 0x2b8   :  { %4100 = vmatprep.subr.bf16.mxu1 %v8986_v14  ;;  %v9040_v14 = vcombine.high %v732_v9, %v736_v63  ;;  %v9042_v15 = vcombine.high %v733_v10, %v737_v11  ;;  %v9041_v39 = vcombine.low %v733_v10, %v737_v11  ;;  %v788_v11 = vld [vmem:[#allocation6 + $0xbd0] sm:$0xff] }
 0x2b9   :  { %3937 = vmatpush1.bf16.msra.mxu0 %v8983_v51  ;;  %v744_v51 = vld [vmem:[#allocation6 + $0xa70] sm:$0xff] }
 0x2ba   :  { %4101 = vmatpush1.bf16.msra.mxu1 %v8985_v19  ;;  %3938 = vmatprep.subr.bf16.mxu0 %v8992_v20  ;;  %v741_v19 = vld [vmem:[#allocation6 + $0xa58] sm:$0xff]  ;;  %v9048_v22 = vcombine.high %v740_v17, %v744_v51 }
 0x2bb   :  { %4102 = vmatprep.subr.bf16.mxu1 %v8994_v21  ;;  %v745_v20 = vld [vmem:[#allocation6 + $0xa78] sm:$0xff]  ;;  %v9039_v21 = vcombine.low %v732_v9, %v736_v63 }
 0x2bc   :  { %v9050_v24 = vcombine.high %v741_v19, %v745_v20  ;;  %v9049_v0 = vcombine.low %v741_v19, %v745_v20  ;;  %v796_v20 = vld [vmem:[#allocation6 + $0xc10] sm:$0xff] }
 0x2bd   :  { %3939 = vmatpush1.bf16.msra.mxu0 %v8991_v27  ;;  %v752_v27 = vld [vmem:[#allocation6 + $0xab0] sm:$0xff] }
 0x2be   :  { %4103 = vmatpush1.bf16.msra.mxu1 %v8993_v33  ;;  %3940 = vmatprep.subr.bf16.mxu0 %v9000_v54  ;;  %v749_v33 = vld [vmem:[#allocation6 + $0xa98] sm:$0xff]  ;;  %v9056_v35 = vcombine.high %v748_v25, %v752_v27 }
 0x2bf   :  { %4104 = vmatprep.subr.bf16.mxu1 %v9002_v34  ;;  %v753_v54 = vld [vmem:[#allocation6 + $0xab8] sm:$0xff]  ;;  %v9047_v34 = vcombine.low %v740_v17, %v744_v51 }
 0x2c0   :  { %v9058_v28 = vcombine.high %v749_v33, %v753_v54  ;;  %v9057_v43 = vcombine.low %v749_v33, %v753_v54  ;;  %v804_v54 = vld [vmem:[#allocation6 + $0xc50] sm:$0xff] }
 0x2c1   :  { %3941 = vmatpush1.bf16.msra.mxu0 %v8999_v42  ;;  %v760_v42 = vld [vmem:[#allocation6 + $0xaf0] sm:$0xff] }
 0x2c2   :  { %4105 = vmatpush1.bf16.msra.mxu1 %v9001_v37  ;;  %3942 = vmatprep.subr.bf16.mxu0 %v9008_v38  ;;  %v757_v37 = vld [vmem:[#allocation6 + $0xad8] sm:$0xff]  ;;  %v9064_v45 = vcombine.high %v756_v36, %v760_v42 }
 0x2c3   :  { %4106 = vmatprep.subr.bf16.mxu1 %v9010_v40  ;;  %v761_v38 = vld [vmem:[#allocation6 + $0xaf8] sm:$0xff]  ;;  %v9055_v40 = vcombine.low %v748_v25, %v752_v27 }
 0x2c4   :  { %v9066_v46 = vcombine.high %v757_v37, %v761_v38  ;;  %v9065_v56 = vcombine.low %v757_v37, %v761_v38  ;;  %v812_v37 = vld [vmem:[#allocation6 + $0xc90] sm:$0xff] }
 0x2c5   :  { %3943 = vmatpush1.bf16.msra.mxu0 %v9007_v49  ;;  %v768_v49 = vld [vmem:[#allocation6 + $0xb30] sm:$0xff] }
 0x2c6   :  { %4107 = vmatpush1.bf16.msra.mxu1 %v9009_v50  ;;  %3944 = vmatprep.subr.bf16.mxu0 %v9016_v52  ;;  %v765_v50 = vld [vmem:[#allocation6 + $0xb18] sm:$0xff]  ;;  %v9072_v58 = vcombine.high %v764_v48, %v768_v49  ;;  %v816_v38 = vld [vmem:[#allocation6 + $0xcb0] sm:$0xff] }
 0x2c7   :  { %4108 = vmatprep.subr.bf16.mxu1 %v9018_v53  ;;  %v769_v52 = vld [vmem:[#allocation6 + $0xb38] sm:$0xff]  ;;  %v9063_v53 = vcombine.low %v756_v36, %v760_v42 }
 0x2c8   :  { %v9074_v59 = vcombine.high %v765_v50, %v769_v52  ;;  %v9073_v55 = vcombine.low %v765_v50, %v769_v52  ;;  %v820_v52 = vld [vmem:[#allocation6 + $0xcd0] sm:$0xff] }
 0x2c9   :  { %3945 = vmatpush1.bf16.msra.mxu0 %v9015_v61  ;;  %v776_v61 = vld [vmem:[#allocation6 + $0xb70] sm:$0xff] }
 0x2ca   :  { %4109 = vmatpush1.bf16.msra.mxu1 %v9017_v1  ;;  %3946 = vmatprep.subr.bf16.mxu0 %v9024_v2  ;;  %v773_v1 = vld [vmem:[#allocation6 + $0xb58] sm:$0xff]  ;;  %v9080_v47 = vcombine.high %v772_v60, %v776_v61 }
 0x2cb   :  { %4110 = vmatprep.subr.bf16.mxu1 %v9026_v3  ;;  %v777_v2 = vld [vmem:[#allocation6 + $0xb78] sm:$0xff]  ;;  %v9071_v3 = vcombine.low %v764_v48, %v768_v49  ;;  %v9120_v49 = vcombine.high %v812_v37, %v816_v38 }
 0x2cc   :  { %v9082_v4 = vcombine.high %v773_v1, %v777_v2  ;;  %v9081_v9 = vcombine.low %v773_v1, %v777_v2  ;;  %v828_v1 = vld [vmem:[#allocation6 + $0xd10] sm:$0xff] }
 0x2cd   :  { %3947 = vmatpush1.bf16.msra.mxu0 %v9023_v7  ;;  %v784_v7 = vld [vmem:[#allocation6 + $0xbb0] sm:$0xff] }
 0x2ce   :  { %4111 = vmatpush1.bf16.msra.mxu1 %v9025_v8  ;;  %3948 = vmatprep.subr.bf16.mxu0 %v9032_v30  ;;  %v781_v8 = vld [vmem:[#allocation6 + $0xb98] sm:$0xff]  ;;  %v9088_v63 = vcombine.high %v780_v5, %v784_v7  ;;  %v832_v2 = vld [vmem:[#allocation6 + $0xd30] sm:$0xff] }
 0x2cf   :  { %4112 = vmatprep.subr.bf16.mxu1 %v9034_v62  ;;  %v785_v30 = vld [vmem:[#allocation6 + $0xbb8] sm:$0xff]  ;;  %v9079_v62 = vcombine.low %v772_v60, %v776_v61 }
 0x2d0   :  { %v9090_v10 = vcombine.high %v781_v8, %v785_v30  ;;  %v9089_v17 = vcombine.low %v781_v8, %v785_v30  ;;  %v840_v8 = vld [vmem:[#allocation6 + $0xd70] sm:$0xff]  ;;  %v837_v30 = vld [vmem:[#allocation6 + $0xd58] sm:$0xff] }
 0x2d1   :  { %3949 = vmatpush1.bf16.msra.mxu0 %v9031_v12  ;;  %v792_v12 = vld [vmem:[#allocation6 + $0xbf0] sm:$0xff] }
 0x2d2   :  { %4113 = vmatpush1.bf16.msra.mxu1 %v9033_v13  ;;  %3950 = vmatprep.subr.bf16.mxu0 %v9040_v14  ;;  %v789_v13 = vld [vmem:[#allocation6 + $0xbd8] sm:$0xff]  ;;  %v9096_v51 = vcombine.high %v788_v11, %v792_v12 }
 0x2d3   :  { %4114 = vmatprep.subr.bf16.mxu1 %v9042_v15  ;;  %v793_v14 = vld [vmem:[#allocation6 + $0xbf8] sm:$0xff]  ;;  %v9087_v15 = vcombine.low %v780_v5, %v784_v7  ;;  %v836_v7 = vld [vmem:[#allocation6 + $0xd50] sm:$0xff] }
 0x2d4   :  { %v9098_v19 = vcombine.high %v789_v13, %v793_v14  ;;  %v9097_v25 = vcombine.low %v789_v13, %v793_v14  ;;  %v848_v13 = vld [vmem:[#allocation6 + $0xdb0] sm:$0xff]  ;;  %v845_v14 = vld [vmem:[#allocation6 + $0xd98] sm:$0xff] }
 0x2d5   :  { %3951 = vmatpush1.bf16.msra.mxu0 %v9039_v21  ;;  %v800_v21 = vld [vmem:[#allocation6 + $0xc30] sm:$0xff] }
 0x2d6   :  { %4115 = vmatpush1.bf16.msra.mxu1 %v9041_v39  ;;  %3952 = vmatprep.subr.bf16.mxu0 %v9048_v22  ;;  %v797_v39 = vld [vmem:[#allocation6 + $0xc18] sm:$0xff]  ;;  %v9104_v27 = vcombine.high %v796_v20, %v800_v21 }
 0x2d7   :  { %4116 = vmatprep.subr.bf16.mxu1 %v9050_v24  ;;  %v801_v22 = vld [vmem:[#allocation6 + $0xc38] sm:$0xff]  ;;  %v9095_v24 = vcombine.low %v788_v11, %v792_v12  ;;  %v844_v12 = vld [vmem:[#allocation6 + $0xd90] sm:$0xff] }
 0x2d8   :  { %v9106_v33 = vcombine.high %v797_v39, %v801_v22  ;;  %v9105_v36 = vcombine.low %v797_v39, %v801_v22  ;;  %v852_v22 = vld [vmem:[#allocation6 + $0xdd0] sm:$0xff] }
 0x2d9   :  { %3953 = vmatpush1.bf16.msra.mxu0 %v9047_v34  ;;  %v808_v34 = vld [vmem:[#allocation6 + $0xc70] sm:$0xff] }
 0x2da   :  { %4117 = vmatpush1.bf16.msra.mxu1 %v9049_v0  ;;  %3954 = vmatprep.subr.bf16.mxu0 %v9056_v35  ;;  %v9103_v0 = vcombine.low %v796_v20, %v800_v21  ;;  %v805_v35 = vld [vmem:[#allocation6 + $0xc58] sm:$0xff]  ;;  %v9112_v42 = vcombine.high %v804_v54, %v808_v34 }
 0x2db   :  { %4118 = vmatprep.subr.bf16.mxu1 %v9058_v28  ;;  %v809_v28 = vld [vmem:[#allocation6 + $0xc78] sm:$0xff] }
 0x2dc   :  { %v9113_v48 = vcombine.low %v805_v35, %v809_v28 }
 0x2dd   :  { %3955 = vmatpush1.bf16.msra.mxu0 %v9055_v40  ;;  %v9114_v40 = vcombine.high %v805_v35, %v809_v28  ;;  %v9151_v35 = vcombine.low %v844_v12, %v848_v13 }
 0x2de   :  { %4119 = vmatpush1.bf16.msra.mxu1 %v9057_v43  ;;  %3956 = vmatprep.subr.bf16.mxu0 %v9064_v45  ;;  %v813_v43 = vld [vmem:[#allocation6 + $0xc98] sm:$0xff] }
 0x2df   :  { %4120 = vmatprep.subr.bf16.mxu1 %v9066_v46  ;;  %v817_v45 = vld [vmem:[#allocation6 + $0xcb8] sm:$0xff]  ;;  %v9111_v46 = vcombine.low %v804_v54, %v808_v34 }
 0x2e0   :  { %v9122_v50 = vcombine.high %v813_v43, %v817_v45  ;;  %v857_v54 = vld [vmem:[#allocation6 + $0xdf8] sm:$0xff] }
 0x2e1   :  { %3957 = vmatpush1.bf16.msra.mxu0 %v9063_v53  ;;  %v824_v53 = vld [vmem:[#allocation6 + $0xcf0] sm:$0xff] }
 0x2e2   :  { %4121 = vmatpush1.bf16.msra.mxu1 %v9065_v56  ;;  %3958 = vmatprep.subr.bf16.mxu0 %v9072_v58  ;;  %v821_v56 = vld [vmem:[#allocation6 + $0xcd8] sm:$0xff]  ;;  %v9128_v60 = vcombine.high %v820_v52, %v824_v53 }
 0x2e3   :  { %4122 = vmatprep.subr.bf16.mxu1 %v9074_v59  ;;  %v825_v58 = vld [vmem:[#allocation6 + $0xcf8] sm:$0xff]  ;;  %v9119_v59 = vcombine.low %v812_v37, %v816_v38 }
 0x2e4   :  { %v9130_v61 = vcombine.high %v821_v56, %v825_v58 }
 0x2e5   :  { %3959 = vmatpush1.bf16.msra.mxu0 %v9071_v3  ;;  %v829_v3 = vld [vmem:[#allocation6 + $0xd18] sm:$0xff] }
 0x2e6   :  { %4123 = vmatpush1.bf16.msra.mxu1 %v9073_v55  ;;  %3960 = vmatprep.subr.bf16.mxu0 %v9080_v47  ;;  %v833_v55 = vld [vmem:[#allocation6 + $0xd38] sm:$0xff]  ;;  %v9129_v47 = vcombine.low %v821_v56, %v825_v58  ;;  %v872_v56 = vld [vmem:[#allocation6 + $0xe70] sm:$0xff] }
 0x2e7   :  { %4124 = vmatprep.subr.bf16.mxu1 %v9082_v4  ;;  %v9136_v4 = vcombine.high %v828_v1, %v832_v2  ;;  %v9138_v5 = vcombine.high %v829_v3, %v833_v55  ;;  %v869_v58 = vld [vmem:[#allocation6 + $0xe58] sm:$0xff] }
 0x2e9   :  { %3961 = vmatpush1.bf16.msra.mxu0 %v9079_v62  ;;  %v841_v62 = vld [vmem:[#allocation6 + $0xd78] sm:$0xff] }
 0x2ea   :  { %4125 = vmatpush1.bf16.msra.mxu1 %v9081_v9  ;;  %3962 = vmatprep.subr.bf16.mxu0 %v9088_v63  ;;  %v9135_v9 = vcombine.low %v828_v1, %v832_v2  ;;  %v9137_v63 = vcombine.low %v829_v3, %v833_v55  ;;  %v9146_v11 = vcombine.high %v837_v30, %v841_v62  ;;  %v876_v2 = vld [vmem:[#allocation6 + $0xe90] sm:$0xff]  ;;  %v877_v55 = vld [vmem:[#allocation6 + $0xe98] sm:$0xff] }
 0x2eb   :  { %4126 = vmatprep.subr.bf16.mxu1 %v9090_v10  ;;  %v9144_v10 = vcombine.high %v836_v7, %v840_v8  ;;  %v880_v3 = vld [vmem:[#allocation6 + $0xeb0] sm:$0xff] }
 0x2ed   :  { %3963 = vmatpush1.bf16.msra.mxu0 %v9087_v15  ;;  %v849_v15 = vld [vmem:[#allocation6 + $0xdb8] sm:$0xff] }
 0x2ee   :  { %4127 = vmatpush1.bf16.msra.mxu1 %v9089_v17  ;;  %3964 = vmatprep.subr.bf16.mxu0 %v9096_v51  ;;  %v9143_v17 = vcombine.low %v836_v7, %v840_v8  ;;  %v9145_v51 = vcombine.low %v837_v30, %v841_v62  ;;  %v9154_v39 = vcombine.high %v845_v14, %v849_v15  ;;  %v884_v8 = vld [vmem:[#allocation6 + $0xed0] sm:$0xff]  ;;  %v885_v62 = vld [vmem:[#allocation6 + $0xed8] sm:$0xff] }
 0x2ef   :  { %4128 = vmatprep.subr.bf16.mxu1 %v9098_v19  ;;  %v9152_v19 = vcombine.high %v844_v12, %v848_v13  ;;  %v888_v30 = vld [vmem:[#allocation6 + $0xef0] sm:$0xff] }
 0x2f0   :  { %v892_v13 = vld [vmem:[#allocation6 + $0xf10] sm:$0xff] }
 0x2f1   :  { %3965 = vmatpush1.bf16.msra.mxu0 %v9095_v24  ;;  %v856_v24 = vld [vmem:[#allocation6 + $0xdf0] sm:$0xff] }
 0x2f2   :  { %4129 = vmatpush1.bf16.msra.mxu1 %v9097_v25  ;;  %3975 = vmatprep.subr.bf16.mxu0 %v9104_v27  ;;  %v9160_v37 = vcombine.high %v852_v22, %v856_v24 }
 0x2f3   :  { %4139 = vmatprep.subr.bf16.mxu1 %v9106_v33  ;;  %v853_v33 = vld [vmem:[#allocation6 + $0xdd8] sm:$0xff] }
 0x2f4   :  { %3967 = vmatmul.mubr.bf16.vlgmr.msra.gmra.mrb[12].mxu0 %v10531_v16  ;;  %v9162_v38 = vcombine.high %v853_v33, %v857_v54 }
 0x2f5   :  { %4131 = vmatmul.mubr.bf16.vlgmr.msra.gmra.mrb[12].mxu1 %v10531_v16  ;;  %3976 = vmatpush1.bf16.msra.mxu0 %v9103_v0  ;;  %v9121_v16 = vcombine.low %v813_v43, %v817_v45  ;;  %v864_v43 = vld [vmem:[#allocation6 + $0xe30] sm:$0xff]  ;;  %v861_v45 = vld [vmem:[#allocation6 + $0xe18] sm:$0xff] }
 0x2f6   :  { %4007 = vmatprep.mubr.bf16.mxu0 %v10533_v23  ;;  %4140 = vmatpush1.bf16.msra.mxu1 %v9105_v36 }
 0x2f7   :  { %4171 = vmatprep.mubr.bf16.mxu1 %v10533_v23  ;;  %3977 = vmatprep.subr.bf16.mxu0 %v9112_v42  ;;  %v9127_v23 = vcombine.low %v820_v52, %v824_v53  ;;  %v9153_v42 = vcombine.low %v845_v14, %v849_v15  ;;  %v868_v53 = vld [vmem:[#allocation6 + $0xe50] sm:$0xff]  ;;  %v893_v15 = vld [vmem:[#allocation6 + $0xf18] sm:$0xff] }
 0x2f8   :  { %4141 = vmatprep.subr.bf16.mxu1 %v9114_v40  ;;  %v860_v40 = vld [vmem:[#allocation6 + $0xe10] sm:$0xff] }
 0x2f9   :  { %3978 = vmatpush1.bf16.msra.mxu0 %v9111_v46  ;;  %v865_v46 = vld [vmem:[#allocation6 + $0xe38] sm:$0xff]  ;;  %v896_v14 = vld [vmem:[#allocation6 + $0xf30] sm:$0xff] }
 0x2fa   :  { %4142 = vmatpush1.bf16.msra.mxu1 %v9113_v48  ;;  %3979 = vmatprep.subr.bf16.mxu0 %v9120_v49  ;;  %v9159_v48 = vcombine.low %v852_v22, %v856_v24  ;;  %v9161_v49 = vcombine.low %v853_v33, %v857_v54  ;;  %v9170_v52 = vcombine.high %v861_v45, %v865_v46  ;;  %v900_v24 = vld [vmem:[#allocation6 + $0xf50] sm:$0xff]  ;;  %v901_v54 = vld [vmem:[#allocation6 + $0xf58] sm:$0xff] }
 0x2fb   :  { %4143 = vmatprep.subr.bf16.mxu1 %v9122_v50  ;;  %v9168_v50 = vcombine.high %v860_v40, %v864_v43  ;;  %v904_v33 = vld [vmem:[#allocation6 + $0xf70] sm:$0xff] }
 0x2fd   :  { %3980 = vmatpush1.bf16.msra.mxu0 %v9119_v59  ;;  %v873_v59 = vld [vmem:[#allocation6 + $0xe78] sm:$0xff] }
 0x2fe   :  { %4144 = vmatpush1.bf16.msra.mxu1 %v9121_v16  ;;  %3981 = vmatprep.subr.bf16.mxu0 %v9128_v60  ;;  %v9167_v16 = vcombine.low %v860_v40, %v864_v43  ;;  %v9169_v60 = vcombine.low %v861_v45, %v865_v46  ;;  %v9178_v1 = vcombine.high %v869_v58, %v873_v59  ;;  %v913_v40 = vld [vmem:[#allocation6 + $0xfb8] sm:$0xff]  ;;  %v10570_v43 = vld [vmem:[#allocation7] sm:$0xff] }
 0x2ff   :  { %4145 = vmatprep.subr.bf16.mxu1 %v9130_v61  ;;  %v9176_v61 = vcombine.high %v868_v53, %v872_v56  ;;  %v9207_v45 = vcombine.low %v900_v24, %v904_v33 }
 0x301   :  { %3982 = vmatpush1.bf16.msra.mxu0 %v9127_v23  ;;  %v881_v23 = vld [vmem:[#allocation6 + $0xeb8] sm:$0xff] }
 0x302   :  { %4146 = vmatpush1.bf16.msra.mxu1 %v9129_v47  ;;  %3983 = vmatprep.subr.bf16.mxu0 %v9136_v4  ;;  %v9175_v47 = vcombine.low %v868_v53, %v872_v56  ;;  %v9177_v4 = vcombine.low %v869_v58, %v873_v59  ;;  %v9186_v7 = vcombine.high %v877_v55, %v881_v23  ;;  %v917_v56 = vld [vmem:[#allocation6 + $0xfd8] sm:$0xff] }
 0x303   :  { %4147 = vmatprep.subr.bf16.mxu1 %v9138_v5  ;;  %v9184_v5 = vcombine.high %v876_v2, %v880_v3  ;;  %v931_v53 = vrot.slane %v10570_v43, %v10466_v31  ;;  %v921_v58 = vld [vmem:[#allocation6 + $0xff8] sm:$0xff] }
 0x305   :  { %3984 = vmatpush1.bf16.msra.mxu0 %v9135_v9  ;;  %v889_v9 = vld [vmem:[#allocation6 + $0xef8] sm:$0xff] }
 0x306   :  { %4148 = vmatpush1.bf16.msra.mxu1 %v9137_v63  ;;  %3985 = vmatprep.subr.bf16.mxu0 %v9144_v10  ;;  %v9183_v63 = vcombine.low %v876_v2, %v880_v3  ;;  %v9185_v10 = vcombine.low %v877_v55, %v881_v23  ;;  %v9194_v12 = vcombine.high %v885_v62, %v889_v9  ;;  %v4200_v2 = vld [vmem:[#allocation9 + $0x20] sm:$0xff]  ;;  %v4197_v55 = vld [vmem:[#allocation9 + $0x8] sm:$0xff] }
 0x307   :  { %v10562_v20 = vpop.f32.mrb[8].mxu0  ;;  %v10564_v21 = vpop.f32.mrb[8].mxu1  ;;  %4149 = vmatprep.subr.bf16.mxu1 %v9146_v11  ;;  %v9192_v11 = vcombine.high %v884_v8, %v888_v30  ;;  %v4201_v23 = vld [vmem:[#allocation9 + $0x28] sm:$0xff] }
 0x308   :  { %v10566_v25 = vpop.f32.mrb[9].mxu0  ;;  %v10568_v27 = vpop.f32.mrb[9].mxu1 }
 0x309   :  { %v3685_v34 = vpop.f32.mrb[10].mxu0  ;;  %v3849_v0 = vpop.f32.mrb[10].mxu1  ;;  %3986 = vmatpush1.bf16.msra.mxu0 %v9143_v17  ;;  %v897_v17 = vld [vmem:[#allocation6 + $0xf38] sm:$0xff]  ;;  %v9893_v3 = vadd.f32 %v10566_v25, %v931_v53  ;;  %v9229_v25 = vcombine.low %v4197_v55, %v4201_v23  ;;  %v4237_v53 = vld [vmem:[#allocation9 + $0x148] sm:$0xff] }
 0x30a   :  { %4150 = vmatpush1.bf16.msra.mxu1 %v9145_v51  ;;  %v3686_v28 = vpop.f32.mrb[11].mxu0  ;;  %v3850_v36 = vpop.f32.mrb[11].mxu1  ;;  %3987 = vmatprep.subr.bf16.mxu0 %v9152_v19  ;;  %v9191_v51 = vcombine.low %v884_v8, %v888_v30  ;;  %v9193_v19 = vcombine.low %v885_v62, %v889_v9  ;;  %v9202_v22 = vcombine.high %v893_v15, %v897_v17  ;;  %v905_v34 = vld [vmem:[#allocation6 + $0xf78] sm:$0xff]  ;;  %v4204_v30 = vld [vmem:[#allocation9 + $0x40] sm:$0xff] }
 0x30b   :  { %4151 = vmatprep.subr.bf16.mxu1 %v9154_v39  ;;  %v9200_v39 = vcombine.high %v892_v13, %v896_v14  ;;  %v9199_v0 = vcombine.low %v892_v13, %v896_v14  ;;  %v9208_v28 = vcombine.high %v900_v24, %v904_v33  ;;  %v9210_v36 = vcombine.high %v901_v54, %v905_v34  ;;  %v4208_v62 = vld [vmem:[#allocation9 + $0x60] sm:$0xff] }
 0x30c   :  { %v9209_v46 = vcombine.low %v901_v54, %v905_v34  ;;  %v4181_v8 = vmax.f32 %v9893_v3, 0.0  ;;  %v4216_v13 = vld [vmem:[#allocation9 + $0xa0] sm:$0xff]  ;;  %v4221_v34 = vld [vmem:[#allocation9 + $0xc8] sm:$0xff] }
 0x30d   :  { %3988 = vmatpush1.bf16.msra.mxu0 %v9151_v35  ;;  %v9201_v35 = vcombine.low %v893_v15, %v897_v17  ;;  %v4213_v17 = vld [vmem:[#allocation9 + $0x88] sm:$0xff]  ;;  %v4220_v33 = vld [vmem:[#allocation9 + $0xc0] sm:$0xff] }
 0x30e   :  { %4152 = vmatpush1.bf16.msra.mxu1 %v9153_v42  ;;  %3989 = vmatprep.subr.bf16.mxu0 %v9160_v37  ;;  %v908_v42 = vld [vmem:[#allocation6 + $0xf90] sm:$0xff]  ;;  %v10575_v14 = vpack.c.bf16 %v4181_v8, %v4181_v8  ;;  %v4224_v54 = vld [vmem:[#allocation9 + $0xe0] sm:$0xff] }
 0x30f   :  { %4153 = vmatprep.subr.bf16.mxu1 %v9162_v38  ;;  %v912_v37 = vld [vmem:[#allocation6 + $0xfb0] sm:$0xff]  ;;  %v909_v38 = vld [vmem:[#allocation6 + $0xf98] sm:$0xff] }
 0x310   :  { %v9215_v59 = vcombine.low %v908_v42, %v912_v37  ;;  %v4249_v3 = vld [vmem:[#allocation9 + $0x1a8] sm:$0xff] }
 0x311   :  { %3990 = vmatpush1.bf16.msra.mxu0 %v9159_v48  ;;  %v9216_v48 = vcombine.high %v908_v42, %v912_v37  ;;  %v4228_v42 = vld [vmem:[#allocation9 + $0x100] sm:$0xff]  ;;  %v4253_v8 = vld [vmem:[#allocation9 + $0x1c8] sm:$0xff] }
 0x312   :  { %4154 = vmatpush1.bf16.msra.mxu1 %v9161_v49  ;;  %3991 = vmatprep.subr.bf16.mxu0 %v9168_v50  ;;  %v9218_v49 = vcombine.high %v909_v38, %v913_v40  ;;  %v916_v50 = vld [vmem:[#allocation6 + $0xfd0] sm:$0xff]  ;;  %v4232_v37 = vld [vmem:[#allocation9 + $0x120] sm:$0xff] }
 0x313   :  { %4155 = vmatprep.subr.bf16.mxu1 %v9170_v52  ;;  %v920_v52 = vld [vmem:[#allocation6 + $0xff0] sm:$0xff] }
 0x315   :  { %3992 = vmatpush1.bf16.msra.mxu0 %v9167_v16  ;;  %v9217_v16 = vcombine.low %v909_v38, %v913_v40  ;;  %v4229_v38 = vld [vmem:[#allocation9 + $0x108] sm:$0xff] }
 0x316   :  { %4156 = vmatpush1.bf16.msra.mxu1 %v9169_v60  ;;  %3993 = vmatprep.subr.bf16.mxu0 %v9176_v61  ;;  %v9224_v60 = vcombine.high %v916_v50, %v920_v52  ;;  %v9226_v61 = vcombine.high %v917_v56, %v921_v58  ;;  %v4233_v40 = vld [vmem:[#allocation9 + $0x128] sm:$0xff] }
 0x317   :  { %4157 = vmatprep.subr.bf16.mxu1 %v9178_v1  ;;  %v4196_v1 = vld [vmem:[#allocation9] sm:$0xff] }
 0x318   :  { %v9227_v9 = vcombine.low %v4196_v1, %v4200_v2 }
 0x319   :  { %3994 = vmatpush1.bf16.msra.mxu0 %v9175_v47  ;;  %v9223_v47 = vcombine.low %v916_v50, %v920_v52  ;;  %v4236_v50 = vld [vmem:[#allocation9 + $0x140] sm:$0xff] }
 0x31a   :  { %4158 = vmatpush1.bf16.msra.mxu1 %v9177_v4  ;;  %3995 = vmatprep.subr.bf16.mxu0 %v9184_v5  ;;  %v9225_v4 = vcombine.low %v917_v56, %v921_v58  ;;  %v9228_v5 = vcombine.high %v4196_v1, %v4200_v2  ;;  %v4240_v52 = vld [vmem:[#allocation9 + $0x160] sm:$0xff]  ;;  %v4241_v56 = vld [vmem:[#allocation9 + $0x168] sm:$0xff]  ;;  %v9259_v58 = vcombine.low %v4228_v42, %v4232_v37 }
 0x31b   :  { %4159 = vmatprep.subr.bf16.mxu1 %v9186_v7  ;;  %v9230_v7 = vcombine.high %v4197_v55, %v4201_v23  ;;  %v4248_v1 = vld [vmem:[#allocation9 + $0x1a0] sm:$0xff]  ;;  %v4245_v2 = vld [vmem:[#allocation9 + $0x188] sm:$0xff]  ;;  %v9267_v55 = vcombine.low %v4236_v50, %v4240_v52  ;;  %v9269_v23 = vcombine.low %v4237_v53, %v4241_v56 }
 0x31d   :  { %3996 = vmatpush1.bf16.msra.mxu0 %v9183_v63  ;;  %v4205_v63 = vld [vmem:[#allocation9 + $0x48] sm:$0xff] }
 0x31e   :  { %4160 = vmatpush1.bf16.msra.mxu1 %v9185_v10  ;;  %3997 = vmatprep.subr.bf16.mxu0 %v9192_v11  ;;  %v4209_v10 = vld [vmem:[#allocation9 + $0x68] sm:$0xff]  ;;  %v9236_v11 = vcombine.high %v4204_v30, %v4208_v62 }
 0x31f   :  { %4161 = vmatprep.subr.bf16.mxu1 %v9194_v12  ;;  %v4212_v12 = vld [vmem:[#allocation9 + $0x80] sm:$0xff]  ;;  %v9238_v15 = vcombine.high %v4205_v63, %v4209_v10 }
 0x321   :  { %3998 = vmatpush1.bf16.msra.mxu0 %v9191_v51  ;;  %v4217_v51 = vld [vmem:[#allocation9 + $0xa8] sm:$0xff] }
 0x322   :  { %4162 = vmatpush1.bf16.msra.mxu1 %v9193_v19  ;;  %3999 = vmatprep.subr.bf16.mxu0 %v9200_v39  ;;  %v9235_v19 = vcombine.low %v4204_v30, %v4208_v62  ;;  %v9237_v39 = vcombine.low %v4205_v63, %v4209_v10  ;;  %v9246_v24 = vcombine.high %v4213_v17, %v4217_v51  ;;  %v4257_v30 = vld [vmem:[#allocation9 + $0x1e8] sm:$0xff] }
 0x323   :  { %4163 = vmatprep.subr.bf16.mxu1 %v9202_v22  ;;  %v9244_v22 = vcombine.high %v4212_v12, %v4216_v13  ;;  %v9286_v10 = vcombine.high %v4253_v8, %v4257_v30 }
 0x325   :  { %4000 = vmatpush1.bf16.msra.mxu0 %v9199_v0  ;;  %v4225_v0 = vld [vmem:[#allocation9 + $0xe8] sm:$0xff] }
 0x326   :  { %4164 = vmatpush1.bf16.msra.mxu1 %v9201_v35  ;;  %4001 = vmatprep.subr.bf16.mxu0 %v9208_v28  ;;  %v9243_v35 = vcombine.low %v4212_v12, %v4216_v13  ;;  %v9252_v28 = vcombine.high %v4220_v33, %v4224_v54  ;;  %v4261_v12 = vld [vmem:[#allocation9 + $0x208] sm:$0xff] }
 0x327   :  { %4165 = vmatprep.subr.bf16.mxu1 %v9210_v36  ;;  %v9254_v36 = vcombine.high %v4221_v34, %v4225_v0  ;;  %v4265_v13 = vld [vmem:[#allocation9 + $0x228] sm:$0xff] }
 0x329   :  { %4002 = vmatpush1.bf16.msra.mxu0 %v9207_v45  ;;  %v9251_v45 = vcombine.low %v4220_v33, %v4224_v54  ;;  %v4273_v33 = vld [vmem:[#allocation9 + $0x268] sm:$0xff] }
 0x32a   :  { %4166 = vmatpush1.bf16.msra.mxu1 %v9209_v46  ;;  %4003 = vmatprep.subr.bf16.mxu0 %v9216_v48  ;;  %v9253_v46 = vcombine.low %v4221_v34, %v4225_v0  ;;  %v9260_v48 = vcombine.high %v4228_v42, %v4232_v37  ;;  %v9293_v34 = vcombine.low %v4261_v12, %v4265_v13  ;;  %v4281_v42 = vld [vmem:[#allocation9 + $0x2a8] sm:$0xff] }
 0x32b   :  { %4167 = vmatprep.subr.bf16.mxu1 %v9218_v49  ;;  %v9262_v49 = vcombine.high %v4229_v38, %v4233_v40 }
 0x32d   :  { %4004 = vmatpush1.bf16.msra.mxu0 %v9215_v59  ;;  %v9261_v59 = vcombine.low %v4229_v38, %v4233_v40 }
 0x32e   :  { %4168 = vmatpush1.bf16.msra.mxu1 %v9217_v16  ;;  %4005 = vmatprep.subr.bf16.mxu0 %v9224_v60  ;;  %v9268_v16 = vcombine.high %v4236_v50, %v4240_v52  ;;  %v9270_v60 = vcombine.high %v4237_v53, %v4241_v56  ;;  %v4289_v50 = vld [vmem:[#allocation9 + $0x2e8] sm:$0xff] }
 0x32f   :  { %4169 = vmatprep.subr.bf16.mxu1 %v9226_v61  ;;  %v4244_v61 = vld [vmem:[#allocation9 + $0x180] sm:$0xff] }
 0x330   :  { %v9275_v62 = vcombine.low %v4244_v61, %v4248_v1 }
 0x331   :  { %4006 = vmatpush1.bf16.msra.mxu0 %v9223_v47  ;;  %v9276_v47 = vcombine.high %v4244_v61, %v4248_v1  ;;  %v4297_v61 = vld [vmem:[#allocation9 + $0x328] sm:$0xff] }
 0x332   :  { %4170 = vmatpush1.bf16.msra.mxu1 %v9225_v4  ;;  %7310 = vmatprep.subr.bf16.mxu0 %v9228_v5  ;;  %v9278_v4 = vcombine.high %v4245_v2, %v4249_v3  ;;  %v4252_v5 = vld [vmem:[#allocation9 + $0x1c0] sm:$0xff] }
 0x333   :  { %7474 = vmatprep.subr.bf16.mxu1 %v9230_v7  ;;  %v4256_v7 = vld [vmem:[#allocation9 + $0x1e0] sm:$0xff] }
 0x334   :  { %4008 = vmatmul.mubr.bf16.vlgmr.msra.gmra.mrb[12].mxu0 %v10544_v6  ;;  %v9284_v63 = vcombine.high %v4252_v5, %v4256_v7 }
 0x335   :  { %4172 = vmatmul.mubr.bf16.vlgmr.msra.gmra.mrb[12].mxu1 %v10544_v6  ;;  %7311 = vmatpush1.bf16.msra.mxu0 %v9227_v9  ;;  %v9245_v6 = vcombine.low %v4213_v17, %v4217_v51  ;;  %v9277_v9 = vcombine.low %v4245_v2, %v4249_v3  ;;  %v9285_v17 = vcombine.low %v4253_v8, %v4257_v30 }
 0x336   :  { %7342 = vmatprep.mubr.bf16.mxu0 %v10575_v14  ;;  %7475 = vmatpush1.bf16.msra.mxu1 %v9229_v25  ;;  %v4260_v25 = vld [vmem:[#allocation9 + $0x200] sm:$0xff] }
 0x337   :  { %7506 = vmatprep.mubr.bf16.mxu1 %v10575_v14  ;;  %7312 = vmatprep.subr.bf16.mxu0 %v9236_v11  ;;  %v4264_v11 = vld [vmem:[#allocation9 + $0x220] sm:$0xff] }
 0x338   :  { %7476 = vmatprep.subr.bf16.mxu1 %v9238_v15  ;;  %v9283_v15 = vcombine.low %v4252_v5, %v4256_v7  ;;  %v9292_v51 = vcombine.high %v4260_v25, %v4264_v11  ;;  %v9291_v54 = vcombine.low %v4260_v25, %v4264_v11  ;;  %v4305_v5 = vld [vmem:[#allocation9 + $0x368] sm:$0xff] }
 0x339   :  { %7313 = vmatpush1.bf16.msra.mxu0 %v9235_v19  ;;  %v9294_v19 = vcombine.high %v4261_v12, %v4265_v13  ;;  %v4313_v25 = vld [vmem:[#allocation9 + $0x3a8] sm:$0xff]  ;;  %v927_v12 = vrot.slane %v10570_v43, %v10461_v29 }
 0x33a   :  { %7477 = vmatpush1.bf16.msra.mxu1 %v9237_v39  ;;  %7314 = vmatprep.subr.bf16.mxu0 %v9244_v22  ;;  %v4268_v39 = vld [vmem:[#allocation9 + $0x240] sm:$0xff] }
 0x33b   :  { %7478 = vmatprep.subr.bf16.mxu1 %v9246_v24  ;;  %v4272_v22 = vld [vmem:[#allocation9 + $0x260] sm:$0xff]  ;;  %v4269_v24 = vld [vmem:[#allocation9 + $0x248] sm:$0xff] }
 0x33c   :  { %v9300_v0 = vcombine.high %v4268_v39, %v4272_v22  ;;  %v9299_v37 = vcombine.low %v4268_v39, %v4272_v22  ;;  %v9301_v38 = vcombine.low %v4269_v24, %v4273_v33  ;;  %v939_v39 = vrot.slane %v10570_v43, %v10469_v32  ;;  %v4317_v22 = vld [vmem:[#allocation9 + $0x3c8] sm:$0xff] }
 0x33d   :  { %7315 = vmatpush1.bf16.msra.mxu0 %v9243_v35  ;;  %v9302_v35 = vcombine.high %v4269_v24, %v4273_v33  ;;  %v4321_v24 = vld [vmem:[#allocation9 + $0x3e8] sm:$0xff] }
 0x33e   :  { %7479 = vmatpush1.bf16.msra.mxu1 %v9245_v6  ;;  %7316 = vmatprep.subr.bf16.mxu0 %v9252_v28  ;;  %v4276_v6 = vld [vmem:[#allocation9 + $0x280] sm:$0xff] }
 0x33f   :  { %7480 = vmatprep.subr.bf16.mxu1 %v9254_v36  ;;  %v4280_v28 = vld [vmem:[#allocation9 + $0x2a0] sm:$0xff]  ;;  %v4277_v36 = vld [vmem:[#allocation9 + $0x288] sm:$0xff] }
 0x340   :  { %v9308_v40 = vcombine.high %v4276_v6, %v4280_v28  ;;  %v9307_v52 = vcombine.low %v4276_v6, %v4280_v28  ;;  %v9309_v53 = vcombine.low %v4277_v36, %v4281_v42  ;;  %v4324_v6 = vld [vmem:[#allocation9 + $0x400] sm:$0xff] }
 0x341   :  { %7317 = vmatpush1.bf16.msra.mxu0 %v9251_v45  ;;  %v9310_v45 = vcombine.high %v4277_v36, %v4281_v42  ;;  %v4328_v28 = vld [vmem:[#allocation9 + $0x420] sm:$0xff]  ;;  %v9895_v36 = vadd.f32 %v10568_v27, %v939_v39  ;;  %v4325_v42 = vld [vmem:[#allocation9 + $0x408] sm:$0xff] }
 0x342   :  { %7481 = vmatpush1.bf16.msra.mxu1 %v9253_v46  ;;  %7318 = vmatprep.subr.bf16.mxu0 %v9260_v48  ;;  %v4284_v46 = vld [vmem:[#allocation9 + $0x2c0] sm:$0xff] }
 0x343   :  { %7482 = vmatprep.subr.bf16.mxu1 %v9262_v49  ;;  %v4288_v48 = vld [vmem:[#allocation9 + $0x2e0] sm:$0xff]  ;;  %v4285_v49 = vld [vmem:[#allocation9 + $0x2c8] sm:$0xff] }
 0x344   :  { %v9316_v56 = vcombine.high %v4284_v46, %v4288_v48  ;;  %v9315_v1 = vcombine.low %v4284_v46, %v4288_v48  ;;  %v9317_v2 = vcombine.low %v4285_v49, %v4289_v50  ;;  %v9356_v46 = vcombine.high %v4324_v6, %v4328_v28  ;;  %v4364_v39 = vld [vmem:[#allocation9 + $0x540] sm:$0xff] }
 0x345   :  { %7319 = vmatpush1.bf16.msra.mxu0 %v9259_v58  ;;  %v9318_v58 = vcombine.high %v4285_v49, %v4289_v50  ;;  %v4183_v48 = vmax.f32 %v9895_v36, 0.0  ;;  %v4332_v49 = vld [vmem:[#allocation9 + $0x440] sm:$0xff]  ;;  %v4373_v36 = vld [vmem:[#allocation9 + $0x588] sm:$0xff] }
 0x346   :  { %7483 = vmatpush1.bf16.msra.mxu1 %v9261_v59  ;;  %7320 = vmatprep.subr.bf16.mxu0 %v9268_v16  ;;  %v4292_v59 = vld [vmem:[#allocation9 + $0x300] sm:$0xff] }
 0x347   :  { %7484 = vmatprep.subr.bf16.mxu1 %v9270_v60  ;;  %v4296_v16 = vld [vmem:[#allocation9 + $0x320] sm:$0xff]  ;;  %v4293_v60 = vld [vmem:[#allocation9 + $0x308] sm:$0xff] }
 0x348   :  { %v9324_v3 = vcombine.high %v4292_v59, %v4296_v16  ;;  %v9323_v7 = vcombine.low %v4292_v59, %v4296_v16  ;;  %v9325_v8 = vcombine.low %v4293_v60, %v4297_v61  ;;  %v4336_v50 = vld [vmem:[#allocation9 + $0x460] sm:$0xff] }
 0x349   :  { %7321 = vmatpush1.bf16.msra.mxu0 %v9267_v55  ;;  %v9326_v55 = vcombine.high %v4293_v60, %v4297_v61  ;;  %v9364_v59 = vcombine.high %v4332_v49, %v4336_v50  ;;  %v4340_v16 = vld [vmem:[#allocation9 + $0x480] sm:$0xff]  ;;  %v10589_v61 = vpack.c.bf16 %v4183_v48, %v4183_v48  ;;  %v4381_v48 = vld [vmem:[#allocation9 + $0x5c8] sm:$0xff] }
 0x34a   :  { %7485 = vmatpush1.bf16.msra.mxu1 %v9269_v23  ;;  %7322 = vmatprep.subr.bf16.mxu0 %v9276_v47  ;;  %v4300_v23 = vld [vmem:[#allocation9 + $0x340] sm:$0xff] }
 0x34b   :  { %7486 = vmatprep.subr.bf16.mxu1 %v9278_v4  ;;  %v4304_v47 = vld [vmem:[#allocation9 + $0x360] sm:$0xff]  ;;  %v4301_v4 = vld [vmem:[#allocation9 + $0x348] sm:$0xff] }
 0x34c   :  { %v9332_v30 = vcombine.high %v4300_v23, %v4304_v47  ;;  %v9331_v11 = vcombine.low %v4300_v23, %v4304_v47  ;;  %v9333_v13 = vcombine.low %v4301_v4, %v4305_v5  ;;  %v4344_v60 = vld [vmem:[#allocation9 + $0x4a0] sm:$0xff] }
 0x34d   :  { %7323 = vmatpush1.bf16.msra.mxu0 %v9275_v62  ;;  %v9334_v62 = vcombine.high %v4301_v4, %v4305_v5  ;;  %v9372_v47 = vcombine.high %v4340_v16, %v4344_v60  ;;  %v4348_v5 = vld [vmem:[#allocation9 + $0x4c0] sm:$0xff] }
 0x34e   :  { %7487 = vmatpush1.bf16.msra.mxu1 %v9277_v9  ;;  %7324 = vmatprep.subr.bf16.mxu0 %v9284_v63  ;;  %v4308_v9 = vld [vmem:[#allocation9 + $0x380] sm:$0xff] }
 0x34f   :  { %7488 = vmatprep.subr.bf16.mxu1 %v9286_v10  ;;  %v4312_v63 = vld [vmem:[#allocation9 + $0x3a0] sm:$0xff]  ;;  %v4309_v10 = vld [vmem:[#allocation9 + $0x388] sm:$0xff] }
 0x350   :  { %v9339_v33 = vcombine.low %v4308_v9, %v4312_v63 }
 0x351   :  { %7325 = vmatpush1.bf16.msra.mxu0 %v9283_v15  ;;  %v9340_v15 = vcombine.high %v4308_v9, %v4312_v63 }
 0x352   :  { %7489 = vmatpush1.bf16.msra.mxu1 %v9285_v17  ;;  %7326 = vmatprep.subr.bf16.mxu0 %v9292_v51  ;;  %v9342_v17 = vcombine.high %v4309_v10, %v4313_v25  ;;  %v4316_v51 = vld [vmem:[#allocation9 + $0x3c0] sm:$0xff] }
 0x353   :  { %7490 = vmatprep.subr.bf16.mxu1 %v9294_v19  ;;  %v4320_v19 = vld [vmem:[#allocation9 + $0x3e0] sm:$0xff] }
 0x355   :  { %7327 = vmatpush1.bf16.msra.mxu0 %v9291_v54  ;;  %v9892_v54 = vadd.f32 %v10562_v20, %v927_v12  ;;  %v4357_v12 = vld [vmem:[#allocation9 + $0x508] sm:$0xff] }
 0x356   :  { %7491 = vmatpush1.bf16.msra.mxu1 %v9293_v34  ;;  %7328 = vmatprep.subr.bf16.mxu0 %v9300_v0  ;;  %v9341_v34 = vcombine.low %v4309_v10, %v4313_v25  ;;  %v9348_v0 = vcombine.high %v4316_v51, %v4320_v19  ;;  %v4356_v25 = vld [vmem:[#allocation9 + $0x500] sm:$0xff] }
 0x357   :  { %7492 = vmatprep.subr.bf16.mxu1 %v9302_v35  ;;  %v9350_v35 = vcombine.high %v4317_v22, %v4321_v24 }
 0x359   :  { %7329 = vmatpush1.bf16.msra.mxu0 %v9299_v37  ;;  %v4329_v37 = vld [vmem:[#allocation9 + $0x428] sm:$0xff] }
 0x35a   :  { %7493 = vmatpush1.bf16.msra.mxu1 %v9301_v38  ;;  %7330 = vmatprep.subr.bf16.mxu0 %v9308_v40  ;;  %v9347_v38 = vcombine.low %v4316_v51, %v4320_v19  ;;  %v4180_v40 = vmax.f32 %v9892_v54, 0.0  ;;  %v9358_v20 = vcombine.high %v4325_v42, %v4329_v37  ;;  %v9357_v27 = vcombine.low %v4325_v42, %v4329_v37  ;;  %v4377_v42 = vld [vmem:[#allocation9 + $0x5a8] sm:$0xff] }
 0x35b   :  { %7494 = vmatprep.subr.bf16.mxu1 %v9310_v45  ;;  %v9349_v45 = vcombine.low %v4317_v22, %v4321_v24  ;;  %v4368_v22 = vld [vmem:[#allocation9 + $0x560] sm:$0xff]  ;;  %v4365_v24 = vld [vmem:[#allocation9 + $0x548] sm:$0xff] }
 0x35c   :  { %v9395_v37 = vcombine.low %v4364_v39, %v4368_v22 }
 0x35d   :  { %7331 = vmatpush1.bf16.msra.mxu0 %v9307_v52  ;;  %v9355_v52 = vcombine.low %v4324_v6, %v4328_v28  ;;  %v4372_v6 = vld [vmem:[#allocation9 + $0x580] sm:$0xff] }
 0x35e   :  { %7495 = vmatpush1.bf16.msra.mxu1 %v9309_v53  ;;  %7332 = vmatprep.subr.bf16.mxu0 %v9316_v56  ;;  %v4333_v53 = vld [vmem:[#allocation9 + $0x448] sm:$0xff]  ;;  %v4376_v28 = vld [vmem:[#allocation9 + $0x5a0] sm:$0xff] }
 0x35f   :  { %7496 = vmatprep.subr.bf16.mxu1 %v9318_v58  ;;  %v4337_v56 = vld [vmem:[#allocation9 + $0x468] sm:$0xff]  ;;  %v10587_v58 = vpack.c.bf16 %v4180_v40, %v4180_v40  ;;  %v9404_v40 = vcombine.high %v4372_v6, %v4376_v28 }
 0x360   :  { %v9365_v23 = vcombine.low %v4333_v53, %v4337_v56 }
 0x361   :  { %7333 = vmatpush1.bf16.msra.mxu0 %v9315_v1  ;;  %v9366_v1 = vcombine.high %v4333_v53, %v4337_v56 }
 0x362   :  { %7497 = vmatpush1.bf16.msra.mxu1 %v9317_v2  ;;  %7334 = vmatprep.subr.bf16.mxu0 %v9324_v3  ;;  %v4341_v2 = vld [vmem:[#allocation9 + $0x488] sm:$0xff] }
 0x363   :  { %7498 = vmatprep.subr.bf16.mxu1 %v9326_v55  ;;  %v4345_v3 = vld [vmem:[#allocation9 + $0x4a8] sm:$0xff]  ;;  %v9363_v55 = vcombine.low %v4332_v49, %v4336_v50  ;;  %v9403_v50 = vcombine.low %v4372_v6, %v4376_v28 }
 0x364   :  { %v9374_v4 = vcombine.high %v4341_v2, %v4345_v3  ;;  %v9373_v9 = vcombine.low %v4341_v2, %v4345_v3  ;;  %v4385_v49 = vld [vmem:[#allocation9 + $0x5e8] sm:$0xff] }
 0x365   :  { %7335 = vmatpush1.bf16.msra.mxu0 %v9323_v7  ;;  %v4352_v7 = vld [vmem:[#allocation9 + $0x4e0] sm:$0xff]  ;;  %v9414_v56 = vcombine.high %v4381_v48, %v4385_v49  ;;  %v9413_v2 = vcombine.low %v4381_v48, %v4385_v49  ;;  %v4425_v6 = vld [vmem:[#allocation9 + $0x728] sm:$0xff] }
 0x366   :  { %7499 = vmatpush1.bf16.msra.mxu1 %v9325_v8  ;;  %7336 = vmatprep.subr.bf16.mxu0 %v9332_v30  ;;  %v4349_v8 = vld [vmem:[#allocation9 + $0x4c8] sm:$0xff]  ;;  %v9380_v63 = vcombine.high %v4348_v5, %v4352_v7 }
 0x367   :  { %7500 = vmatprep.subr.bf16.mxu1 %v9334_v62  ;;  %v4353_v30 = vld [vmem:[#allocation9 + $0x4e8] sm:$0xff]  ;;  %v9371_v62 = vcombine.low %v4340_v16, %v4344_v60 }
 0x368   :  { %v9382_v10 = vcombine.high %v4349_v8, %v4353_v30  ;;  %v4389_v16 = vld [vmem:[#allocation9 + $0x608] sm:$0xff] }
 0x369   :  { %7337 = vmatpush1.bf16.msra.mxu0 %v9331_v11  ;;  %v4360_v11 = vld [vmem:[#allocation9 + $0x520] sm:$0xff]  ;;  %v4393_v60 = vld [vmem:[#allocation9 + $0x628] sm:$0xff] }
 0x36a   :  { %7501 = vmatpush1.bf16.msra.mxu1 %v9333_v13  ;;  %7338 = vmatprep.subr.bf16.mxu0 %v9340_v15  ;;  %v4361_v13 = vld [vmem:[#allocation9 + $0x528] sm:$0xff]  ;;  %v9379_v15 = vcombine.low %v4348_v5, %v4352_v7  ;;  %v9388_v51 = vcombine.high %v4356_v25, %v4360_v11  ;;  %v9387_v54 = vcombine.low %v4356_v25, %v4360_v11 }
 0x36b   :  { %7502 = vmatprep.subr.bf16.mxu1 %v9342_v17  ;;  %v9381_v17 = vcombine.low %v4349_v8, %v4353_v30  ;;  %v9390_v19 = vcombine.high %v4357_v12, %v4361_v13  ;;  %v4401_v5 = vld [vmem:[#allocation9 + $0x668] sm:$0xff]  ;;  %v9421_v8 = vcombine.low %v4389_v16, %v4393_v60 }
 0x36c   :  { %v4409_v25 = vld [vmem:[#allocation9 + $0x6a8] sm:$0xff] }
 0x36d   :  { %7339 = vmatpush1.bf16.msra.mxu0 %v9339_v33  ;;  %v4369_v33 = vld [vmem:[#allocation9 + $0x568] sm:$0xff] }
 0x36e   :  { %7503 = vmatpush1.bf16.msra.mxu1 %v9341_v34  ;;  %7340 = vmatprep.subr.bf16.mxu0 %v9348_v0  ;;  %v9389_v34 = vcombine.low %v4357_v12, %v4361_v13  ;;  %v9396_v0 = vcombine.high %v4364_v39, %v4368_v22  ;;  %v4417_v39 = vld [vmem:[#allocation9 + $0x6e8] sm:$0xff] }
 0x36f   :  { %7504 = vmatprep.subr.bf16.mxu1 %v9350_v35  ;;  %v9398_v35 = vcombine.high %v4365_v24, %v4369_v33 }
 0x371   :  { %7341 = vmatpush1.bf16.msra.mxu0 %v9347_v38  ;;  %v9397_v38 = vcombine.low %v4365_v24, %v4369_v33 }
 0x372   :  { %7505 = vmatpush1.bf16.msra.mxu1 %v9349_v45  ;;  %7351 = vmatprep.subr.bf16.mxu0 %v9356_v46  ;;  %v9406_v45 = vcombine.high %v4373_v36, %v4377_v42  ;;  %v4380_v46 = vld [vmem:[#allocation9 + $0x5c0] sm:$0xff] }
 0x373   :  { %7515 = vmatprep.subr.bf16.mxu1 %v9358_v20  ;;  %v4384_v20 = vld [vmem:[#allocation9 + $0x5e0] sm:$0xff] }
 0x374   :  { %7343 = vmatmul.mubr.bf16.vlgmr.msra.gmra.mrb[16].mxu0 %v10587_v58  ;;  %v9412_v53 = vcombine.high %v4380_v46, %v4384_v20 }
 0x375   :  { %7507 = vmatmul.mubr.bf16.vlgmr.msra.gmra.mrb[16].mxu1 %v10587_v58  ;;  %7352 = vmatpush1.bf16.msra.mxu0 %v9355_v52  ;;  %v9405_v52 = vcombine.low %v4373_v36, %v4377_v42 }
 0x376   :  { %7383 = vmatprep.mubr.bf16.mxu0 %v10589_v61  ;;  %7516 = vmatpush1.bf16.msra.mxu1 %v9357_v27  ;;  %v4388_v27 = vld [vmem:[#allocation9 + $0x600] sm:$0xff] }
 0x377   :  { %7547 = vmatprep.mubr.bf16.mxu1 %v10589_v61  ;;  %7353 = vmatprep.subr.bf16.mxu0 %v9364_v59  ;;  %v4392_v59 = vld [vmem:[#allocation9 + $0x620] sm:$0xff] }
 0x378   :  { %7517 = vmatprep.subr.bf16.mxu1 %v9366_v1  ;;  %v9411_v1 = vcombine.low %v4380_v46, %v4384_v20  ;;  %v9420_v3 = vcombine.high %v4388_v27, %v4392_v59  ;;  %v9419_v7 = vcombine.low %v4388_v27, %v4392_v59  ;;  %v4433_v46 = vld [vmem:[#allocation9 + $0x768] sm:$0xff] }
 0x379   :  { %7354 = vmatpush1.bf16.msra.mxu0 %v9363_v55  ;;  %v9422_v55 = vcombine.high %v4389_v16, %v4393_v60  ;;  %v4441_v27 = vld [vmem:[#allocation9 + $0x7a8] sm:$0xff]  ;;  %v935_v16 = vrot.slane %v10570_v43, %v10496_v44 }
 0x37a   :  { %7518 = vmatpush1.bf16.msra.mxu1 %v9365_v23  ;;  %7355 = vmatprep.subr.bf16.mxu0 %v9372_v47  ;;  %v4396_v23 = vld [vmem:[#allocation9 + $0x640] sm:$0xff] }
 0x37b   :  { %7519 = vmatprep.subr.bf16.mxu1 %v9374_v4  ;;  %v4400_v47 = vld [vmem:[#allocation9 + $0x660] sm:$0xff]  ;;  %v4397_v4 = vld [vmem:[#allocation9 + $0x648] sm:$0xff] }
 0x37c   :  { %v9428_v30 = vcombine.high %v4396_v23, %v4400_v47  ;;  %v9427_v11 = vcombine.low %v4396_v23, %v4400_v47  ;;  %v9429_v12 = vcombine.low %v4397_v4, %v4401_v5  ;;  %v4445_v23 = vld [vmem:[#allocation9 + $0x7c8] sm:$0xff] }
 0x37d   :  { %7356 = vmatpush1.bf16.msra.mxu0 %v9371_v62  ;;  %v9430_v62 = vcombine.high %v4397_v4, %v4401_v5  ;;  %v4449_v47 = vld [vmem:[#allocation9 + $0x7e8] sm:$0xff]  ;;  %v9894_v5 = vadd.f32 %v10564_v21, %v935_v16  ;;  %v4460_v21 = vld [vmem:[#allocation9 + $0x840] sm:$0xff] }
 0x37e   :  { %7520 = vmatpush1.bf16.msra.mxu1 %v9373_v9  ;;  %7357 = vmatprep.subr.bf16.mxu0 %v9380_v63  ;;  %v4404_v9 = vld [vmem:[#allocation9 + $0x680] sm:$0xff]  ;;  %v9478_v43 = vcombine.high %v4445_v23, %v4449_v47 }
 0x37f   :  { %7521 = vmatprep.subr.bf16.mxu1 %v9382_v10  ;;  %v4408_v63 = vld [vmem:[#allocation9 + $0x6a0] sm:$0xff]  ;;  %v4405_v10 = vld [vmem:[#allocation9 + $0x688] sm:$0xff] }
 0x380   :  { %v9436_v13 = vcombine.high %v4404_v9, %v4408_v63  ;;  %v9435_v22 = vcombine.low %v4404_v9, %v4408_v63  ;;  %v9437_v24 = vcombine.low %v4405_v10, %v4409_v25  ;;  %v4453_v9 = vld [vmem:[#allocation9 + $0x808] sm:$0xff] }
 0x381   :  { %7358 = vmatpush1.bf16.msra.mxu0 %v9379_v15  ;;  %v9438_v15 = vcombine.high %v4405_v10, %v4409_v25  ;;  %v4457_v63 = vld [vmem:[#allocation9 + $0x828] sm:$0xff]  ;;  %v4182_v25 = vmax.f32 %v9894_v5, 0.0 }
 0x382   :  { %7522 = vmatpush1.bf16.msra.mxu1 %v9381_v17  ;;  %7359 = vmatprep.subr.bf16.mxu0 %v9388_v51  ;;  %v4412_v17 = vld [vmem:[#allocation9 + $0x6c0] sm:$0xff] }
 0x383   :  { %7523 = vmatprep.subr.bf16.mxu1 %v9390_v19  ;;  %v4416_v51 = vld [vmem:[#allocation9 + $0x6e0] sm:$0xff]  ;;  %v4413_v19 = vld [vmem:[#allocation9 + $0x6c8] sm:$0xff] }
 0x384   :  { %v9444_v33 = vcombine.high %v4412_v17, %v4416_v51  ;;  %v9443_v28 = vcombine.low %v4412_v17, %v4416_v51  ;;  %v9445_v36 = vcombine.low %v4413_v19, %v4417_v39  ;;  %v4461_v17 = vld [vmem:[#allocation9 + $0x848] sm:$0xff] }
 0x385   :  { %7360 = vmatpush1.bf16.msra.mxu0 %v9387_v54  ;;  %v9446_v54 = vcombine.high %v4413_v19, %v4417_v39  ;;  %v4465_v51 = vld [vmem:[#allocation9 + $0x868] sm:$0xff]  ;;  %v10598_v39 = vpack.c.bf16 %v4182_v25, %v4182_v25  ;;  %v4508_v25 = vld [vmem:[#allocation9 + $0x9c0] sm:$0xff] }
 0x386   :  { %7524 = vmatpush1.bf16.msra.mxu1 %v9389_v34  ;;  %7361 = vmatprep.subr.bf16.mxu0 %v9396_v0  ;;  %v4420_v34 = vld [vmem:[#allocation9 + $0x700] sm:$0xff] }
 0x387   :  { %7525 = vmatprep.subr.bf16.mxu1 %v9398_v35  ;;  %v4424_v0 = vld [vmem:[#allocation9 + $0x720] sm:$0xff]  ;;  %v4421_v35 = vld [vmem:[#allocation9 + $0x708] sm:$0xff] }
 0x388   :  { %v9452_v42 = vcombine.high %v4420_v34, %v4424_v0  ;;  %v9451_v20 = vcombine.low %v4420_v34, %v4424_v0  ;;  %v9453_v48 = vcombine.low %v4421_v35, %v4425_v6  ;;  %v4472_v34 = vld [vmem:[#allocation9 + $0x8a0] sm:$0xff]  ;;  %v4469_v0 = vld [vmem:[#allocation9 + $0x888] sm:$0xff] }
 0x389   :  { %7362 = vmatpush1.bf16.msra.mxu0 %v9395_v37  ;;  %v9454_v37 = vcombine.high %v4421_v35, %v4425_v6  ;;  %v4473_v35 = vld [vmem:[#allocation9 + $0x8a8] sm:$0xff] }
 0x38a   :  { %7526 = vmatpush1.bf16.msra.mxu1 %v9397_v38  ;;  %7363 = vmatprep.subr.bf16.mxu0 %v9404_v40  ;;  %v4428_v38 = vld [vmem:[#allocation9 + $0x740] sm:$0xff] }
 0x38b   :  { %7527 = vmatprep.subr.bf16.mxu1 %v9406_v45  ;;  %v4432_v40 = vld [vmem:[#allocation9 + $0x760] sm:$0xff]  ;;  %v4429_v45 = vld [vmem:[#allocation9 + $0x748] sm:$0xff] }
 0x38c   :  { %v9460_v49 = vcombine.high %v4428_v38, %v4432_v40  ;;  %v9459_v59 = vcombine.low %v4428_v38, %v4432_v40  ;;  %v9461_v60 = vcombine.low %v4429_v45, %v4433_v46  ;;  %v4480_v38 = vld [vmem:[#allocation9 + $0x8e0] sm:$0xff]  ;;  %v4477_v40 = vld [vmem:[#allocation9 + $0x8c8] sm:$0xff] }
 0x38d   :  { %7364 = vmatpush1.bf16.msra.mxu0 %v9403_v50  ;;  %v9462_v50 = vcombine.high %v4429_v45, %v4433_v46  ;;  %v4481_v45 = vld [vmem:[#allocation9 + $0x8e8] sm:$0xff] }
 0x38e   :  { %7528 = vmatpush1.bf16.msra.mxu1 %v9405_v52  ;;  %7365 = vmatprep.subr.bf16.mxu0 %v9412_v53  ;;  %v4436_v52 = vld [vmem:[#allocation9 + $0x780] sm:$0xff] }
 0x38f   :  { %7529 = vmatprep.subr.bf16.mxu1 %v9414_v56  ;;  %v4440_v53 = vld [vmem:[#allocation9 + $0x7a0] sm:$0xff]  ;;  %v4437_v56 = vld [vmem:[#allocation9 + $0x788] sm:$0xff] }
 0x390   :  { %v9467_v4 = vcombine.low %v4436_v52, %v4440_v53 }
 0x391   :  { %7366 = vmatpush1.bf16.msra.mxu0 %v9411_v1  ;;  %v9468_v1 = vcombine.high %v4436_v52, %v4440_v53  ;;  %v4488_v52 = vld [vmem:[#allocation9 + $0x920] sm:$0xff]  ;;  %v4485_v53 = vld [vmem:[#allocation9 + $0x908] sm:$0xff] }
 0x392   :  { %7530 = vmatpush1.bf16.msra.mxu1 %v9413_v2  ;;  %7367 = vmatprep.subr.bf16.mxu0 %v9420_v3  ;;  %v9470_v2 = vcombine.high %v4437_v56, %v4441_v27  ;;  %v4444_v3 = vld [vmem:[#allocation9 + $0x7c0] sm:$0xff] }
 0x393   :  { %7531 = vmatprep.subr.bf16.mxu1 %v9422_v55  ;;  %v4448_v55 = vld [vmem:[#allocation9 + $0x7e0] sm:$0xff] }
 0x394   :  { %v9475_v10 = vcombine.low %v4444_v3, %v4448_v55 }
 0x395   :  { %7368 = vmatpush1.bf16.msra.mxu0 %v9419_v7  ;;  %v9469_v7 = vcombine.low %v4437_v56, %v4441_v27  ;;  %v4489_v56 = vld [vmem:[#allocation9 + $0x928] sm:$0xff] }
 0x396   :  { %7532 = vmatpush1.bf16.msra.mxu1 %v9421_v8  ;;  %7369 = vmatprep.subr.bf16.mxu0 %v9428_v30  ;;  %v9476_v8 = vcombine.high %v4444_v3, %v4448_v55  ;;  %v4452_v30 = vld [vmem:[#allocation9 + $0x800] sm:$0xff]  ;;  %v4493_v3 = vld [vmem:[#allocation9 + $0x948] sm:$0xff] }
 0x397   :  { %7533 = vmatprep.subr.bf16.mxu1 %v9430_v62  ;;  %v4456_v62 = vld [vmem:[#allocation9 + $0x820] sm:$0xff]  ;;  %v4497_v55 = vld [vmem:[#allocation9 + $0x968] sm:$0xff] }
 0x398   :  { %v9483_v19 = vcombine.low %v4452_v30, %v4456_v62  ;;  %v9526_v5 = vcombine.high %v4493_v3, %v4497_v55 }
 0x399   :  { %7370 = vmatpush1.bf16.msra.mxu0 %v9427_v11  ;;  %v9477_v11 = vcombine.low %v4445_v23, %v4449_v47  ;;  %v9517_v47 = vcombine.low %v4485_v53, %v4489_v56 }
 0x39a   :  { %7534 = vmatpush1.bf16.msra.mxu1 %v9429_v12  ;;  %7371 = vmatprep.subr.bf16.mxu0 %v9436_v13  ;;  %v9484_v12 = vcombine.high %v4452_v30, %v4456_v62  ;;  %v9486_v13 = vcombine.high %v4453_v9, %v4457_v63  ;;  %v4505_v30 = vld [vmem:[#allocation9 + $0x9a8] sm:$0xff] }
 0x39b   :  { %7535 = vmatprep.subr.bf16.mxu1 %v9438_v15  ;;  %v4464_v15 = vld [vmem:[#allocation9 + $0x860] sm:$0xff] }
 0x39c   :  { %v9491_v6 = vcombine.low %v4460_v21, %v4464_v15 }
 0x39d   :  { %7372 = vmatpush1.bf16.msra.mxu0 %v9435_v22  ;;  %v9485_v22 = vcombine.low %v4453_v9, %v4457_v63  ;;  %v9525_v9 = vcombine.low %v4493_v3, %v4497_v55 }
 0x39e   :  { %7536 = vmatpush1.bf16.msra.mxu1 %v9437_v24  ;;  %7373 = vmatprep.subr.bf16.mxu0 %v9444_v33  ;;  %v9492_v24 = vcombine.high %v4460_v21, %v4464_v15  ;;  %v9494_v33 = vcombine.high %v4461_v17, %v4465_v51 }
 0x39f   :  { %7537 = vmatprep.subr.bf16.mxu1 %v9446_v54  ;;  %v4468_v54 = vld [vmem:[#allocation9 + $0x880] sm:$0xff] }
 0x3a0   :  { %v9499_v46 = vcombine.low %v4468_v54, %v4472_v34 }
 0x3a1   :  { %7374 = vmatpush1.bf16.msra.mxu0 %v9443_v28  ;;  %v9493_v28 = vcombine.low %v4461_v17, %v4465_v51 }
 0x3a2   :  { %7538 = vmatpush1.bf16.msra.mxu1 %v9445_v36  ;;  %7375 = vmatprep.subr.bf16.mxu0 %v9452_v42  ;;  %v9500_v36 = vcombine.high %v4468_v54, %v4472_v34  ;;  %v9502_v42 = vcombine.high %v4469_v0, %v4473_v35 }
 0x3a3   :  { %7539 = vmatprep.subr.bf16.mxu1 %v9454_v37  ;;  %v4476_v37 = vld [vmem:[#allocation9 + $0x8c0] sm:$0xff] }
 0x3a4   :  { %v9507_v27 = vcombine.low %v4476_v37, %v4480_v38 }
 0x3a5   :  { %7376 = vmatpush1.bf16.msra.mxu0 %v9451_v20  ;;  %v9501_v20 = vcombine.low %v4469_v0, %v4473_v35 }
 0x3a6   :  { %7540 = vmatpush1.bf16.msra.mxu1 %v9453_v48  ;;  %7377 = vmatprep.subr.bf16.mxu0 %v9460_v49  ;;  %v9508_v48 = vcombine.high %v4476_v37, %v4480_v38  ;;  %v9510_v49 = vcombine.high %v4477_v40, %v4481_v45 }
 0x3a7   :  { %7541 = vmatprep.subr.bf16.mxu1 %v9462_v50  ;;  %v4484_v50 = vld [vmem:[#allocation9 + $0x900] sm:$0xff] }
 0x3a8   :  { %v9516_v16 = vcombine.high %v4484_v50, %v4488_v52  ;;  %v9515_v23 = vcombine.low %v4484_v50, %v4488_v52 }
 0x3a9   :  { %7378 = vmatpush1.bf16.msra.mxu0 %v9459_v59  ;;  %v9509_v59 = vcombine.low %v4477_v40, %v4481_v45 }
 0x3aa   :  { %7542 = vmatpush1.bf16.msra.mxu1 %v9461_v60  ;;  %7379 = vmatprep.subr.bf16.mxu0 %v9468_v1  ;;  %v9518_v60 = vcombine.high %v4485_v53, %v4489_v56  ;;  %v4492_v1 = vld [vmem:[#allocation9 + $0x940] sm:$0xff] }
 0x3ab   :  { %7543 = vmatprep.subr.bf16.mxu1 %v9470_v2  ;;  %v4496_v2 = vld [vmem:[#allocation9 + $0x960] sm:$0xff] }
 0x3ac   :  { %v9523_v62 = vcombine.low %v4492_v1, %v4496_v2 }
 0x3ad   :  { %7380 = vmatpush1.bf16.msra.mxu0 %v9467_v4  ;;  %v9524_v4 = vcombine.high %v4492_v1, %v4496_v2 }
 0x3ae   :  { %7544 = vmatpush1.bf16.msra.mxu1 %v9469_v7  ;;  %7381 = vmatprep.subr.bf16.mxu0 %v9476_v8  ;;  %v4500_v7 = vld [vmem:[#allocation9 + $0x980] sm:$0xff] }
 0x3af   :  { %7545 = vmatprep.subr.bf16.mxu1 %v9478_v43  ;;  %v4504_v8 = vld [vmem:[#allocation9 + $0x9a0] sm:$0xff]  ;;  %v4501_v43 = vld [vmem:[#allocation9 + $0x988] sm:$0xff] }
 0x3b0   :  { %v9532_v63 = vcombine.high %v4500_v7, %v4504_v8  ;;  %v9531_v21 = vcombine.low %v4500_v7, %v4504_v8  ;;  %v9533_v15 = vcombine.low %v4501_v43, %v4505_v30 }
 0x3b1   :  { %7382 = vmatpush1.bf16.msra.mxu0 %v9475_v10  ;;  %v9534_v10 = vcombine.high %v4501_v43, %v4505_v30 }
 0x3b2   :  { %7546 = vmatpush1.bf16.msra.mxu1 %v9477_v11  ;;  %7392 = vmatprep.subr.bf16.mxu0 %v9484_v12  ;;  %v4512_v11 = vld [vmem:[#allocation9 + $0x9e0] sm:$0xff]  ;;  %v4509_v12 = vld [vmem:[#allocation9 + $0x9c8] sm:$0xff] }
 0x3b3   :  { %7556 = vmatprep.subr.bf16.mxu1 %v9486_v13  ;;  %v4513_v13 = vld [vmem:[#allocation9 + $0x9e8] sm:$0xff]  ;;  %v9540_v17 = vcombine.high %v4508_v25, %v4512_v11  ;;  %v9539_v54 = vcombine.low %v4508_v25, %v4512_v11 }
 0x3b4   :  { %7384 = vmatmul.mubr.bf16.vlgmr.msra.gmra.mrb[16].mxu0 %v10598_v39  ;;  %v9542_v51 = vcombine.high %v4509_v12, %v4513_v13  ;;  %v9541_v34 = vcombine.low %v4509_v12, %v4513_v13 }
 0x3b5   :  { %7548 = vmatmul.mubr.bf16.vlgmr.msra.gmra.mrb[16].mxu1 %v10598_v39  ;;  %7393 = vmatpush1.bf16.msra.mxu0 %v9483_v19  ;;  %v4516_v19 = vld [vmem:[#allocation9 + $0xa00] sm:$0xff] }
 0x3b6   :  { %7557 = vmatpush1.bf16.msra.mxu1 %v9485_v22  ;;  %7394 = vmatprep.subr.bf16.mxu0 %v9492_v24  ;;  %v4520_v22 = vld [vmem:[#allocation9 + $0xa20] sm:$0xff]  ;;  %v4517_v24 = vld [vmem:[#allocation9 + $0xa08] sm:$0xff] }
 0x3b7   :  { %7558 = vmatprep.subr.bf16.mxu1 %v9494_v33  ;;  %v4521_v33 = vld [vmem:[#allocation9 + $0xa28] sm:$0xff]  ;;  %v9548_v0 = vcombine.high %v4516_v19, %v4520_v22  ;;  %v9547_v37 = vcombine.low %v4516_v19, %v4520_v22 }
 0x3b8   :  { %v9550_v35 = vcombine.high %v4517_v24, %v4521_v33  ;;  %v9549_v38 = vcombine.low %v4517_v24, %v4521_v33 }
 0x3b9   :  { %7395 = vmatpush1.bf16.msra.mxu0 %v9491_v6  ;;  %v4524_v6 = vld [vmem:[#allocation9 + $0xa40] sm:$0xff] }
 0x3ba   :  { %7559 = vmatpush1.bf16.msra.mxu1 %v9493_v28  ;;  %7396 = vmatprep.subr.bf16.mxu0 %v9500_v36  ;;  %v4528_v28 = vld [vmem:[#allocation9 + $0xa60] sm:$0xff]  ;;  %v4525_v36 = vld [vmem:[#allocation9 + $0xa48] sm:$0xff] }
 0x3bb   :  { %7560 = vmatprep.subr.bf16.mxu1 %v9502_v42  ;;  %v4529_v42 = vld [vmem:[#allocation9 + $0xa68] sm:$0xff]  ;;  %v9556_v40 = vcombine.high %v4524_v6, %v4528_v28  ;;  %v9555_v50 = vcombine.low %v4524_v6, %v4528_v28 }
 0x3bc   :  { %v9558_v45 = vcombine.high %v4525_v36, %v4529_v42  ;;  %v9557_v52 = vcombine.low %v4525_v36, %v4529_v42 }
 0x3bd   :  { %7397 = vmatpush1.bf16.msra.mxu0 %v9499_v46  ;;  %v4532_v46 = vld [vmem:[#allocation9 + $0xa80] sm:$0xff] }
 0x3be   :  { %7561 = vmatpush1.bf16.msra.mxu1 %v9501_v20  ;;  %7398 = vmatprep.subr.bf16.mxu0 %v9508_v48  ;;  %v4536_v20 = vld [vmem:[#allocation9 + $0xaa0] sm:$0xff]  ;;  %v4533_v48 = vld [vmem:[#allocation9 + $0xa88] sm:$0xff] }
 0x3bf   :  { %7562 = vmatprep.subr.bf16.mxu1 %v9510_v49  ;;  %v4537_v49 = vld [vmem:[#allocation9 + $0xaa8] sm:$0xff]  ;;  %v9564_v53 = vcombine.high %v4532_v46, %v4536_v20  ;;  %v9563_v1 = vcombine.low %v4532_v46, %v4536_v20 }
 0x3c0   :  { %v9566_v56 = vcombine.high %v4533_v48, %v4537_v49  ;;  %v9565_v2 = vcombine.low %v4533_v48, %v4537_v49 }
 0x3c1   :  { %7399 = vmatpush1.bf16.msra.mxu0 %v9507_v27  ;;  %v4540_v27 = vld [vmem:[#allocation9 + $0xac0] sm:$0xff] }
 0x3c2   :  { %7563 = vmatpush1.bf16.msra.mxu1 %v9509_v59  ;;  %7400 = vmatprep.subr.bf16.mxu0 %v9516_v16  ;;  %v4544_v59 = vld [vmem:[#allocation9 + $0xae0] sm:$0xff]  ;;  %v4541_v16 = vld [vmem:[#allocation9 + $0xac8] sm:$0xff] }
 0x3c3   :  { %7564 = vmatprep.subr.bf16.mxu1 %v9518_v60  ;;  %v4545_v60 = vld [vmem:[#allocation9 + $0xae8] sm:$0xff]  ;;  %v9572_v3 = vcombine.high %v4540_v27, %v4544_v59  ;;  %v9571_v7 = vcombine.low %v4540_v27, %v4544_v59 }
 0x3c4   :  { %v9574_v55 = vcombine.high %v4541_v16, %v4545_v60  ;;  %v9573_v8 = vcombine.low %v4541_v16, %v4545_v60 }
 0x3c5   :  { %7401 = vmatpush1.bf16.msra.mxu0 %v9515_v23  ;;  %v4548_v23 = vld [vmem:[#allocation9 + $0xb00] sm:$0xff] }
 0x3c6   :  { %7565 = vmatpush1.bf16.msra.mxu1 %v9517_v47  ;;  %7402 = vmatprep.subr.bf16.mxu0 %v9524_v4  ;;  %v4552_v47 = vld [vmem:[#allocation9 + $0xb20] sm:$0xff]  ;;  %v4549_v4 = vld [vmem:[#allocation9 + $0xb08] sm:$0xff] }
 0x3c7   :  { %7566 = vmatprep.subr.bf16.mxu1 %v9526_v5  ;;  %v4553_v5 = vld [vmem:[#allocation9 + $0xb28] sm:$0xff]  ;;  %v9580_v43 = vcombine.high %v4548_v23, %v4552_v47  ;;  %v9579_v25 = vcombine.low %v4548_v23, %v4552_v47 }
 0x3c8   :  { %v9582_v30 = vcombine.high %v4549_v4, %v4553_v5  ;;  %v9581_v11 = vcombine.low %v4549_v4, %v4553_v5 }
 0x3c9   :  { %7403 = vmatpush1.bf16.msra.mxu0 %v9523_v62  ;;  %v4556_v62 = vld [vmem:[#allocation9 + $0xb40] sm:$0xff] }
 0x3ca   :  { %7567 = vmatpush1.bf16.msra.mxu1 %v9525_v9  ;;  %7404 = vmatprep.subr.bf16.mxu0 %v9532_v63  ;;  %v4560_v9 = vld [vmem:[#allocation9 + $0xb60] sm:$0xff]  ;;  %v4557_v63 = vld [vmem:[#allocation9 + $0xb48] sm:$0xff] }
 0x3cb   :  { %7568 = vmatprep.subr.bf16.mxu1 %v9534_v10  ;;  %v4561_v10 = vld [vmem:[#allocation9 + $0xb68] sm:$0xff]  ;;  %v9588_v12 = vcombine.high %v4556_v62, %v4560_v9  ;;  %v9587_v19 = vcombine.low %v4556_v62, %v4560_v9 }
 0x3cc   :  { %v9590_v13 = vcombine.high %v4557_v63, %v4561_v10  ;;  %v9589_v22 = vcombine.low %v4557_v63, %v4561_v10  ;;  %v4589_v62 = vld [vmem:[#allocation9 + $0xc48] sm:$0xff] }
 0x3cd   :  { %7405 = vmatpush1.bf16.msra.mxu0 %v9531_v21  ;;  %v4564_v21 = vld [vmem:[#allocation9 + $0xb80] sm:$0xff]  ;;  %v4593_v9 = vld [vmem:[#allocation9 + $0xc68] sm:$0xff] }
 0x3ce   :  { %7569 = vmatpush1.bf16.msra.mxu1 %v9533_v15  ;;  %7406 = vmatprep.subr.bf16.mxu0 %v9540_v17  ;;  %v4568_v15 = vld [vmem:[#allocation9 + $0xba0] sm:$0xff]  ;;  %v4565_v17 = vld [vmem:[#allocation9 + $0xb88] sm:$0xff] }
 0x3cf   :  { %7570 = vmatprep.subr.bf16.mxu1 %v9542_v51  ;;  %v4569_v51 = vld [vmem:[#allocation9 + $0xba8] sm:$0xff]  ;;  %v9596_v24 = vcombine.high %v4564_v21, %v4568_v15  ;;  %v9595_v6 = vcombine.low %v4564_v21, %v4568_v15  ;;  %v9622_v21 = vcombine.high %v4589_v62, %v4593_v9  ;;  %v4600_v15 = vld [vmem:[#allocation9 + $0xca0] sm:$0xff] }
 0x3d0   :  { %v9598_v33 = vcombine.high %v4565_v17, %v4569_v51  ;;  %v9597_v28 = vcombine.low %v4565_v17, %v4569_v51  ;;  %v4597_v17 = vld [vmem:[#allocation9 + $0xc88] sm:$0xff] }
 0x3d1   :  { %7407 = vmatpush1.bf16.msra.mxu0 %v9539_v54  ;;  %v4572_v54 = vld [vmem:[#allocation9 + $0xbc0] sm:$0xff]  ;;  %v4601_v51 = vld [vmem:[#allocation9 + $0xca8] sm:$0xff] }
 0x3d2   :  { %7571 = vmatpush1.bf16.msra.mxu1 %v9541_v34  ;;  %7408 = vmatprep.subr.bf16.mxu0 %v9548_v0  ;;  %v4576_v34 = vld [vmem:[#allocation9 + $0xbe0] sm:$0xff]  ;;  %v4573_v0 = vld [vmem:[#allocation9 + $0xbc8] sm:$0xff] }
 0x3d3   :  { %7572 = vmatprep.subr.bf16.mxu1 %v9550_v35  ;;  %v4577_v35 = vld [vmem:[#allocation9 + $0xbe8] sm:$0xff]  ;;  %v9604_v36 = vcombine.high %v4572_v54, %v4576_v34  ;;  %v9603_v46 = vcombine.low %v4572_v54, %v4576_v34  ;;  %v9630_v54 = vcombine.high %v4597_v17, %v4601_v51  ;;  %v4604_v34 = vld [vmem:[#allocation9 + $0xcc0] sm:$0xff] }
 0x3d4   :  { %v9606_v42 = vcombine.high %v4573_v0, %v4577_v35  ;;  %v9605_v20 = vcombine.low %v4573_v0, %v4577_v35  ;;  %v4608_v0 = vld [vmem:[#allocation9 + $0xce0] sm:$0xff]  ;;  %v4605_v35 = vld [vmem:[#allocation9 + $0xcc8] sm:$0xff] }
 0x3d5   :  { %7409 = vmatpush1.bf16.msra.mxu0 %v9547_v37  ;;  %v4580_v37 = vld [vmem:[#allocation9 + $0xc00] sm:$0xff] }
 0x3d6   :  { %7573 = vmatpush1.bf16.msra.mxu1 %v9549_v38  ;;  %7410 = vmatprep.subr.bf16.mxu0 %v9556_v40  ;;  %v4584_v38 = vld [vmem:[#allocation9 + $0xc20] sm:$0xff]  ;;  %v4581_v40 = vld [vmem:[#allocation9 + $0xc08] sm:$0xff] }
 0x3d7   :  { %7574 = vmatprep.subr.bf16.mxu1 %v9558_v45  ;;  %v4585_v45 = vld [vmem:[#allocation9 + $0xc28] sm:$0xff]  ;;  %v9612_v48 = vcombine.high %v4580_v37, %v4584_v38  ;;  %v9611_v10 = vcombine.low %v4580_v37, %v4584_v38  ;;  %v4612_v38 = vld [vmem:[#allocation9 + $0xd00] sm:$0xff] }
 0x3d8   :  { %v9614_v49 = vcombine.high %v4581_v40, %v4585_v45 }
 0x3d9   :  { %7411 = vmatpush1.bf16.msra.mxu0 %v9555_v50  ;;  %v10602_v50 = vld [vmem:[#allocation7] sm:$0xff] }
 0x3da   :  { %7575 = vmatpush1.bf16.msra.mxu1 %v9557_v52  ;;  %7412 = vmatprep.subr.bf16.mxu0 %v9564_v53  ;;  %v943_v52 = vrot.slane %v10602_v50, %v10520_v26  ;;  %v947_v53 = vrot.slane %v10602_v50, %v10503_v57 }
 0x3db   :  { %7576 = vmatprep.subr.bf16.mxu1 %v9566_v56  ;;  %v955_v56 = vrot.slane %v10602_v50, %v10523_v41 }
 0x3dd   :  { %7413 = vmatpush1.bf16.msra.mxu0 %v9563_v1 }
 0x3de   :  { %7577 = vmatpush1.bf16.msra.mxu1 %v9565_v2  ;;  %7414 = vmatprep.subr.bf16.mxu0 %v9572_v3 }
 0x3df   :  { %7578 = vmatprep.subr.bf16.mxu1 %v9574_v55 }
 0x3e1   :  { %7415 = vmatpush1.bf16.msra.mxu0 %v9571_v7 }
 0x3e2   :  { %7579 = vmatpush1.bf16.msra.mxu1 %v9573_v8  ;;  %7416 = vmatprep.subr.bf16.mxu0 %v9580_v43  ;;  %v4588_v8 = vld [vmem:[#allocation9 + $0xc40] sm:$0xff] }
 0x3e3   :  { %7580 = vmatprep.subr.bf16.mxu1 %v9582_v30  ;;  %v4592_v30 = vld [vmem:[#allocation9 + $0xc60] sm:$0xff] }
 0x3e5   :  { %7417 = vmatpush1.bf16.msra.mxu0 %v9579_v25  ;;  %v9613_v25 = vcombine.low %v4581_v40, %v4585_v45  ;;  %v4616_v40 = vld [vmem:[#allocation9 + $0xd20] sm:$0xff]  ;;  %v4613_v45 = vld [vmem:[#allocation9 + $0xd08] sm:$0xff] }
 0x3e6   :  { %7581 = vmatpush1.bf16.msra.mxu1 %v9581_v11  ;;  %7418 = vmatprep.subr.bf16.mxu0 %v9588_v12  ;;  %v4596_v12 = vld [vmem:[#allocation9 + $0xc80] sm:$0xff] }
 0x3e7   :  { %7582 = vmatprep.subr.bf16.mxu1 %v9590_v13  ;;  %v9620_v13 = vcombine.high %v4588_v8, %v4592_v30 }
 0x3e9   :  { %7419 = vmatpush1.bf16.msra.mxu0 %v9587_v19 }
 0x3ea   :  { %7583 = vmatpush1.bf16.msra.mxu1 %v9589_v22  ;;  %7420 = vmatprep.subr.bf16.mxu0 %v9596_v24  ;;  %v9619_v22 = vcombine.low %v4588_v8, %v4592_v30  ;;  %v9621_v24 = vcombine.low %v4589_v62, %v4593_v9  ;;  %v4636_v30 = vld [vmem:[#allocation9 + $0xdc0] sm:$0xff]  ;;  %v4637_v9 = vld [vmem:[#allocation9 + $0xdc8] sm:$0xff] }
 0x3eb   :  { %7584 = vmatprep.subr.bf16.mxu1 %v9598_v33  ;;  %v9628_v33 = vcombine.high %v4596_v12, %v4600_v15  ;;  %v4640_v62 = vld [vmem:[#allocation9 + $0xde0] sm:$0xff] }
 0x3ed   :  { %7421 = vmatpush1.bf16.msra.mxu0 %v9595_v6  ;;  %v4609_v6 = vld [vmem:[#allocation9 + $0xce8] sm:$0xff] }
 0x3ee   :  { %7585 = vmatpush1.bf16.msra.mxu1 %v9597_v28  ;;  %7422 = vmatprep.subr.bf16.mxu0 %v9604_v36  ;;  %v9627_v28 = vcombine.low %v4596_v12, %v4600_v15  ;;  %v9629_v36 = vcombine.low %v4597_v17, %v4601_v51  ;;  %v9638_v37 = vcombine.high %v4605_v35, %v4609_v6  ;;  %v4644_v15 = vld [vmem:[#allocation9 + $0xe00] sm:$0xff]  ;;  %v4645_v51 = vld [vmem:[#allocation9 + $0xe08] sm:$0xff] }
 0x3ef   :  { %7586 = vmatprep.subr.bf16.mxu1 %v9606_v42  ;;  %v9636_v42 = vcombine.high %v4604_v34, %v4608_v0  ;;  %v4648_v17 = vld [vmem:[#allocation9 + $0xe20] sm:$0xff] }
 0x3f1   :  { %7423 = vmatpush1.bf16.msra.mxu0 %v9603_v46  ;;  %v4617_v46 = vld [vmem:[#allocation9 + $0xd28] sm:$0xff] }
 0x3f2   :  { %7587 = vmatpush1.bf16.msra.mxu1 %v9605_v20  ;;  %7433 = vmatprep.subr.bf16.mxu0 %v9612_v48  ;;  %v9635_v20 = vcombine.low %v4604_v34, %v4608_v0  ;;  %v9637_v48 = vcombine.low %v4605_v35, %v4609_v6  ;;  %v4652_v0 = vld [vmem:[#allocation9 + $0xe40] sm:$0xff]  ;;  %v4653_v6 = vld [vmem:[#allocation9 + $0xe48] sm:$0xff] }
 0x3f3   :  { %7597 = vmatprep.subr.bf16.mxu1 %v9614_v49  ;;  %v9644_v49 = vcombine.high %v4612_v38, %v4616_v40  ;;  %v4656_v35 = vld [vmem:[#allocation9 + $0xe60] sm:$0xff] }
 0x407   :  { %v4009_v27 = vpop.f32.mrb[12].mxu0 }
 0x408   :  { %v9896_v59 = vadd.f32 %v4009_v27, %v943_v52  ;;  %v10610_v16 = vpop.f32.mrb[12].mxu1  ;;  %v4011_v60 = vpop.f32.mrb[13].mxu0  ;;  %v9646_v52 = vcombine.high %v4613_v45, %v4617_v46  ;;  %v4621_v27 = vld [vmem:[#allocation9 + $0xd48] sm:$0xff] }
 0x409   :  { %v9897_v1 = vadd.f32 %v4011_v60, %v947_v53  ;;  %v4175_v2 = vpop.f32.mrb[13].mxu1  ;;  %v4013_v3 = vpop.f32.mrb[14].mxu0  ;;  %v4620_v53 = vld [vmem:[#allocation9 + $0xd40] sm:$0xff]  ;;  %v9643_v60 = vcombine.low %v4612_v38, %v4616_v40 }
 0x40a   :  { %v4184_v55 = vmax.f32 %v9896_v59, 0.0  ;;  %v9899_v23 = vadd.f32 %v4175_v2, %v955_v56  ;;  %v4177_v47 = vpop.f32.mrb[14].mxu1  ;;  %v4014_v4 = vpop.f32.mrb[15].mxu0  ;;  %v4624_v56 = vld [vmem:[#allocation9 + $0xd60] sm:$0xff]  ;;  %v4625_v59 = vld [vmem:[#allocation9 + $0xd68] sm:$0xff] }
 0x40b   :  { %v4185_v5 = vmax.f32 %v9897_v1, 0.0  ;;  %v4178_v7 = vpop.f32.mrb[15].mxu1  ;;  %v9645_v1 = vcombine.low %v4613_v45, %v4617_v46  ;;  %v9652_v2 = vcombine.high %v4620_v53, %v4624_v56  ;;  %v9654_v3 = vcombine.high %v4621_v27, %v4625_v59  ;;  %v4629_v47 = vld [vmem:[#allocation9 + $0xd88] sm:$0xff]  ;;  %v4660_v40 = vld [vmem:[#allocation9 + $0xe80] sm:$0xff] }
 0x40c   :  { %v4187_v43 = vmax.f32 %v9899_v23, 0.0  ;;  %v10614_v11 = vpack.c.bf16 %v4184_v55, %v4184_v55  ;;  %v4628_v55 = vld [vmem:[#allocation9 + $0xd80] sm:$0xff]  ;;  %v4633_v4 = vld [vmem:[#allocation9 + $0xda8] sm:$0xff]  ;;  %v9653_v7 = vcombine.low %v4621_v27, %v4625_v59 }
 0x40d   :  { %v10612_v63 = vpack.c.bf16 %v4185_v5, %v4185_v5  ;;  %v4632_v23 = vld [vmem:[#allocation9 + $0xda0] sm:$0xff]  ;;  %v9651_v5 = vcombine.low %v4620_v53, %v4624_v56  ;;  %v9661_v12 = vcombine.low %v4629_v47, %v4633_v4  ;;  %v4661_v46 = vld [vmem:[#allocation9 + $0xe88] sm:$0xff] }
 0x40e   :  { %v10618_v19 = vpack.c.bf16 %v4187_v43, %v4187_v43  ;;  %v9660_v8 = vcombine.high %v4628_v55, %v4632_v23  ;;  %v9662_v43 = vcombine.high %v4629_v47, %v4633_v4  ;;  %v4664_v45 = vld [vmem:[#allocation9 + $0xea0] sm:$0xff]  ;;  %v4669_v59 = vld [vmem:[#allocation9 + $0xec8] sm:$0xff] }
 0x40f   :  { %7424 = vmatprep.mubr.bf16.mxu0 %v10612_v63  ;;  %7588 = vmatprep.mubr.bf16.mxu1 %v10612_v63  ;;  %v4668_v56 = vld [vmem:[#allocation9 + $0xec0] sm:$0xff]  ;;  %v4677_v4 = vld [vmem:[#allocation9 + $0xf08] sm:$0xff] }
 0x410   :  { %7425 = vmatmul.mubr.bf16.vlgmr.msra.gmra.mrb[16].mxu0 %v10614_v11  ;;  %7589 = vmatmul.mubr.bf16.vlgmr.msra.gmra.mrb[16].mxu1 %v10614_v11  ;;  %v4672_v27 = vld [vmem:[#allocation9 + $0xee0] sm:$0xff] }
 0x411   :  { %7434 = vmatpush1.bf16.msra.mxu0 %v9611_v10  ;;  %7598 = vmatpush1.bf16.msra.mxu1 %v9613_v25  ;;  %v4641_v10 = vld [vmem:[#allocation9 + $0xde8] sm:$0xff]  ;;  %v9659_v25 = vcombine.low %v4628_v55, %v4632_v23  ;;  %v4676_v23 = vld [vmem:[#allocation9 + $0xf00] sm:$0xff] }
 0x412   :  { %7465 = vmatprep.mubr.bf16.mxu0 %v10618_v19  ;;  %7629 = vmatprep.mubr.bf16.mxu1 %v10618_v19  ;;  %v4680_v47 = vld [vmem:[#allocation9 + $0xf20] sm:$0xff] }
 0x413   :  { %7435 = vmatprep.subr.bf16.mxu0 %v9620_v13  ;;  %7599 = vmatprep.subr.bf16.mxu1 %v9622_v21  ;;  %v9668_v13 = vcombine.high %v4636_v30, %v4640_v62  ;;  %v9670_v21 = vcombine.high %v4637_v9, %v4641_v10 }
 0x415   :  { %7436 = vmatpush1.bf16.msra.mxu0 %v9619_v22  ;;  %7600 = vmatpush1.bf16.msra.mxu1 %v9621_v24  ;;  %v4649_v22 = vld [vmem:[#allocation9 + $0xe28] sm:$0xff]  ;;  %v9667_v24 = vcombine.low %v4636_v30, %v4640_v62  ;;  %v4684_v62 = vld [vmem:[#allocation9 + $0xf40] sm:$0xff] }
 0x416   :  { %7437 = vmatprep.subr.bf16.mxu0 %v9628_v33  ;;  %7601 = vmatprep.subr.bf16.mxu1 %v9630_v54  ;;  %v9669_v33 = vcombine.low %v4637_v9, %v4641_v10  ;;  %v9676_v54 = vcombine.high %v4644_v15, %v4648_v17  ;;  %v9678_v34 = vcombine.high %v4645_v51, %v4649_v22  ;;  %v4688_v9 = vld [vmem:[#allocation9 + $0xf60] sm:$0xff]  ;;  %v4685_v10 = vld [vmem:[#allocation9 + $0xf48] sm:$0xff] }
 0x419   :  { %7438 = vmatpush1.bf16.msra.mxu0 %v9627_v28  ;;  %7602 = vmatpush1.bf16.msra.mxu1 %v9629_v36  ;;  %v4657_v28 = vld [vmem:[#allocation9 + $0xe68] sm:$0xff]  ;;  %v9675_v36 = vcombine.low %v4644_v15, %v4648_v17  ;;  %v4692_v17 = vld [vmem:[#allocation9 + $0xf80] sm:$0xff] }
 0x41a   :  { %7439 = vmatprep.subr.bf16.mxu0 %v9636_v42  ;;  %7603 = vmatprep.subr.bf16.mxu1 %v9638_v37  ;;  %v9677_v42 = vcombine.low %v4645_v51, %v4649_v22  ;;  %v9684_v37 = vcombine.high %v4652_v0, %v4656_v35  ;;  %v9686_v38 = vcombine.high %v4653_v6, %v4657_v28  ;;  %v4696_v51 = vld [vmem:[#allocation9 + $0xfa0] sm:$0xff]  ;;  %v4693_v22 = vld [vmem:[#allocation9 + $0xf88] sm:$0xff] }
 0x41d   :  { %7440 = vmatpush1.bf16.msra.mxu0 %v9635_v20  ;;  %7604 = vmatpush1.bf16.msra.mxu1 %v9637_v48  ;;  %v4665_v20 = vld [vmem:[#allocation9 + $0xea8] sm:$0xff]  ;;  %v9683_v48 = vcombine.low %v4652_v0, %v4656_v35  ;;  %v9724_v0 = vcombine.high %v4692_v17, %v4696_v51 }
 0x41e   :  { %7441 = vmatprep.subr.bf16.mxu0 %v9644_v49  ;;  %7605 = vmatprep.subr.bf16.mxu1 %v9646_v52  ;;  %v9685_v49 = vcombine.low %v4653_v6, %v4657_v28  ;;  %v9692_v52 = vcombine.high %v4660_v40, %v4664_v45  ;;  %v9694_v53 = vcombine.high %v4661_v46, %v4665_v20  ;;  %v4700_v6 = vld [vmem:[#allocation9 + $0xfc0] sm:$0xff] }
 0x41f   :  { %v4704_v28 = vld [vmem:[#allocation9 + $0xfe0] sm:$0xff] }
 0x421   :  { %7442 = vmatpush1.bf16.msra.mxu0 %v9643_v60  ;;  %7606 = vmatpush1.bf16.msra.mxu1 %v9645_v1  ;;  %v4673_v60 = vld [vmem:[#allocation9 + $0xee8] sm:$0xff]  ;;  %v9691_v1 = vcombine.low %v4660_v40, %v4664_v45  ;;  %v9732_v45 = vcombine.high %v4700_v6, %v4704_v28 }
 0x422   :  { %7443 = vmatprep.subr.bf16.mxu0 %v9652_v2  ;;  %7607 = vmatprep.subr.bf16.mxu1 %v9654_v3  ;;  %v9693_v2 = vcombine.low %v4661_v46, %v4665_v20  ;;  %v9700_v3 = vcombine.high %v4668_v56, %v4672_v27  ;;  %v9702_v55 = vcombine.high %v4669_v59, %v4673_v60  ;;  %v4198_v20 = vld [vmem:[#allocation9 + $0x10] sm:$0xff] }
 0x425   :  { %7444 = vmatpush1.bf16.msra.mxu0 %v9651_v5  ;;  %7608 = vmatpush1.bf16.msra.mxu1 %v9653_v7  ;;  %v4681_v5 = vld [vmem:[#allocation9 + $0xf28] sm:$0xff]  ;;  %v9699_v7 = vcombine.low %v4668_v56, %v4672_v27 }
 0x426   :  { %7445 = vmatprep.subr.bf16.mxu0 %v9660_v8  ;;  %7609 = vmatprep.subr.bf16.mxu1 %v9662_v43  ;;  %v9701_v8 = vcombine.low %v4669_v59, %v4673_v60  ;;  %v9708_v43 = vcombine.high %v4676_v23, %v4680_v47  ;;  %v9710_v30 = vcombine.high %v4677_v4, %v4681_v5  ;;  %v4206_v60 = vld [vmem:[#allocation9 + $0x50] sm:$0xff] }
 0x429   :  { %7446 = vmatpush1.bf16.msra.mxu0 %v9659_v25  ;;  %7610 = vmatpush1.bf16.msra.mxu1 %v9661_v12  ;;  %v4689_v25 = vld [vmem:[#allocation9 + $0xf68] sm:$0xff]  ;;  %v9707_v12 = vcombine.low %v4676_v23, %v4680_v47 }
 0x42a   :  { %7447 = vmatprep.subr.bf16.mxu0 %v9668_v13  ;;  %7611 = vmatprep.subr.bf16.mxu1 %v9670_v21  ;;  %v9709_v13 = vcombine.low %v4677_v4, %v4681_v5  ;;  %v9716_v21 = vcombine.high %v4684_v62, %v4688_v9  ;;  %v9718_v15 = vcombine.high %v4685_v10, %v4689_v25  ;;  %v4214_v5 = vld [vmem:[#allocation9 + $0x90] sm:$0xff] }
 0x42d   :  { %7448 = vmatpush1.bf16.msra.mxu0 %v9667_v24  ;;  %7612 = vmatpush1.bf16.msra.mxu1 %v9669_v33  ;;  %v4697_v24 = vld [vmem:[#allocation9 + $0xfa8] sm:$0xff]  ;;  %v9715_v33 = vcombine.low %v4684_v62, %v4688_v9 }
 0x42e   :  { %7449 = vmatprep.subr.bf16.mxu0 %v9676_v54  ;;  %7613 = vmatprep.subr.bf16.mxu1 %v9678_v34  ;;  %v9717_v54 = vcombine.low %v4685_v10, %v4689_v25  ;;  %v951_v34 = vrot.slane %v10602_v50, %v10540_v18  ;;  %v9726_v35 = vcombine.high %v4693_v22, %v4697_v24  ;;  %v4202_v50 = vld [vmem:[#allocation9 + $0x30] sm:$0xff] }
 0x42f   :  { %v9232_v27 = vcombine.high %v4198_v20, %v4202_v50  ;;  %v4222_v25 = vld [vmem:[#allocation9 + $0xd0] sm:$0xff] }
 0x430   :  { %v9898_v40 = vadd.f32 %v10610_v16, %v951_v34  ;;  %v4207_v16 = vld [vmem:[#allocation9 + $0x58] sm:$0xff] }
 0x431   :  { %7450 = vmatpush1.bf16.msra.mxu0 %v9675_v36  ;;  %7614 = vmatpush1.bf16.msra.mxu1 %v9677_v42  ;;  %v4701_v36 = vld [vmem:[#allocation9 + $0xfc8] sm:$0xff] }
 0x432   :  { %7451 = vmatprep.subr.bf16.mxu0 %v9684_v37  ;;  %7615 = vmatprep.subr.bf16.mxu1 %v9686_v38  ;;  %v4705_v42 = vld [vmem:[#allocation9 + $0xfe8] sm:$0xff]  ;;  %v9723_v37 = vcombine.low %v4692_v17, %v4696_v51  ;;  %v9725_v38 = vcombine.low %v4693_v22, %v4697_v24  ;;  %v4186_v56 = vmax.f32 %v9898_v40, 0.0  ;;  %v4230_v24 = vld [vmem:[#allocation9 + $0x110] sm:$0xff] }
 0x433   :  { %v9734_v46 = vcombine.high %v4701_v36, %v4705_v42 }
 0x435   :  { %7452 = vmatpush1.bf16.msra.mxu0 %v9683_v48  ;;  %7616 = vmatpush1.bf16.msra.mxu1 %v9685_v49  ;;  %v4199_v48 = vld [vmem:[#allocation9 + $0x18] sm:$0xff] }
 0x436   :  { %7453 = vmatprep.subr.bf16.mxu0 %v9692_v52  ;;  %7617 = vmatprep.subr.bf16.mxu1 %v9694_v53  ;;  %v4203_v49 = vld [vmem:[#allocation9 + $0x38] sm:$0xff]  ;;  %v9731_v52 = vcombine.low %v4700_v6, %v4704_v28  ;;  %v9733_v53 = vcombine.low %v4701_v36, %v4705_v42  ;;  %v4238_v28 = vld [vmem:[#allocation9 + $0x150] sm:$0xff] }
 0x437   :  { %v9234_v59 = vcombine.high %v4199_v48, %v4203_v49  ;;  %v9233_v23 = vcombine.low %v4199_v48, %v4203_v49  ;;  %v4242_v36 = vld [vmem:[#allocation9 + $0x170] sm:$0xff]  ;;  %v4239_v42 = vld [vmem:[#allocation9 + $0x158] sm:$0xff] }
 0x438   :  { %v4247_v48 = vld [vmem:[#allocation9 + $0x198] sm:$0xff] }
 0x439   :  { %7454 = vmatpush1.bf16.msra.mxu0 %v9691_v1  ;;  %7618 = vmatpush1.bf16.msra.mxu1 %v9693_v2  ;;  %v4210_v1 = vld [vmem:[#allocation9 + $0x70] sm:$0xff]  ;;  %v4211_v2 = vld [vmem:[#allocation9 + $0x78] sm:$0xff] }
 0x43a   :  { %7455 = vmatprep.subr.bf16.mxu0 %v9700_v3  ;;  %7619 = vmatprep.subr.bf16.mxu1 %v9702_v55  ;;  %v9231_v3 = vcombine.low %v4198_v20, %v4202_v50  ;;  %v10627_v55 = vpack.c.bf16 %v4186_v56, %v4186_v56  ;;  %v9240_v47 = vcombine.high %v4206_v60, %v4210_v1  ;;  %v4246_v20 = vld [vmem:[#allocation9 + $0x190] sm:$0xff]  ;;  %v4251_v49 = vld [vmem:[#allocation9 + $0x1b8] sm:$0xff] }
 0x43b   :  { %v9242_v4 = vcombine.high %v4207_v16, %v4211_v2  ;;  %v9241_v62 = vcombine.low %v4207_v16, %v4211_v2  ;;  %v4250_v50 = vld [vmem:[#allocation9 + $0x1b0] sm:$0xff]  ;;  %v4259_v16 = vld [vmem:[#allocation9 + $0x1f8] sm:$0xff] }
 0x43c   :  { %v9280_v56 = vcombine.high %v4246_v20, %v4250_v50  ;;  %v9279_v2 = vcombine.low %v4246_v20, %v4250_v50  ;;  %v4298_v20 = vld [vmem:[#allocation9 + $0x330] sm:$0xff]  ;;  %v4295_v50 = vld [vmem:[#allocation9 + $0x318] sm:$0xff] }
 0x43d   :  { %7456 = vmatpush1.bf16.msra.mxu0 %v9699_v7  ;;  %7620 = vmatpush1.bf16.msra.mxu1 %v9701_v8  ;;  %v4218_v7 = vld [vmem:[#allocation9 + $0xb0] sm:$0xff]  ;;  %v4215_v8 = vld [vmem:[#allocation9 + $0x98] sm:$0xff] }
 0x43e   :  { %7457 = vmatprep.subr.bf16.mxu0 %v9708_v43  ;;  %7621 = vmatprep.subr.bf16.mxu1 %v9710_v30  ;;  %v4219_v43 = vld [vmem:[#allocation9 + $0xb8] sm:$0xff]  ;;  %v9239_v30 = vcombine.low %v4206_v60, %v4210_v1  ;;  %v9248_v9 = vcombine.high %v4214_v5, %v4218_v7  ;;  %v4258_v60 = vld [vmem:[#allocation9 + $0x1f0] sm:$0xff] }
 0x43f   :  { %v9250_v10 = vcombine.high %v4215_v8, %v4219_v43  ;;  %v9249_v17 = vcombine.low %v4215_v8, %v4219_v43  ;;  %v4255_v1 = vld [vmem:[#allocation9 + $0x1d8] sm:$0xff] }
 0x440   :  { %v4267_v8 = vld [vmem:[#allocation9 + $0x238] sm:$0xff] }
 0x441   :  { %7458 = vmatpush1.bf16.msra.mxu0 %v9707_v12  ;;  %7622 = vmatpush1.bf16.msra.mxu1 %v9709_v13  ;;  %v4226_v12 = vld [vmem:[#allocation9 + $0xf0] sm:$0xff]  ;;  %v4223_v13 = vld [vmem:[#allocation9 + $0xd8] sm:$0xff] }
 0x442   :  { %7459 = vmatprep.subr.bf16.mxu0 %v9716_v21  ;;  %7623 = vmatprep.subr.bf16.mxu1 %v9718_v15  ;;  %v4227_v21 = vld [vmem:[#allocation9 + $0xf8] sm:$0xff]  ;;  %v9247_v15 = vcombine.low %v4214_v5, %v4218_v7  ;;  %v9256_v51 = vcombine.high %v4222_v25, %v4226_v12  ;;  %v9255_v34 = vcombine.low %v4222_v25, %v4226_v12  ;;  %v4266_v5 = vld [vmem:[#allocation9 + $0x230] sm:$0xff] }
 0x443   :  { %v9258_v22 = vcombine.high %v4223_v13, %v4227_v21  ;;  %v4263_v7 = vld [vmem:[#allocation9 + $0x218] sm:$0xff]  ;;  %v4274_v25 = vld [vmem:[#allocation9 + $0x270] sm:$0xff] }
 0x444   :  { %v4271_v12 = vld [vmem:[#allocation9 + $0x258] sm:$0xff] }
 0x445   :  { %7460 = vmatpush1.bf16.msra.mxu0 %v9715_v33  ;;  %7624 = vmatpush1.bf16.msra.mxu1 %v9717_v54  ;;  %v4234_v33 = vld [vmem:[#allocation9 + $0x130] sm:$0xff]  ;;  %v4235_v54 = vld [vmem:[#allocation9 + $0x138] sm:$0xff] }
 0x446   :  { %7461 = vmatprep.subr.bf16.mxu0 %v9724_v0  ;;  %7625 = vmatprep.subr.bf16.mxu1 %v9726_v35  ;;  %v9257_v0 = vcombine.low %v4223_v13, %v4227_v21  ;;  %v9264_v35 = vcombine.high %v4230_v24, %v4234_v33  ;;  %v4275_v13 = vld [vmem:[#allocation9 + $0x278] sm:$0xff] }
 0x449   :  { %7462 = vmatpush1.bf16.msra.mxu0 %v9723_v37  ;;  %7626 = vmatpush1.bf16.msra.mxu1 %v9725_v38  ;;  %v4243_v37 = vld [vmem:[#allocation9 + $0x178] sm:$0xff]  ;;  %v9263_v38 = vcombine.low %v4230_v24, %v4234_v33  ;;  %v4282_v24 = vld [vmem:[#allocation9 + $0x2b0] sm:$0xff] }
 0x44a   :  { %7463 = vmatprep.subr.bf16.mxu0 %v9732_v45  ;;  %7627 = vmatprep.subr.bf16.mxu1 %v9734_v46  ;;  %v9272_v45 = vcombine.high %v4238_v28, %v4242_v36  ;;  %v9274_v46 = vcombine.high %v4239_v42, %v4243_v37  ;;  %v4279_v33 = vld [vmem:[#allocation9 + $0x298] sm:$0xff] }
 0x44d   :  { %7464 = vmatpush1.bf16.msra.mxu0 %v9731_v52  ;;  %7628 = vmatpush1.bf16.msra.mxu1 %v9733_v53  ;;  %v9271_v52 = vcombine.low %v4238_v28, %v4242_v36  ;;  %v9273_v53 = vcombine.low %v4239_v42, %v4243_v37  ;;  %v4290_v28 = vld [vmem:[#allocation9 + $0x2f0] sm:$0xff]  ;;  %v4287_v36 = vld [vmem:[#allocation9 + $0x2d8] sm:$0xff] }
 0x44e   :  { %7638 = vmatprep.subr.bf16.mxu0 %v9232_v27  ;;  %7802 = vmatprep.subr.bf16.mxu1 %v9234_v59  ;;  %v9282_v27 = vcombine.high %v4247_v48, %v4251_v49  ;;  %v4254_v59 = vld [vmem:[#allocation9 + $0x1d0] sm:$0xff]  ;;  %v4291_v42 = vld [vmem:[#allocation9 + $0x2f8] sm:$0xff] }
 0x44f   :  { %v9287_v43 = vcombine.low %v4254_v59, %v4258_v60 }
 0x450   :  { %7466 = vmatmul.mubr.bf16.vlgmr.msra.gmra.mrb[16].mxu0 %v10627_v55  ;;  %7630 = vmatmul.mubr.bf16.vlgmr.msra.gmra.mrb[16].mxu1 %v10627_v55 }
 0x451   :  { %7639 = vmatpush1.bf16.msra.mxu0 %v9231_v3  ;;  %7670 = vmatprep.mubr.bf16.mxu0 %v10575_v14  ;;  %v9281_v3 = vcombine.low %v4247_v48, %v4251_v49  ;;  %v4299_v48 = vld [vmem:[#allocation9 + $0x338] sm:$0xff] }
 0x452   :  { %7803 = vmatpush1.bf16.msra.mxu1 %v9233_v23  ;;  %7834 = vmatprep.mubr.bf16.mxu1 %v10575_v14  ;;  %v4231_v14 = vld [vmem:[#allocation9 + $0x118] sm:$0xff]  ;;  %v9288_v23 = vcombine.high %v4254_v59, %v4258_v60  ;;  %v4306_v59 = vld [vmem:[#allocation9 + $0x370] sm:$0xff] }
 0x453   :  { %7640 = vmatprep.subr.bf16.mxu0 %v9240_v47  ;;  %7804 = vmatprep.subr.bf16.mxu1 %v9242_v4  ;;  %v9266_v6 = vcombine.high %v4231_v14, %v4235_v54  ;;  %v9265_v40 = vcombine.low %v4231_v14, %v4235_v54  ;;  %v9290_v47 = vcombine.high %v4255_v1, %v4259_v16  ;;  %v4262_v4 = vld [vmem:[#allocation9 + $0x210] sm:$0xff]  ;;  %v4283_v14 = vld [vmem:[#allocation9 + $0x2b8] sm:$0xff] }
 0x454   :  { %v9295_v21 = vcombine.low %v4262_v4, %v4266_v5  ;;  %v4303_v60 = vld [vmem:[#allocation9 + $0x358] sm:$0xff] }
 0x455   :  { %7641 = vmatpush1.bf16.msra.mxu0 %v9239_v30  ;;  %v9289_v30 = vcombine.low %v4255_v1, %v4259_v16  ;;  %v4307_v1 = vld [vmem:[#allocation9 + $0x378] sm:$0xff] }
 0x456   :  { %7805 = vmatpush1.bf16.msra.mxu1 %v9241_v62  ;;  %7642 = vmatprep.subr.bf16.mxu0 %v9248_v9  ;;  %v9296_v62 = vcombine.high %v4262_v4, %v4266_v5  ;;  %v9298_v9 = vcombine.high %v4263_v7, %v4267_v8  ;;  %v4314_v4 = vld [vmem:[#allocation9 + $0x3b0] sm:$0xff]  ;;  %v4311_v5 = vld [vmem:[#allocation9 + $0x398] sm:$0xff] }
 0x457   :  { %7806 = vmatprep.subr.bf16.mxu1 %v9250_v10  ;;  %v4270_v10 = vld [vmem:[#allocation9 + $0x250] sm:$0xff] }
 0x458   :  { %v9303_v54 = vcombine.low %v4270_v10, %v4274_v25 }
 0x459   :  { %7643 = vmatpush1.bf16.msra.mxu0 %v9247_v15  ;;  %v9297_v15 = vcombine.low %v4263_v7, %v4267_v8  ;;  %v4315_v7 = vld [vmem:[#allocation9 + $0x3b8] sm:$0xff] }
 0x45a   :  { %7807 = vmatpush1.bf16.msra.mxu1 %v9249_v17  ;;  %7644 = vmatprep.subr.bf16.mxu0 %v9256_v51  ;;  %v9304_v17 = vcombine.high %v4270_v10, %v4274_v25  ;;  %v9306_v51 = vcombine.high %v4271_v12, %v4275_v13  ;;  %v4322_v10 = vld [vmem:[#allocation9 + $0x3f0] sm:$0xff]  ;;  %v4319_v25 = vld [vmem:[#allocation9 + $0x3d8] sm:$0xff] }
 0x45b   :  { %7808 = vmatprep.subr.bf16.mxu1 %v9258_v22  ;;  %v4278_v22 = vld [vmem:[#allocation9 + $0x290] sm:$0xff] }
 0x45c   :  { %v9311_v37 = vcombine.low %v4278_v22, %v4282_v24 }
 0x45d   :  { %7645 = vmatpush1.bf16.msra.mxu0 %v9255_v34  ;;  %v9305_v34 = vcombine.low %v4271_v12, %v4275_v13  ;;  %v4323_v12 = vld [vmem:[#allocation9 + $0x3f8] sm:$0xff] }
 0x45e   :  { %7809 = vmatpush1.bf16.msra.mxu1 %v9257_v0  ;;  %7646 = vmatprep.subr.bf16.mxu0 %v9264_v35  ;;  %v9312_v0 = vcombine.high %v4278_v22, %v4282_v24  ;;  %v9314_v35 = vcombine.high %v4279_v33, %v4283_v14  ;;  %v4330_v22 = vld [vmem:[#allocation9 + $0x430] sm:$0xff]  ;;  %v4327_v24 = vld [vmem:[#allocation9 + $0x418] sm:$0xff] }
 0x45f   :  { %7810 = vmatprep.subr.bf16.mxu1 %v9266_v6  ;;  %v4286_v6 = vld [vmem:[#allocation9 + $0x2d0] sm:$0xff] }
 0x460   :  { %v9319_v49 = vcombine.low %v4286_v6, %v4290_v28 }
 0x461   :  { %7647 = vmatpush1.bf16.msra.mxu0 %v9263_v38  ;;  %v9313_v38 = vcombine.low %v4279_v33, %v4283_v14  ;;  %v4331_v33 = vld [vmem:[#allocation9 + $0x438] sm:$0xff] }
 0x462   :  { %7811 = vmatpush1.bf16.msra.mxu1 %v9265_v40  ;;  %7648 = vmatprep.subr.bf16.mxu0 %v9272_v45  ;;  %v9320_v40 = vcombine.high %v4286_v6, %v4290_v28  ;;  %v9322_v45 = vcombine.high %v4287_v36, %v4291_v42  ;;  %v4338_v6 = vld [vmem:[#allocation9 + $0x470] sm:$0xff] }
 0x463   :  { %7812 = vmatprep.subr.bf16.mxu1 %v9274_v46  ;;  %v4294_v46 = vld [vmem:[#allocation9 + $0x310] sm:$0xff] }
 0x464   :  { %v9327_v16 = vcombine.low %v4294_v46, %v4298_v20 }
 0x465   :  { %7649 = vmatpush1.bf16.msra.mxu0 %v9271_v52  ;;  %v9321_v52 = vcombine.low %v4287_v36, %v4291_v42  ;;  %v4335_v36 = vld [vmem:[#allocation9 + $0x458] sm:$0xff] }
 0x466   :  { %7813 = vmatpush1.bf16.msra.mxu1 %v9273_v53  ;;  %7650 = vmatprep.subr.bf16.mxu0 %v9280_v56  ;;  %v9328_v53 = vcombine.high %v4294_v46, %v4298_v20  ;;  %v9330_v56 = vcombine.high %v4295_v50, %v4299_v48  ;;  %v4339_v42 = vld [vmem:[#allocation9 + $0x478] sm:$0xff] }
 0x467   :  { %7814 = vmatprep.subr.bf16.mxu1 %v9282_v27  ;;  %v4302_v27 = vld [vmem:[#allocation9 + $0x350] sm:$0xff]  ;;  %v9370_v46 = vcombine.high %v4335_v36, %v4339_v42  ;;  %v4343_v20 = vld [vmem:[#allocation9 + $0x498] sm:$0xff] }
 0x468   :  { %v9335_v8 = vcombine.low %v4302_v27, %v4306_v59 }
 0x469   :  { %7651 = vmatpush1.bf16.msra.mxu0 %v9279_v2  ;;  %v9329_v2 = vcombine.low %v4295_v50, %v4299_v48  ;;  %v4347_v50 = vld [vmem:[#allocation9 + $0x4b8] sm:$0xff] }
 0x46a   :  { %7815 = vmatpush1.bf16.msra.mxu1 %v9281_v3  ;;  %7652 = vmatprep.subr.bf16.mxu0 %v9288_v23  ;;  %v9336_v3 = vcombine.high %v4302_v27, %v4306_v59  ;;  %v9338_v23 = vcombine.high %v4303_v60, %v4307_v1  ;;  %v4354_v27 = vld [vmem:[#allocation9 + $0x4f0] sm:$0xff]  ;;  %v4351_v59 = vld [vmem:[#allocation9 + $0x4d8] sm:$0xff] }
 0x46b   :  { %7816 = vmatprep.subr.bf16.mxu1 %v9290_v47  ;;  %v4310_v47 = vld [vmem:[#allocation9 + $0x390] sm:$0xff] }
 0x46c   :  { %v9343_v13 = vcombine.low %v4310_v47, %v4314_v4 }
 0x46d   :  { %7653 = vmatpush1.bf16.msra.mxu0 %v9287_v43  ;;  %v9337_v43 = vcombine.low %v4303_v60, %v4307_v1  ;;  %v4355_v60 = vld [vmem:[#allocation9 + $0x4f8] sm:$0xff] }
 0x46e   :  { %7817 = vmatpush1.bf16.msra.mxu1 %v9289_v30  ;;  %7654 = vmatprep.subr.bf16.mxu0 %v9296_v62  ;;  %v9344_v30 = vcombine.high %v4310_v47, %v4314_v4  ;;  %v9346_v62 = vcombine.high %v4311_v5, %v4315_v7  ;;  %v4359_v47 = vld [vmem:[#allocation9 + $0x518] sm:$0xff] }
 0x46f   :  { %7818 = vmatprep.subr.bf16.mxu1 %v9298_v9  ;;  %v4318_v9 = vld [vmem:[#allocation9 + $0x3d0] sm:$0xff]  ;;  %v4363_v4 = vld [vmem:[#allocation9 + $0x538] sm:$0xff] }
 0x470   :  { %v9351_v14 = vcombine.low %v4318_v9, %v4322_v10 }
 0x471   :  { %7655 = vmatpush1.bf16.msra.mxu0 %v9295_v21  ;;  %v9345_v21 = vcombine.low %v4311_v5, %v4315_v7  ;;  %v9385_v5 = vcombine.low %v4351_v59, %v4355_v60 }
 0x472   :  { %7819 = vmatpush1.bf16.msra.mxu1 %v9297_v15  ;;  %7656 = vmatprep.subr.bf16.mxu0 %v9304_v17  ;;  %v9352_v15 = vcombine.high %v4318_v9, %v4322_v10  ;;  %v9354_v17 = vcombine.high %v4319_v25, %v4323_v12  ;;  %v4371_v9 = vld [vmem:[#allocation9 + $0x578] sm:$0xff] }
 0x473   :  { %7820 = vmatprep.subr.bf16.mxu1 %v9306_v51  ;;  %v4326_v51 = vld [vmem:[#allocation9 + $0x410] sm:$0xff] }
 0x474   :  { %v9359_v28 = vcombine.low %v4326_v51, %v4330_v22 }
 0x475   :  { %7657 = vmatpush1.bf16.msra.mxu0 %v9303_v54  ;;  %v9353_v54 = vcombine.low %v4319_v25, %v4323_v12  ;;  %v9393_v25 = vcombine.low %v4359_v47, %v4363_v4 }
 0x476   :  { %7821 = vmatpush1.bf16.msra.mxu1 %v9305_v34  ;;  %7658 = vmatprep.subr.bf16.mxu0 %v9312_v0  ;;  %v9360_v34 = vcombine.high %v4326_v51, %v4330_v22  ;;  %v9362_v0 = vcombine.high %v4327_v24, %v4331_v33  ;;  %v4379_v51 = vld [vmem:[#allocation9 + $0x5b8] sm:$0xff] }
 0x477   :  { %7822 = vmatprep.subr.bf16.mxu1 %v9314_v35  ;;  %v4334_v35 = vld [vmem:[#allocation9 + $0x450] sm:$0xff] }
 0x478   :  { %v9367_v48 = vcombine.low %v4334_v35, %v4338_v6 }
 0x479   :  { %7659 = vmatpush1.bf16.msra.mxu0 %v9311_v37  ;;  %v9361_v37 = vcombine.low %v4327_v24, %v4331_v33 }
 0x47a   :  { %7823 = vmatpush1.bf16.msra.mxu1 %v9313_v38  ;;  %7660 = vmatprep.subr.bf16.mxu0 %v9320_v40  ;;  %v9368_v38 = vcombine.high %v4334_v35, %v4338_v6  ;;  %v4342_v40 = vld [vmem:[#allocation9 + $0x490] sm:$0xff]  ;;  %v4387_v35 = vld [vmem:[#allocation9 + $0x5f8] sm:$0xff] }
 0x47b   :  { %7824 = vmatprep.subr.bf16.mxu1 %v9322_v45  ;;  %v4346_v45 = vld [vmem:[#allocation9 + $0x4b0] sm:$0xff] }
 0x47c   :  { %v9375_v1 = vcombine.low %v4342_v40, %v4346_v45 }
 0x47d   :  { %7661 = vmatpush1.bf16.msra.mxu0 %v9319_v49  ;;  %v9369_v49 = vcombine.low %v4335_v36, %v4339_v42 }
 0x47e   :  { %7825 = vmatpush1.bf16.msra.mxu1 %v9321_v52  ;;  %7662 = vmatprep.subr.bf16.mxu0 %v9328_v53  ;;  %v9376_v52 = vcombine.high %v4342_v40, %v4346_v45  ;;  %v9378_v53 = vcombine.high %v4343_v20, %v4347_v50  ;;  %v4391_v40 = vld [vmem:[#allocation9 + $0x618] sm:$0xff] }
 0x47f   :  { %7826 = vmatprep.subr.bf16.mxu1 %v9330_v56  ;;  %v4350_v56 = vld [vmem:[#allocation9 + $0x4d0] sm:$0xff]  ;;  %v4395_v45 = vld [vmem:[#allocation9 + $0x638] sm:$0xff] }
 0x481   :  { %7663 = vmatpush1.bf16.msra.mxu0 %v9327_v16  ;;  %v9384_v16 = vcombine.high %v4350_v56, %v4354_v27 }
 0x482   :  { %7827 = vmatpush1.bf16.msra.mxu1 %v9329_v2  ;;  %7664 = vmatprep.subr.bf16.mxu0 %v9336_v3  ;;  %v9386_v2 = vcombine.high %v4351_v59, %v4355_v60  ;;  %v4358_v3 = vld [vmem:[#allocation9 + $0x510] sm:$0xff]  ;;  %v9425_v59 = vcombine.low %v4391_v40, %v4395_v45 }
 0x483   :  { %7828 = vmatprep.subr.bf16.mxu1 %v9338_v23  ;;  %v4362_v23 = vld [vmem:[#allocation9 + $0x530] sm:$0xff] }
 0x484   :  { %v9392_v7 = vcombine.high %v4358_v3, %v4362_v23  ;;  %v9391_v10 = vcombine.low %v4358_v3, %v4362_v23  ;;  %v4411_v3 = vld [vmem:[#allocation9 + $0x6b8] sm:$0xff] }
 0x485   :  { %7665 = vmatpush1.bf16.msra.mxu0 %v9335_v8  ;;  %v9394_v8 = vcombine.high %v4359_v47, %v4363_v4 }
 0x486   :  { %7829 = vmatpush1.bf16.msra.mxu1 %v9337_v43  ;;  %7666 = vmatprep.subr.bf16.mxu0 %v9344_v30  ;;  %v4366_v43 = vld [vmem:[#allocation9 + $0x550] sm:$0xff] }
 0x487   :  { %7830 = vmatprep.subr.bf16.mxu1 %v9346_v62  ;;  %v4370_v30 = vld [vmem:[#allocation9 + $0x570] sm:$0xff]  ;;  %v4367_v62 = vld [vmem:[#allocation9 + $0x558] sm:$0xff] }
 0x488   :  { %v9400_v12 = vcombine.high %v4366_v43, %v4370_v30  ;;  %v9399_v22 = vcombine.low %v4366_v43, %v4370_v30  ;;  %v9401_v24 = vcombine.low %v4367_v62, %v4371_v9  ;;  %v4419_v43 = vld [vmem:[#allocation9 + $0x6f8] sm:$0xff] }
 0x489   :  { %7667 = vmatpush1.bf16.msra.mxu0 %v9343_v13  ;;  %v9402_v13 = vcombine.high %v4367_v62, %v4371_v9 }
 0x48a   :  { %7831 = vmatpush1.bf16.msra.mxu1 %v9345_v21  ;;  %7668 = vmatprep.subr.bf16.mxu0 %v9352_v15  ;;  %v4374_v21 = vld [vmem:[#allocation9 + $0x590] sm:$0xff] }
 0x48b   :  { %7832 = vmatprep.subr.bf16.mxu1 %v9354_v17  ;;  %v4378_v15 = vld [vmem:[#allocation9 + $0x5b0] sm:$0xff]  ;;  %v4375_v17 = vld [vmem:[#allocation9 + $0x598] sm:$0xff] }
 0x48c   :  { %v9408_v33 = vcombine.high %v4374_v21, %v4378_v15  ;;  %v9407_v6 = vcombine.low %v4374_v21, %v4378_v15  ;;  %v4427_v21 = vld [vmem:[#allocation9 + $0x738] sm:$0xff] }
 0x48d   :  { %7669 = vmatpush1.bf16.msra.mxu0 %v9351_v14  ;;  %v9410_v14 = vcombine.high %v4375_v17, %v4379_v51 }
 0x48e   :  { %7833 = vmatpush1.bf16.msra.mxu1 %v9353_v54  ;;  %7679 = vmatprep.subr.bf16.mxu0 %v9360_v34  ;;  %v4382_v54 = vld [vmem:[#allocation9 + $0x5d0] sm:$0xff] }
 0x48f   :  { %7843 = vmatprep.subr.bf16.mxu1 %v9362_v0  ;;  %v4386_v34 = vld [vmem:[#allocation9 + $0x5f0] sm:$0xff]  ;;  %v4383_v0 = vld [vmem:[#allocation9 + $0x5d8] sm:$0xff] }
 0x490   :  { %7671 = vmatmul.mubr.bf16.vlgmr.msra.gmra.mrb[20].mxu0 %v10587_v58  ;;  %v9416_v36 = vcombine.high %v4382_v54, %v4386_v34  ;;  %v9418_v42 = vcombine.high %v4383_v0, %v4387_v35 }
 0x491   :  { %7835 = vmatmul.mubr.bf16.vlgmr.msra.gmra.mrb[20].mxu1 %v10587_v58  ;;  %7680 = vmatpush1.bf16.msra.mxu0 %v9359_v28  ;;  %v9377_v58 = vcombine.low %v4343_v20, %v4347_v50  ;;  %v9409_v28 = vcombine.low %v4375_v17, %v4379_v51  ;;  %v9417_v20 = vcombine.low %v4383_v0, %v4387_v35 }
 0x492   :  { %7711 = vmatprep.mubr.bf16.mxu0 %v10589_v61  ;;  %7844 = vmatpush1.bf16.msra.mxu1 %v9361_v37  ;;  %v4390_v37 = vld [vmem:[#allocation9 + $0x610] sm:$0xff] }
 0x493   :  { %7875 = vmatprep.mubr.bf16.mxu1 %v10589_v61  ;;  %7681 = vmatprep.subr.bf16.mxu0 %v9368_v38  ;;  %v9383_v61 = vcombine.low %v4350_v56, %v4354_v27  ;;  %v4394_v38 = vld [vmem:[#allocation9 + $0x630] sm:$0xff]  ;;  %v4403_v56 = vld [vmem:[#allocation9 + $0x678] sm:$0xff] }
 0x494   :  { %7845 = vmatprep.subr.bf16.mxu1 %v9370_v46  ;;  %v9415_v46 = vcombine.low %v4382_v54, %v4386_v34  ;;  %v9424_v50 = vcombine.high %v4390_v37, %v4394_v38  ;;  %v9423_v27 = vcombine.low %v4390_v37, %v4394_v38  ;;  %v4435_v54 = vld [vmem:[#allocation9 + $0x778] sm:$0xff] }
 0x495   :  { %7682 = vmatpush1.bf16.msra.mxu0 %v9367_v48  ;;  %v9426_v48 = vcombine.high %v4391_v40, %v4395_v45  ;;  %v4443_v37 = vld [vmem:[#allocation9 + $0x7b8] sm:$0xff] }
 0x496   :  { %7846 = vmatpush1.bf16.msra.mxu1 %v9369_v49  ;;  %7683 = vmatprep.subr.bf16.mxu0 %v9376_v52  ;;  %v4398_v49 = vld [vmem:[#allocation9 + $0x650] sm:$0xff] }
 0x497   :  { %7847 = vmatprep.subr.bf16.mxu1 %v9378_v53  ;;  %v4402_v52 = vld [vmem:[#allocation9 + $0x670] sm:$0xff]  ;;  %v4399_v53 = vld [vmem:[#allocation9 + $0x658] sm:$0xff] }
 0x498   :  { %v9432_v60 = vcombine.high %v4398_v49, %v4402_v52  ;;  %v9431_v23 = vcombine.low %v4398_v49, %v4402_v52  ;;  %v9433_v47 = vcombine.low %v4399_v53, %v4403_v56  ;;  %v4451_v49 = vld [vmem:[#allocation9 + $0x7f8] sm:$0xff] }
 0x499   :  { %7684 = vmatpush1.bf16.msra.mxu0 %v9375_v1  ;;  %v9434_v1 = vcombine.high %v4399_v53, %v4403_v56 }
 0x49a   :  { %7848 = vmatpush1.bf16.msra.mxu1 %v9377_v58  ;;  %7685 = vmatprep.subr.bf16.mxu0 %v9384_v16  ;;  %v4406_v58 = vld [vmem:[#allocation9 + $0x690] sm:$0xff] }
 0x49b   :  { %7849 = vmatprep.subr.bf16.mxu1 %v9386_v2  ;;  %v4410_v16 = vld [vmem:[#allocation9 + $0x6b0] sm:$0xff]  ;;  %v4407_v2 = vld [vmem:[#allocation9 + $0x698] sm:$0xff] }
 0x49c   :  { %v9440_v4 = vcombine.high %v4406_v58, %v4410_v16  ;;  %v9439_v30 = vcombine.low %v4406_v58, %v4410_v16  ;;  %v9441_v62 = vcombine.low %v4407_v2, %v4411_v3  ;;  %v4459_v58 = vld [vmem:[#allocation9 + $0x838] sm:$0xff] }
 0x49d   :  { %7686 = vmatpush1.bf16.msra.mxu0 %v9383_v61  ;;  %v9442_v61 = vcombine.high %v4407_v2, %v4411_v3 }
 0x49e   :  { %7850 = vmatpush1.bf16.msra.mxu1 %v9385_v5  ;;  %7687 = vmatprep.subr.bf16.mxu0 %v9392_v7  ;;  %v4414_v5 = vld [vmem:[#allocation9 + $0x6d0] sm:$0xff] }
 0x49f   :  { %7851 = vmatprep.subr.bf16.mxu1 %v9394_v8  ;;  %v4418_v7 = vld [vmem:[#allocation9 + $0x6f0] sm:$0xff]  ;;  %v4415_v8 = vld [vmem:[#allocation9 + $0x6d8] sm:$0xff] }
 0x4a0   :  { %v9448_v9 = vcombine.high %v4414_v5, %v4418_v7  ;;  %v9447_v15 = vcombine.low %v4414_v5, %v4418_v7  ;;  %v9449_v17 = vcombine.low %v4415_v8, %v4419_v43  ;;  %v4463_v5 = vld [vmem:[#allocation9 + $0x858] sm:$0xff] }
 0x4a1   :  { %7688 = vmatpush1.bf16.msra.mxu0 %v9391_v10  ;;  %v9450_v10 = vcombine.high %v4415_v8, %v4419_v43  ;;  %v4467_v7 = vld [vmem:[#allocation9 + $0x878] sm:$0xff] }
 0x4a2   :  { %7852 = vmatpush1.bf16.msra.mxu1 %v9393_v25  ;;  %7689 = vmatprep.subr.bf16.mxu0 %v9400_v12  ;;  %v4422_v25 = vld [vmem:[#allocation9 + $0x710] sm:$0xff] }
 0x4a3   :  { %7853 = vmatprep.subr.bf16.mxu1 %v9402_v13  ;;  %v4426_v12 = vld [vmem:[#allocation9 + $0x730] sm:$0xff]  ;;  %v4423_v13 = vld [vmem:[#allocation9 + $0x718] sm:$0xff] }
 0x4a4   :  { %v9456_v51 = vcombine.high %v4422_v25, %v4426_v12  ;;  %v9455_v34 = vcombine.low %v4422_v25, %v4426_v12  ;;  %v9457_v0 = vcombine.low %v4423_v13, %v4427_v21  ;;  %v4475_v25 = vld [vmem:[#allocation9 + $0x8b8] sm:$0xff] }
 0x4a5   :  { %7690 = vmatpush1.bf16.msra.mxu0 %v9399_v22  ;;  %v9458_v22 = vcombine.high %v4423_v13, %v4427_v21  ;;  %v9497_v13 = vcombine.low %v4463_v5, %v4467_v7 }
 0x4a6   :  { %7854 = vmatpush1.bf16.msra.mxu1 %v9401_v24  ;;  %7691 = vmatprep.subr.bf16.mxu0 %v9408_v33  ;;  %v4430_v24 = vld [vmem:[#allocation9 + $0x750] sm:$0xff] }
 0x4a7   :  { %7855 = vmatprep.subr.bf16.mxu1 %v9410_v14  ;;  %v4434_v33 = vld [vmem:[#allocation9 + $0x770] sm:$0xff]  ;;  %v4431_v14 = vld [vmem:[#allocation9 + $0x758] sm:$0xff] }
 0x4a8   :  { %v9464_v35 = vcombine.high %v4430_v24, %v4434_v33  ;;  %v9463_v38 = vcombine.low %v4430_v24, %v4434_v33  ;;  %v9465_v40 = vcombine.low %v4431_v14, %v4435_v54  ;;  %v4483_v24 = vld [vmem:[#allocation9 + $0x8f8] sm:$0xff] }
 0x4a9   :  { %7692 = vmatpush1.bf16.msra.mxu0 %v9407_v6  ;;  %v9466_v6 = vcombine.high %v4431_v14, %v4435_v54 }
 0x4aa   :  { %7856 = vmatpush1.bf16.msra.mxu1 %v9409_v28  ;;  %7693 = vmatprep.subr.bf16.mxu0 %v9416_v36  ;;  %v4438_v28 = vld [vmem:[#allocation9 + $0x790] sm:$0xff] }
 0x4ab   :  { %7857 = vmatprep.subr.bf16.mxu1 %v9418_v42  ;;  %v4442_v36 = vld [vmem:[#allocation9 + $0x7b0] sm:$0xff]  ;;  %v4439_v42 = vld [vmem:[#allocation9 + $0x798] sm:$0xff] }
 0x4ac   :  { %v9472_v45 = vcombine.high %v4438_v28, %v4442_v36  ;;  %v9471_v52 = vcombine.low %v4438_v28, %v4442_v36  ;;  %v9473_v53 = vcombine.low %v4439_v42, %v4443_v37 }
 0x4ad   :  { %7694 = vmatpush1.bf16.msra.mxu0 %v9415_v46  ;;  %v9474_v46 = vcombine.high %v4439_v42, %v4443_v37  ;;  %v4494_v37 = vld [vmem:[#allocation9 + $0x950] sm:$0xff] }
 0x4ae   :  { %7858 = vmatpush1.bf16.msra.mxu1 %v9417_v20  ;;  %7695 = vmatprep.subr.bf16.mxu0 %v9424_v50  ;;  %v4446_v20 = vld [vmem:[#allocation9 + $0x7d0] sm:$0xff] }
 0x4af   :  { %7859 = vmatprep.subr.bf16.mxu1 %v9426_v48  ;;  %v4450_v50 = vld [vmem:[#allocation9 + $0x7f0] sm:$0xff]  ;;  %v4447_v48 = vld [vmem:[#allocation9 + $0x7d8] sm:$0xff] }
 0x4b0   :  { %v9480_v56 = vcombine.high %v4446_v20, %v4450_v50  ;;  %v9479_v16 = vcombine.low %v4446_v20, %v4450_v50  ;;  %v9481_v2 = vcombine.low %v4447_v48, %v4451_v49 }
 0x4b1   :  { %7696 = vmatpush1.bf16.msra.mxu0 %v9423_v27  ;;  %v9482_v27 = vcombine.high %v4447_v48, %v4451_v49  ;;  %v4502_v49 = vld [vmem:[#allocation9 + $0x990] sm:$0xff] }
 0x4b2   :  { %7860 = vmatpush1.bf16.msra.mxu1 %v9425_v59  ;;  %7697 = vmatprep.subr.bf16.mxu0 %v9432_v60  ;;  %v4454_v59 = vld [vmem:[#allocation9 + $0x810] sm:$0xff] }
 0x4b3   :  { %7861 = vmatprep.subr.bf16.mxu1 %v9434_v1  ;;  %v4458_v60 = vld [vmem:[#allocation9 + $0x830] sm:$0xff]  ;;  %v4455_v1 = vld [vmem:[#allocation9 + $0x818] sm:$0xff] }
 0x4b4   :  { %v9488_v3 = vcombine.high %v4454_v59, %v4458_v60  ;;  %v9489_v8 = vcombine.low %v4455_v1, %v4459_v58 }
 0x4b5   :  { %7698 = vmatpush1.bf16.msra.mxu0 %v9431_v23  ;;  %v9490_v23 = vcombine.high %v4455_v1, %v4459_v58  ;;  %v4510_v58 = vld [vmem:[#allocation9 + $0x9d0] sm:$0xff] }
 0x4b6   :  { %7862 = vmatpush1.bf16.msra.mxu1 %v9433_v47  ;;  %7699 = vmatprep.subr.bf16.mxu0 %v9440_v4  ;;  %v4462_v47 = vld [vmem:[#allocation9 + $0x850] sm:$0xff] }
 0x4b7   :  { %7863 = vmatprep.subr.bf16.mxu1 %v9442_v61  ;;  %v4466_v4 = vld [vmem:[#allocation9 + $0x870] sm:$0xff]  ;;  %v9487_v61 = vcombine.low %v4454_v59, %v4458_v60 }
 0x4b8   :  { %v9496_v43 = vcombine.high %v4462_v47, %v4466_v4  ;;  %v9495_v12 = vcombine.low %v4462_v47, %v4466_v4 }
 0x4b9   :  { %7700 = vmatpush1.bf16.msra.mxu0 %v9439_v30  ;;  %v4470_v30 = vld [vmem:[#allocation9 + $0x890] sm:$0xff] }
 0x4ba   :  { %7864 = vmatpush1.bf16.msra.mxu1 %v9441_v62  ;;  %7701 = vmatprep.subr.bf16.mxu0 %v9448_v9  ;;  %v4474_v62 = vld [vmem:[#allocation9 + $0x8b0] sm:$0xff]  ;;  %v9498_v9 = vcombine.high %v4463_v5, %v4467_v7 }
 0x4bb   :  { %7865 = vmatprep.subr.bf16.mxu1 %v9450_v10  ;;  %v4471_v10 = vld [vmem:[#allocation9 + $0x898] sm:$0xff]  ;;  %v9504_v21 = vcombine.high %v4470_v30, %v4474_v62  ;;  %v9503_v33 = vcombine.low %v4470_v30, %v4474_v62  ;;  %v4518_v5 = vld [vmem:[#allocation9 + $0xa10] sm:$0xff] }
 0x4bc   :  { %v4522_v7 = vld [vmem:[#allocation9 + $0xa30] sm:$0xff] }
 0x4bd   :  { %7702 = vmatpush1.bf16.msra.mxu0 %v9447_v15  ;;  %v9506_v15 = vcombine.high %v4471_v10, %v4475_v25 }
 0x4be   :  { %7866 = vmatpush1.bf16.msra.mxu1 %v9449_v17  ;;  %7703 = vmatprep.subr.bf16.mxu0 %v9456_v51  ;;  %v4478_v17 = vld [vmem:[#allocation9 + $0x8d0] sm:$0xff] }
 0x4bf   :  { %7867 = vmatprep.subr.bf16.mxu1 %v9458_v22  ;;  %v4482_v51 = vld [vmem:[#allocation9 + $0x8f0] sm:$0xff]  ;;  %v4479_v22 = vld [vmem:[#allocation9 + $0x8d8] sm:$0xff] }
 0x4c0   :  { %v9512_v14 = vcombine.high %v4478_v17, %v4482_v51  ;;  %v9514_v54 = vcombine.high %v4479_v22, %v4483_v24  ;;  %v9513_v28 = vcombine.low %v4479_v22, %v4483_v24  ;;  %v4534_v24 = vld [vmem:[#allocation9 + $0xa90] sm:$0xff] }
 0x4c1   :  { %7704 = vmatpush1.bf16.msra.mxu0 %v9455_v34  ;;  %v4486_v34 = vld [vmem:[#allocation9 + $0x910] sm:$0xff] }
 0x4c2   :  { %7868 = vmatpush1.bf16.msra.mxu1 %v9457_v0  ;;  %7705 = vmatprep.subr.bf16.mxu0 %v9464_v35  ;;  %v4490_v0 = vld [vmem:[#allocation9 + $0x930] sm:$0xff]  ;;  %v4487_v35 = vld [vmem:[#allocation9 + $0x918] sm:$0xff] }
 0x4c3   :  { %7869 = vmatprep.subr.bf16.mxu1 %v9466_v6  ;;  %v4491_v6 = vld [vmem:[#allocation9 + $0x938] sm:$0xff]  ;;  %v9520_v36 = vcombine.high %v4486_v34, %v4490_v0 }
 0x4c4   :  { %v9522_v42 = vcombine.high %v4487_v35, %v4491_v6  ;;  %v9521_v20 = vcombine.low %v4487_v35, %v4491_v6  ;;  %v4542_v6 = vld [vmem:[#allocation9 + $0xad0] sm:$0xff] }
 0x4c5   :  { %7706 = vmatpush1.bf16.msra.mxu0 %v9463_v38  ;;  %v4498_v38 = vld [vmem:[#allocation9 + $0x970] sm:$0xff] }
 0x4c6   :  { %7870 = vmatpush1.bf16.msra.mxu1 %v9465_v40  ;;  %7707 = vmatprep.subr.bf16.mxu0 %v9472_v45  ;;  %v4495_v40 = vld [vmem:[#allocation9 + $0x958] sm:$0xff]  ;;  %v9528_v50 = vcombine.high %v4494_v37, %v4498_v38 }
 0x4c7   :  { %7871 = vmatprep.subr.bf16.mxu1 %v9474_v46  ;;  %v4499_v45 = vld [vmem:[#allocation9 + $0x978] sm:$0xff]  ;;  %v9519_v46 = vcombine.low %v4486_v34, %v4490_v0 }
 0x4c8   :  { %v9530_v48 = vcombine.high %v4495_v40, %v4499_v45  ;;  %v9529_v59 = vcombine.low %v4495_v40, %v4499_v45  ;;  %v4550_v45 = vld [vmem:[#allocation9 + $0xb10] sm:$0xff] }
 0x4c9   :  { %7708 = vmatpush1.bf16.msra.mxu0 %v9471_v52  ;;  %v4506_v52 = vld [vmem:[#allocation9 + $0x9b0] sm:$0xff] }
 0x4ca   :  { %7872 = vmatpush1.bf16.msra.mxu1 %v9473_v53  ;;  %7709 = vmatprep.subr.bf16.mxu0 %v9480_v56  ;;  %v4503_v53 = vld [vmem:[#allocation9 + $0x998] sm:$0xff]  ;;  %v9536_v60 = vcombine.high %v4502_v49, %v4506_v52 }
 0x4cb   :  { %7873 = vmatprep.subr.bf16.mxu1 %v9482_v27  ;;  %v4507_v56 = vld [vmem:[#allocation9 + $0x9b8] sm:$0xff]  ;;  %v9527_v27 = vcombine.low %v4494_v37, %v4498_v38 }
 0x4cc   :  { %v9538_v1 = vcombine.high %v4503_v53, %v4507_v56  ;;  %v9537_v47 = vcombine.low %v4503_v53, %v4507_v56  ;;  %v4558_v56 = vld [vmem:[#allocation9 + $0xb50] sm:$0xff] }
 0x4cd   :  { %7710 = vmatpush1.bf16.msra.mxu0 %v9479_v16  ;;  %v4514_v16 = vld [vmem:[#allocation9 + $0x9f0] sm:$0xff] }
 0x4ce   :  { %7874 = vmatpush1.bf16.msra.mxu1 %v9481_v2  ;;  %7720 = vmatprep.subr.bf16.mxu0 %v9488_v3  ;;  %v4511_v2 = vld [vmem:[#allocation9 + $0x9d8] sm:$0xff]  ;;  %v9544_v4 = vcombine.high %v4510_v58, %v4514_v16  ;;  %v9543_v30 = vcombine.low %v4510_v58, %v4514_v16 }
 0x4cf   :  { %7884 = vmatprep.subr.bf16.mxu1 %v9490_v23  ;;  %v4515_v3 = vld [vmem:[#allocation9 + $0x9f8] sm:$0xff]  ;;  %v9535_v23 = vcombine.low %v4502_v49, %v4506_v52 }
 0x4d0   :  { %7712 = vmatmul.mubr.bf16.vlgmr.msra.gmra.mrb[20].mxu0 %v10598_v39  ;;  %v9545_v62 = vcombine.low %v4511_v2, %v4515_v3 }
 0x4d1   :  { %7876 = vmatmul.mubr.bf16.vlgmr.msra.gmra.mrb[20].mxu1 %v10598_v39  ;;  %7721 = vmatpush1.bf16.msra.mxu0 %v9487_v61  ;;  %v9505_v39 = vcombine.low %v4471_v10, %v4475_v25  ;;  %v9546_v61 = vcombine.high %v4511_v2, %v4515_v3  ;;  %v4526_v25 = vld [vmem:[#allocation9 + $0xa50] sm:$0xff] }
 0x4d2   :  { %7752 = vmatprep.mubr.bf16.mxu0 %v10612_v63  ;;  %7885 = vmatpush1.bf16.msra.mxu1 %v9489_v8  ;;  %v4519_v8 = vld [vmem:[#allocation9 + $0xa18] sm:$0xff]  ;;  %v4566_v3 = vld [vmem:[#allocation9 + $0xb90] sm:$0xff] }
 0x4d3   :  { %7916 = vmatprep.mubr.bf16.mxu1 %v10612_v63  ;;  %7722 = vmatprep.subr.bf16.mxu0 %v9496_v43  ;;  %v9511_v63 = vcombine.low %v4478_v17, %v4482_v51  ;;  %v4523_v43 = vld [vmem:[#allocation9 + $0xa38] sm:$0xff] }
 0x4d4   :  { %7886 = vmatprep.subr.bf16.mxu1 %v9498_v9  ;;  %v9552_v9 = vcombine.high %v4518_v5, %v4522_v7  ;;  %v9554_v10 = vcombine.high %v4519_v8, %v4523_v43  ;;  %v9553_v17 = vcombine.low %v4519_v8, %v4523_v43  ;;  %v4574_v43 = vld [vmem:[#allocation9 + $0xbd0] sm:$0xff] }
 0x4d5   :  { %7723 = vmatpush1.bf16.msra.mxu0 %v9495_v12  ;;  %v4530_v12 = vld [vmem:[#allocation9 + $0xa70] sm:$0xff] }
 0x4d6   :  { %7887 = vmatpush1.bf16.msra.mxu1 %v9497_v13  ;;  %7724 = vmatprep.subr.bf16.mxu0 %v9504_v21  ;;  %v4527_v13 = vld [vmem:[#allocation9 + $0xa58] sm:$0xff]  ;;  %v9560_v51 = vcombine.high %v4526_v25, %v4530_v12 }
 0x4d7   :  { %7888 = vmatprep.subr.bf16.mxu1 %v9506_v15  ;;  %v4531_v21 = vld [vmem:[#allocation9 + $0xa78] sm:$0xff]  ;;  %v9551_v15 = vcombine.low %v4518_v5, %v4522_v7 }
 0x4d8   :  { %v9562_v22 = vcombine.high %v4527_v13, %v4531_v21  ;;  %v9561_v34 = vcombine.low %v4527_v13, %v4531_v21  ;;  %v4582_v21 = vld [vmem:[#allocation9 + $0xc10] sm:$0xff] }
 0x4d9   :  { %7725 = vmatpush1.bf16.msra.mxu0 %v9503_v33  ;;  %v4538_v33 = vld [vmem:[#allocation9 + $0xab0] sm:$0xff] }
 0x4da   :  { %7889 = vmatpush1.bf16.msra.mxu1 %v9505_v39  ;;  %7726 = vmatprep.subr.bf16.mxu0 %v9512_v14  ;;  %v4535_v39 = vld [vmem:[#allocation9 + $0xa98] sm:$0xff]  ;;  %v9568_v0 = vcombine.high %v4534_v24, %v4538_v33 }
 0x4db   :  { %7890 = vmatprep.subr.bf16.mxu1 %v9514_v54  ;;  %v4539_v14 = vld [vmem:[#allocation9 + $0xab8] sm:$0xff]  ;;  %v9559_v54 = vcombine.low %v4526_v25, %v4530_v12 }
 0x4dc   :  { %v9570_v35 = vcombine.high %v4535_v39, %v4539_v14  ;;  %v9569_v37 = vcombine.low %v4535_v39, %v4539_v14  ;;  %v4590_v14 = vld [vmem:[#allocation9 + $0xc50] sm:$0xff] }
 0x4dd   :  { %7727 = vmatpush1.bf16.msra.mxu0 %v9511_v63  ;;  %v4546_v63 = vld [vmem:[#allocation9 + $0xaf0] sm:$0xff] }
 0x4de   :  { %7891 = vmatpush1.bf16.msra.mxu1 %v9513_v28  ;;  %7728 = vmatprep.subr.bf16.mxu0 %v9520_v36  ;;  %v4543_v28 = vld [vmem:[#allocation9 + $0xad8] sm:$0xff]  ;;  %v9576_v38 = vcombine.high %v4542_v6, %v4546_v63 }
 0x4df   :  { %7892 = vmatprep.subr.bf16.mxu1 %v9522_v42  ;;  %v4547_v36 = vld [vmem:[#allocation9 + $0xaf8] sm:$0xff]  ;;  %v9567_v42 = vcombine.low %v4534_v24, %v4538_v33 }
 0x4e0   :  { %v9578_v40 = vcombine.high %v4543_v28, %v4547_v36  ;;  %v9577_v49 = vcombine.low %v4543_v28, %v4547_v36  ;;  %v4598_v28 = vld [vmem:[#allocation9 + $0xc90] sm:$0xff] }
 0x4e1   :  { %7729 = vmatpush1.bf16.msra.mxu0 %v9519_v46  ;;  %v4554_v46 = vld [vmem:[#allocation9 + $0xb30] sm:$0xff] }
 0x4e2   :  { %7893 = vmatpush1.bf16.msra.mxu1 %v9521_v20  ;;  %7730 = vmatprep.subr.bf16.mxu0 %v9528_v50  ;;  %v4551_v20 = vld [vmem:[#allocation9 + $0xb18] sm:$0xff]  ;;  %v9584_v52 = vcombine.high %v4550_v45, %v4554_v46  ;;  %v4602_v36 = vld [vmem:[#allocation9 + $0xcb0] sm:$0xff] }
 0x4e3   :  { %7894 = vmatprep.subr.bf16.mxu1 %v9530_v48  ;;  %v4555_v50 = vld [vmem:[#allocation9 + $0xb38] sm:$0xff]  ;;  %v9575_v48 = vcombine.low %v4542_v6, %v4546_v63 }
 0x4e4   :  { %v9586_v53 = vcombine.high %v4551_v20, %v4555_v50  ;;  %v9585_v58 = vcombine.low %v4551_v20, %v4555_v50  ;;  %v4606_v50 = vld [vmem:[#allocation9 + $0xcd0] sm:$0xff] }
 0x4e5   :  { %7731 = vmatpush1.bf16.msra.mxu0 %v9527_v27  ;;  %v4562_v27 = vld [vmem:[#allocation9 + $0xb70] sm:$0xff] }
 0x4e6   :  { %7895 = vmatpush1.bf16.msra.mxu1 %v9529_v59  ;;  %7732 = vmatprep.subr.bf16.mxu0 %v9536_v60  ;;  %v4559_v59 = vld [vmem:[#allocation9 + $0xb58] sm:$0xff]  ;;  %v9592_v16 = vcombine.high %v4558_v56, %v4562_v27 }
 0x4e7   :  { %7896 = vmatprep.subr.bf16.mxu1 %v9538_v1  ;;  %v4563_v60 = vld [vmem:[#allocation9 + $0xb78] sm:$0xff]  ;;  %v9583_v1 = vcombine.low %v4550_v45, %v4554_v46  ;;  %v9632_v46 = vcombine.high %v4598_v28, %v4602_v36 }
 0x4e8   :  { %v9594_v2 = vcombine.high %v4559_v59, %v4563_v60  ;;  %v9593_v5 = vcombine.low %v4559_v59, %v4563_v60  ;;  %v4614_v59 = vld [vmem:[#allocation9 + $0xd10] sm:$0xff] }
 0x4e9   :  { %7733 = vmatpush1.bf16.msra.mxu0 %v9535_v23  ;;  %v4570_v23 = vld [vmem:[#allocation9 + $0xbb0] sm:$0xff] }
 0x4ea   :  { %7897 = vmatpush1.bf16.msra.mxu1 %v9537_v47  ;;  %7734 = vmatprep.subr.bf16.mxu0 %v9544_v4  ;;  %v4567_v47 = vld [vmem:[#allocation9 + $0xb98] sm:$0xff]  ;;  %v9600_v7 = vcombine.high %v4566_v3, %v4570_v23  ;;  %v4618_v60 = vld [vmem:[#allocation9 + $0xd30] sm:$0xff] }
 0x4eb   :  { %7898 = vmatprep.subr.bf16.mxu1 %v9546_v61  ;;  %v4571_v4 = vld [vmem:[#allocation9 + $0xbb8] sm:$0xff]  ;;  %v9591_v61 = vcombine.low %v4558_v56, %v4562_v27 }
 0x4ec   :  { %v9602_v8 = vcombine.high %v4567_v47, %v4571_v4  ;;  %v9601_v25 = vcombine.low %v4567_v47, %v4571_v4  ;;  %v4626_v47 = vld [vmem:[#allocation9 + $0xd70] sm:$0xff]  ;;  %v4623_v4 = vld [vmem:[#allocation9 + $0xd58] sm:$0xff] }
 0x4ed   :  { %7735 = vmatpush1.bf16.msra.mxu0 %v9543_v30  ;;  %v4578_v30 = vld [vmem:[#allocation9 + $0xbf0] sm:$0xff] }
 0x4ee   :  { %7899 = vmatpush1.bf16.msra.mxu1 %v9545_v62  ;;  %7736 = vmatprep.subr.bf16.mxu0 %v9552_v9  ;;  %v4575_v62 = vld [vmem:[#allocation9 + $0xbd8] sm:$0xff]  ;;  %v9608_v12 = vcombine.high %v4574_v43, %v4578_v30 }
 0x4ef   :  { %7900 = vmatprep.subr.bf16.mxu1 %v9554_v10  ;;  %v4579_v9 = vld [vmem:[#allocation9 + $0xbf8] sm:$0xff]  ;;  %v9599_v10 = vcombine.low %v4566_v3, %v4570_v23  ;;  %v4622_v23 = vld [vmem:[#allocation9 + $0xd50] sm:$0xff] }
 0x4f0   :  { %v9610_v13 = vcombine.high %v4575_v62, %v4579_v9  ;;  %v9609_v24 = vcombine.low %v4575_v62, %v4579_v9  ;;  %v4634_v62 = vld [vmem:[#allocation9 + $0xdb0] sm:$0xff]  ;;  %v4631_v9 = vld [vmem:[#allocation9 + $0xd98] sm:$0xff] }
 0x4f1   :  { %7737 = vmatpush1.bf16.msra.mxu0 %v9551_v15  ;;  %v4586_v15 = vld [vmem:[#allocation9 + $0xc30] sm:$0xff] }
 0x4f2   :  { %7901 = vmatpush1.bf16.msra.mxu1 %v9553_v17  ;;  %7738 = vmatprep.subr.bf16.mxu0 %v9560_v51  ;;  %v4583_v17 = vld [vmem:[#allocation9 + $0xc18] sm:$0xff]  ;;  %v9616_v33 = vcombine.high %v4582_v21, %v4586_v15 }
 0x4f3   :  { %7902 = vmatprep.subr.bf16.mxu1 %v9562_v22  ;;  %v4587_v51 = vld [vmem:[#allocation9 + $0xc38] sm:$0xff]  ;;  %v9607_v22 = vcombine.low %v4574_v43, %v4578_v30  ;;  %v4630_v30 = vld [vmem:[#allocation9 + $0xd90] sm:$0xff] }
 0x4f4   :  { %v9618_v39 = vcombine.high %v4583_v17, %v4587_v51  ;;  %v9617_v6 = vcombine.low %v4583_v17, %v4587_v51  ;;  %v4638_v51 = vld [vmem:[#allocation9 + $0xdd0] sm:$0xff] }
 0x4f5   :  { %7739 = vmatpush1.bf16.msra.mxu0 %v9559_v54  ;;  %v4594_v54 = vld [vmem:[#allocation9 + $0xc70] sm:$0xff] }
 0x4f6   :  { %7903 = vmatpush1.bf16.msra.mxu1 %v9561_v34  ;;  %7740 = vmatprep.subr.bf16.mxu0 %v9568_v0  ;;  %v9615_v34 = vcombine.low %v4582_v21, %v4586_v15  ;;  %v4591_v0 = vld [vmem:[#allocation9 + $0xc58] sm:$0xff]  ;;  %v9624_v63 = vcombine.high %v4590_v14, %v4594_v54 }
 0x4f7   :  { %7904 = vmatprep.subr.bf16.mxu1 %v9570_v35  ;;  %v4595_v35 = vld [vmem:[#allocation9 + $0xc78] sm:$0xff] }
 0x4f8   :  { %v9625_v45 = vcombine.low %v4591_v0, %v4595_v35 }
 0x4f9   :  { %7741 = vmatpush1.bf16.msra.mxu0 %v9567_v42  ;;  %v9626_v42 = vcombine.high %v4591_v0, %v4595_v35  ;;  %v9663_v0 = vcombine.low %v4630_v30, %v4634_v62 }
 0x4fa   :  { %7905 = vmatpush1.bf16.msra.mxu1 %v9569_v37  ;;  %7742 = vmatprep.subr.bf16.mxu0 %v9576_v38  ;;  %v4599_v37 = vld [vmem:[#allocation9 + $0xc98] sm:$0xff] }
 0x4fb   :  { %7906 = vmatprep.subr.bf16.mxu1 %v9578_v40  ;;  %v4603_v38 = vld [vmem:[#allocation9 + $0xcb8] sm:$0xff]  ;;  %v9623_v40 = vcombine.low %v4590_v14, %v4594_v54 }
 0x4fc   :  { %v9634_v20 = vcombine.high %v4599_v37, %v4603_v38  ;;  %v4643_v14 = vld [vmem:[#allocation9 + $0xdf8] sm:$0xff] }
 0x4fd   :  { %7743 = vmatpush1.bf16.msra.mxu0 %v9575_v48  ;;  %v4610_v48 = vld [vmem:[#allocation9 + $0xcf0] sm:$0xff] }
 0x4fe   :  { %7907 = vmatpush1.bf16.msra.mxu1 %v9577_v49  ;;  %7744 = vmatprep.subr.bf16.mxu0 %v9584_v52  ;;  %v4607_v49 = vld [vmem:[#allocation9 + $0xcd8] sm:$0xff]  ;;  %v9640_v56 = vcombine.high %v4606_v50, %v4610_v48 }
 0x4ff   :  { %7908 = vmatprep.subr.bf16.mxu1 %v9586_v53  ;;  %v4611_v52 = vld [vmem:[#allocation9 + $0xcf8] sm:$0xff]  ;;  %v9631_v53 = vcombine.low %v4598_v28, %v4602_v36 }
 0x500   :  { %v9642_v27 = vcombine.high %v4607_v49, %v4611_v52 }
 0x501   :  { %7745 = vmatpush1.bf16.msra.mxu0 %v9583_v1  ;;  %v4615_v1 = vld [vmem:[#allocation9 + $0xd18] sm:$0xff] }
 0x502   :  { %7909 = vmatpush1.bf16.msra.mxu1 %v9585_v58  ;;  %7746 = vmatprep.subr.bf16.mxu0 %v9592_v16  ;;  %v4619_v58 = vld [vmem:[#allocation9 + $0xd38] sm:$0xff]  ;;  %v9641_v16 = vcombine.low %v4607_v49, %v4611_v52  ;;  %v4658_v49 = vld [vmem:[#allocation9 + $0xe70] sm:$0xff] }
 0x503   :  { %7910 = vmatprep.subr.bf16.mxu1 %v9594_v2  ;;  %v9648_v2 = vcombine.high %v4614_v59, %v4618_v60  ;;  %v9650_v3 = vcombine.high %v4615_v1, %v4619_v58  ;;  %v4655_v52 = vld [vmem:[#allocation9 + $0xe58] sm:$0xff] }
 0x505   :  { %7747 = vmatpush1.bf16.msra.mxu0 %v9591_v61  ;;  %v4627_v61 = vld [vmem:[#allocation9 + $0xd78] sm:$0xff] }
 0x506   :  { %7911 = vmatpush1.bf16.msra.mxu1 %v9593_v5  ;;  %7748 = vmatprep.subr.bf16.mxu0 %v9600_v7  ;;  %v9647_v5 = vcombine.low %v4614_v59, %v4618_v60  ;;  %v9649_v7 = vcombine.low %v4615_v1, %v4619_v58  ;;  %v9658_v43 = vcombine.high %v4623_v4, %v4627_v61  ;;  %v4662_v60 = vld [vmem:[#allocation9 + $0xe90] sm:$0xff]  ;;  %v4663_v58 = vld [vmem:[#allocation9 + $0xe98] sm:$0xff] }
 0x507   :  { %7912 = vmatprep.subr.bf16.mxu1 %v9602_v8  ;;  %v9656_v8 = vcombine.high %v4622_v23, %v4626_v47  ;;  %v4666_v1 = vld [vmem:[#allocation9 + $0xeb0] sm:$0xff] }
 0x509   :  { %7749 = vmatpush1.bf16.msra.mxu0 %v9599_v10  ;;  %v4635_v10 = vld [vmem:[#allocation9 + $0xdb8] sm:$0xff] }
 0x50a   :  { %7913 = vmatpush1.bf16.msra.mxu1 %v9601_v25  ;;  %7750 = vmatprep.subr.bf16.mxu0 %v9608_v12  ;;  %v9655_v25 = vcombine.low %v4622_v23, %v4626_v47  ;;  %v9657_v12 = vcombine.low %v4623_v4, %v4627_v61  ;;  %v9666_v17 = vcombine.high %v4631_v9, %v4635_v10  ;;  %v4670_v4 = vld [vmem:[#allocation9 + $0xed0] sm:$0xff] }
 0x50b   :  { %7914 = vmatprep.subr.bf16.mxu1 %v9610_v13  ;;  %v9664_v13 = vcombine.high %v4630_v30, %v4634_v62  ;;  %v9696_v23 = vcombine.high %v4662_v60, %v4666_v1  ;;  %v4674_v61 = vld [vmem:[#allocation9 + $0xef0] sm:$0xff]  ;;  %v9695_v30 = vcombine.low %v4662_v60, %v4666_v1 }
 0x50d   :  { %7751 = vmatpush1.bf16.msra.mxu0 %v9607_v22  ;;  %v4642_v22 = vld [vmem:[#allocation9 + $0xdf0] sm:$0xff] }
 0x50e   :  { %7915 = vmatpush1.bf16.msra.mxu1 %v9609_v24  ;;  %7761 = vmatprep.subr.bf16.mxu0 %v9616_v33  ;;  %v9672_v28 = vcombine.high %v4638_v51, %v4642_v22 }
 0x50f   :  { %7925 = vmatprep.subr.bf16.mxu1 %v9618_v39  ;;  %v4639_v39 = vld [vmem:[#allocation9 + $0xdd8] sm:$0xff] }
 0x510   :  { %7753 = vmatmul.mubr.bf16.vlgmr.msra.gmra.mrb[20].mxu0 %v10614_v11  ;;  %v9674_v36 = vcombine.high %v4639_v39, %v4643_v14 }
 0x511   :  { %7917 = vmatmul.mubr.bf16.vlgmr.msra.gmra.mrb[20].mxu1 %v10614_v11  ;;  %7762 = vmatpush1.bf16.msra.mxu0 %v9615_v34  ;;  %v9633_v11 = vcombine.low %v4599_v37, %v4603_v38  ;;  %v4650_v37 = vld [vmem:[#allocation9 + $0xe30] sm:$0xff]  ;;  %v4647_v38 = vld [vmem:[#allocation9 + $0xe18] sm:$0xff] }
 0x512   :  { %7793 = vmatprep.mubr.bf16.mxu0 %v10618_v19  ;;  %7926 = vmatpush1.bf16.msra.mxu1 %v9617_v6 }
 0x513   :  { %7957 = vmatprep.mubr.bf16.mxu1 %v10618_v19  ;;  %7763 = vmatprep.subr.bf16.mxu0 %v9624_v63  ;;  %v9639_v19 = vcombine.low %v4606_v50, %v4610_v48  ;;  %v9665_v63 = vcombine.low %v4631_v9, %v4635_v10  ;;  %v4654_v48 = vld [vmem:[#allocation9 + $0xe50] sm:$0xff]  ;;  %v9704_v9 = vcombine.high %v4670_v4, %v4674_v61 }
 0x514   :  { %7927 = vmatprep.subr.bf16.mxu1 %v9626_v42  ;;  %v4646_v42 = vld [vmem:[#allocation9 + $0xe10] sm:$0xff] }
 0x515   :  { %7764 = vmatpush1.bf16.msra.mxu0 %v9623_v40  ;;  %v4651_v40 = vld [vmem:[#allocation9 + $0xe38] sm:$0xff] }
 0x516   :  { %7928 = vmatpush1.bf16.msra.mxu1 %v9625_v45  ;;  %7765 = vmatprep.subr.bf16.mxu0 %v9632_v46  ;;  %v9671_v45 = vcombine.low %v4638_v51, %v4642_v22  ;;  %v9673_v46 = vcombine.low %v4639_v39, %v4643_v14  ;;  %v9682_v50 = vcombine.high %v4647_v38, %v4651_v40  ;;  %v4683_v51 = vld [vmem:[#allocation9 + $0xf38] sm:$0xff] }
 0x517   :  { %7929 = vmatprep.subr.bf16.mxu1 %v9634_v20  ;;  %v9680_v20 = vcombine.high %v4646_v42, %v4650_v37  ;;  %v9703_v22 = vcombine.low %v4670_v4, %v4674_v61  ;;  %v10017_v4 = vld [vmem:[#allocation12 + $0x40] sm:$0xff]  }
 0x518   :  { %v10018_v61 = vld [vmem:[#allocation12 + $0xc0] sm:$0xff]  }
 0x519   :  { %7766 = vmatpush1.bf16.msra.mxu0 %v9631_v53  ;;  %v4659_v53 = vld [vmem:[#allocation9 + $0xe78] sm:$0xff] }
 0x51a   :  { %7930 = vmatpush1.bf16.msra.mxu1 %v9633_v11  ;;  %7767 = vmatprep.subr.bf16.mxu0 %v9640_v56  ;;  %v9679_v11 = vcombine.low %v4646_v42, %v4650_v37  ;;  %v9681_v56 = vcombine.low %v4647_v38, %v4651_v40  ;;  %v9690_v59 = vcombine.high %v4655_v52, %v4659_v53  ;;  %v4694_v42 = vld [vmem:[#allocation9 + $0xf90] sm:$0xff]  ;;  %v4695_v40 = vld [vmem:[#allocation9 + $0xf98] sm:$0xff] }
 0x51b   :  { %7931 = vmatprep.subr.bf16.mxu1 %v9642_v27  ;;  %v9688_v27 = vcombine.high %v4654_v48, %v4658_v49  ;;  %v4698_v37 = vld [vmem:[#allocation9 + $0xfb0] sm:$0xff] }
 0x51c   :  { %v9727_v60 = vcombine.low %v4694_v42, %v4698_v37 }
 0x51d   :  { %7768 = vmatpush1.bf16.msra.mxu0 %v9639_v19  ;;  %v4667_v19 = vld [vmem:[#allocation9 + $0xeb8] sm:$0xff] }
 0x51e   :  { %7932 = vmatpush1.bf16.msra.mxu1 %v9641_v16  ;;  %7769 = vmatprep.subr.bf16.mxu0 %v9648_v2  ;;  %v10653_v16 = vld [vmem:[#allocation10] sm:$0xff]  ;;  %v9687_v2 = vcombine.low %v4654_v48, %v4658_v49  ;;  %v9698_v47 = vcombine.high %v4663_v58, %v4667_v19  ;;  %v9697_v62 = vcombine.low %v4663_v58, %v4667_v19 }
 0x51f   :  { %7933 = vmatprep.subr.bf16.mxu1 %v9650_v3  ;;  %v9689_v3 = vcombine.low %v4655_v52, %v4659_v53  ;;  %v9728_v48 = vcombine.high %v4694_v42, %v4698_v37  ;;  %v4702_v52 = vld [vmem:[#allocation9 + $0xfd0] sm:$0xff] }
 0x520   :  { %v4706_v53 = vld [vmem:[#allocation9 + $0xff0] sm:$0xff] }
 0x521   :  { %7770 = vmatpush1.bf16.msra.mxu0 %v9647_v5  ;;  %v4717_v5 = vrot.slane %v10653_v16, %v10466_v31  ;;  %v9736_v58 = vcombine.high %v4702_v52, %v4706_v53  ;;  %v10040_v37 = vld [vmem:[#allocation12 + $0xa8] sm:$0xff]  }
 0x522   :  { %7934 = vmatpush1.bf16.msra.mxu1 %v9649_v7  ;;  %7771 = vmatprep.subr.bf16.mxu0 %v9656_v8  ;;  %v4671_v7 = vld [vmem:[#allocation9 + $0xed8] sm:$0xff] }
 0x523   :  { %v10645_v21 = vpop.f32.mrb[16].mxu0  ;;  %v10647_v15 = vpop.f32.mrb[16].mxu1  ;;  %7935 = vmatprep.subr.bf16.mxu1 %v9658_v43  ;;  %v4675_v8 = vld [vmem:[#allocation9 + $0xef8] sm:$0xff]  ;;  %v4725_v43 = vrot.slane %v10653_v16, %v10469_v32 }
 0x524   :  { %v10649_v24 = vpop.f32.mrb[17].mxu0  ;;  %v10651_v33 = vpop.f32.mrb[17].mxu1  ;;  %v9706_v10 = vcombine.high %v4671_v7, %v4675_v8  ;;  %v9705_v32 = vcombine.low %v4671_v7, %v4675_v8  ;;  %v10019_v8 = vld [vmem:[#allocation12] sm:$0xff]  }
 0x525   :  { %v7471_v54 = vpop.f32.mrb[18].mxu0  ;;  %v7635_v34 = vpop.f32.mrb[18].mxu1  ;;  %7772 = vmatpush1.bf16.msra.mxu0 %v9655_v25  ;;  %v4678_v25 = vld [vmem:[#allocation9 + $0xf10] sm:$0xff]  ;;  %v9903_v31 = vadd.f32 %v10651_v33, %v4725_v43  ;;  %v10020_v43 = vld [vmem:[#allocation12 + $0x80] sm:$0xff]  }
 0x526   :  { %7936 = vmatpush1.bf16.msra.mxu1 %v9657_v12  ;;  %v7472_v35 = vpop.f32.mrb[19].mxu0  ;;  %v7636_v6 = vpop.f32.mrb[19].mxu1  ;;  %7773 = vmatprep.subr.bf16.mxu0 %v9664_v13  ;;  %v4682_v12 = vld [vmem:[#allocation9 + $0xf30] sm:$0xff]  ;;  %v9901_v13 = vadd.f32 %v10649_v24, %v4717_v5 }
 0x527   :  { %7937 = vmatprep.subr.bf16.mxu1 %v9666_v17  ;;  %v4679_v17 = vld [vmem:[#allocation9 + $0xf18] sm:$0xff]  ;;  %v9712_v39 = vcombine.high %v4678_v25, %v4682_v12  ;;  %v4686_v54 = vld [vmem:[#allocation9 + $0xf50] sm:$0xff]  ;;  %v9711_v24 = vcombine.low %v4678_v25, %v4682_v12  ;;  %v4713_v12 = vrot.slane %v10653_v16, %v10461_v29 }
 0x528   :  { %v9714_v14 = vcombine.high %v4679_v17, %v4683_v51  ;;  %v4690_v34 = vld [vmem:[#allocation9 + $0xf70] sm:$0xff]  ;;  %v4687_v35 = vld [vmem:[#allocation9 + $0xf58] sm:$0xff] }
 0x529   :  { %7774 = vmatpush1.bf16.msra.mxu0 %v9663_v0  ;;  %v7967_v0 = vadd.f32 3.0, %v9901_v13  ;;  %v4691_v6 = vld [vmem:[#allocation9 + $0xf78] sm:$0xff]  ;;  %v9720_v33 = vcombine.high %v4686_v54, %v4690_v34  ;;  %v10023_v25 = vld [vmem:[#allocation12 + $0x8] sm:$0xff]  }
 0x52a   :  { %7938 = vmatpush1.bf16.msra.mxu1 %v9665_v63  ;;  %7775 = vmatprep.subr.bf16.mxu0 %v9672_v28  ;;  %v7969_v63 = vadd.f32 3.0, %v9903_v31  ;;  %v9713_v28 = vcombine.low %v4679_v17, %v4683_v51  ;;  %v10025_v17 = vld [vmem:[#allocation12 + $0x50] sm:$0xff]   ;;  %v4721_v51 = vrot.slane %v10653_v16, %v10496_v44  ;;  %v10032_v44 = vld [vmem:[#allocation12 + $0x98] sm:$0xff]  }
 0x52b   :  { %7939 = vmatprep.subr.bf16.mxu1 %v9674_v36  ;;  %v9722_v36 = vcombine.high %v4687_v35, %v4691_v6  ;;  %v7975_v38 = vmax.f32 %v7967_v0, 0.0  ;;  %v10033_v0 = vld [vmem:[#allocation12 + $0x60] sm:$0xff]  }
 0x52c   :  { %v9902_v29 = vadd.f32 %v10647_v15, %v4721_v51  ;;  %v10070_v51 = vld [vmem:[#allocation12 + $0x1e8] sm:$0xff]  }
 0x52d   :  { %7776 = vmatpush1.bf16.msra.mxu0 %v9671_v45  ;;  %v4699_v45 = vld [vmem:[#allocation9 + $0xfb8] sm:$0xff] }
 0x52e   :  { %7940 = vmatpush1.bf16.msra.mxu1 %v9673_v46  ;;  %7777 = vmatprep.subr.bf16.mxu0 %v9680_v20  ;;  %v7977_v46 = vmax.f32 %v7969_v63, 0.0  ;;  %v9719_v20 = vcombine.low %v4686_v54, %v4690_v34  ;;  %v9730_v49 = vcombine.high %v4695_v40, %v4699_v45  ;;  %v9729_v1 = vcombine.low %v4695_v40, %v4699_v45  ;;  %v10031_v54 = vld [vmem:[#allocation12 + $0x18] sm:$0xff]   ;;  %v10042_v45 = vld [vmem:[#allocation12 + $0xf0] sm:$0xff]  }
 0x52f   :  { %7941 = vmatprep.subr.bf16.mxu1 %v9682_v50  ;;  %v9721_v50 = vcombine.low %v4687_v35, %v4691_v6  ;;  %v7968_v35 = vadd.f32 3.0, %v9902_v29  ;;  %v10034_v6 = vld [vmem:[#allocation12 + $0xe0] sm:$0xff]  }
 0x531   :  { %7778 = vmatpush1.bf16.msra.mxu0 %v9679_v11  ;;  %v7983_v11 = vmin.f32 %v7975_v38, 6.0  ;;  %v7976_v15 = vmax.f32 %v7968_v35, 0.0  ;;  %v10041_v38 = vld [vmem:[#allocation12 + $0x70] sm:$0xff]   ;;  %v4737_v35 = vrot.slane %v10653_v16, %v10540_v18 }
 0x532   :  { %7942 = vmatpush1.bf16.msra.mxu1 %v9681_v56  ;;  %7779 = vmatprep.subr.bf16.mxu0 %v9688_v27  ;;  %v4703_v56 = vld [vmem:[#allocation9 + $0xfd8] sm:$0xff] }
 0x533   :  { %7943 = vmatprep.subr.bf16.mxu1 %v9690_v59  ;;  %v4707_v27 = vld [vmem:[#allocation9 + $0xff8] sm:$0xff]  ;;  %v7985_v59 = vmin.f32 %v7977_v46, 6.0  ;;  %v7984_v40 = vmin.f32 %v7976_v15, 6.0 }
 0x534   :  { %v9738_v19 = vcombine.high %v4703_v56, %v4707_v27  ;;  %v10043_v46 = vld [vmem:[#allocation12 + $0x30] sm:$0xff]  }
 0x535   :  { %7780 = vmatpush1.bf16.msra.mxu0 %v9687_v2  ;;  %v7991_v2 = vmul.f32 %v9901_v13, %v7983_v11  ;;  %v10024_v13 = vld [vmem:[#allocation12 + $0x88] sm:$0xff]  }
 0x536   :  { %7944 = vmatpush1.bf16.msra.mxu1 %v9689_v3  ;;  %7781 = vmatprep.subr.bf16.mxu0 %v9696_v23  ;;  %v7993_v3 = vmul.f32 %v9903_v31, %v7985_v59  ;;  %v9735_v23 = vcombine.low %v4702_v52, %v4706_v53  ;;  %v10026_v31 = vld [vmem:[#allocation12 + $0xd0] sm:$0xff]   ;;  %v10046_v52 = vld [vmem:[#allocation12 + $0xf8] sm:$0xff]  }
 0x537   :  { %7945 = vmatprep.subr.bf16.mxu1 %v9698_v47  ;;  %v9737_v47 = vcombine.low %v4703_v56, %v4707_v27  ;;  %v7999_v5 = vmul.f32 0.16666667, %v7991_v2  ;;  %v10047_v53 = vld [vmem:[#allocation12 + $0x38] sm:$0xff]   ;;  %v10049_v27 = vld [vmem:[#allocation12 + $0x140] sm:$0xff]   ;;  %v10053_v2 = vld [vmem:[#allocation12 + $0x148] sm:$0xff]  }
 0x538   :  { %v8001_v7 = vmul.f32 0.16666667, %v7993_v3  ;;  %v10048_v56 = vld [vmem:[#allocation12 + $0xb8] sm:$0xff]  }
 0x539   :  { %7782 = vmatpush1.bf16.msra.mxu0 %v9695_v30  ;;  %v10021_v30 = vld [vmem:[#allocation12 + $0x48] sm:$0xff]  }
 0x53a   :  { %7946 = vmatpush1.bf16.msra.mxu1 %v9697_v62  ;;  %7783 = vmatprep.subr.bf16.mxu0 %v9704_v9  ;;  %v8007_v62 = vpack.c.bf16 %v7999_v5, %v7999_v5  ;;  %v10022_v9 = vld [vmem:[#allocation12 + $0xc8] sm:$0xff]   ;;  %v10058_v5 = vld [vmem:[#allocation12 + $0x1d0] sm:$0xff]  }
 0x53b   :  { %7947 = vmatprep.subr.bf16.mxu1 %v9706_v10  ;;  %v8009_v10 = vpack.c.bf16 %v8001_v7, %v8001_v7  ;;  %v10059_v7 = vld [vmem:[#allocation12 + $0x110] sm:$0xff]  }
 0x53d   :  { %7784 = vmatpush1.bf16.msra.mxu0 %v9703_v22  ;;  %v10027_v22 = vld [vmem:[#allocation12 + $0x10] sm:$0xff]  }
 0x53e   :  { %7948 = vmatpush1.bf16.msra.mxu1 %v9705_v32  ;;  %7785 = vmatprep.subr.bf16.mxu0 %v9712_v39  ;;  %v10028_v32 = vld [vmem:[#allocation12 + $0x90] sm:$0xff]   ;;  %v10029_v39 = vld [vmem:[#allocation12 + $0x58] sm:$0xff]  }
 0x53f   :  { %7949 = vmatprep.subr.bf16.mxu1 %v9714_v14  ;;  %v10030_v14 = vld [vmem:[#allocation12 + $0xd8] sm:$0xff]  }
 0x541   :  { %7786 = vmatpush1.bf16.msra.mxu0 %v9711_v24  ;;  %v10036_v24 = vld [vmem:[#allocation12 + $0xa0] sm:$0xff]  }
 0x542   :  { %7950 = vmatpush1.bf16.msra.mxu1 %v9713_v28  ;;  %7787 = vmatprep.subr.bf16.mxu0 %v9720_v33  ;;  %v10037_v28 = vld [vmem:[#allocation12 + $0x68] sm:$0xff]  }
 0x543   :  { %7951 = vmatprep.subr.bf16.mxu1 %v9722_v36  ;;  %v10038_v33 = vld [vmem:[#allocation12 + $0xe8] sm:$0xff]  }
 0x544   :  { %v10039_v36 = vld [vmem:[#allocation12 + $0x28] sm:$0xff]  }
 0x545   :  { %7788 = vmatpush1.bf16.msra.mxu0 %v9719_v20 }
 0x546   :  { %7952 = vmatpush1.bf16.msra.mxu1 %v9721_v50  ;;  %7789 = vmatprep.subr.bf16.mxu0 %v9728_v48  ;;  %v10044_v50 = vld [vmem:[#allocation12 + $0xb0] sm:$0xff]   ;;  %v10045_v48 = vld [vmem:[#allocation12 + $0x78] sm:$0xff]  }
 0x547   :  { %7953 = vmatprep.subr.bf16.mxu1 %v9730_v49  ;;  %v7992_v49 = vmul.f32 %v9902_v29, %v7984_v40  ;;  %v10076_v29 = vld [vmem:[#allocation12 + $0x1b0] sm:$0xff]  }
 0x549   :  { %7790 = vmatpush1.bf16.msra.mxu0 %v9727_v60  ;;  %v8000_v59 = vmul.f32 0.16666667, %v7992_v49  ;;  %v10050_v60 = vld [vmem:[#allocation12 + $0x1c0] sm:$0xff]  }
 0x54a   :  { %7954 = vmatpush1.bf16.msra.mxu1 %v9729_v1  ;;  %7791 = vmatprep.subr.bf16.mxu0 %v9736_v58  ;;  %v10051_v1 = vld [vmem:[#allocation12 + $0x100] sm:$0xff]  }
 0x54b   :  { %7955 = vmatprep.subr.bf16.mxu1 %v9738_v19  ;;  %v10052_v19 = vld [vmem:[#allocation12 + $0x180] sm:$0xff]   ;;  %v8008_v3 = vpack.c.bf16 %v8000_v59, %v8000_v59 }
 0x54d   :  { %7792 = vmatpush1.bf16.msra.mxu0 %v9735_v23  ;;  %v10054_v23 = vld [vmem:[#allocation12 + $0x1c8] sm:$0xff]  }
 0x54e   :  { %7956 = vmatpush1.bf16.msra.mxu1 %v9737_v47  ;;  %9804 = vmatprep.subr.bf16.mxu0 %v10017_v4  ;;  %v10055_v47 = vld [vmem:[#allocation12 + $0x108] sm:$0xff]  }
 0x54f   :  { %9826 = vmatprep.subr.bf16.mxu1 %v10018_v61  ;;  %v10056_v4 = vld [vmem:[#allocation12 + $0x188] sm:$0xff]   ;;  %v10057_v61 = vld [vmem:[#allocation12 + $0x150] sm:$0xff]  }
 0x550   :  { %7794 = vmatmul.mubr.bf16.vlgmr.msra.gmra.mrb[20].mxu0 %v10627_v55 }
 0x551   :  { %7958 = vmatmul.mubr.bf16.vlgmr.msra.gmra.mrb[20].mxu1 %v10627_v55  ;;  %9805 = vmatpush3.bf16.msra.mxu0 %v10019_v8  ;;  %v9900_v55 = vadd.f32 %v10645_v21, %v4713_v12  ;;  %v10035_v21 = vld [vmem:[#allocation12 + $0x20] sm:$0xff]   ;;  %v10060_v8 = vld [vmem:[#allocation12 + $0x190] sm:$0xff]  }
 0x552   :  { %8565 = vmatprep.mubr.bf16.mxu0 %v8007_v62  ;;  %9827 = vmatpush3.bf16.msra.mxu1 %v10020_v43  ;;  %v10061_v43 = vld [vmem:[#allocation12 + $0x158] sm:$0xff]   ;;  %v10067_v12 = vld [vmem:[#allocation12 + $0x120] sm:$0xff]  }
 0x553   :  { %8605 = vmatprep.mubr.bf16.mxu1 %v8009_v10  ;;  %9806 = vmatprep.subr.bf16.mxu0 %v10021_v30  ;;  %v7966_v34 = vadd.f32 3.0, %v9900_v55  ;;  %v10062_v30 = vld [vmem:[#allocation12 + $0x1d8] sm:$0xff]   ;;  %v10065_v10 = vld [vmem:[#allocation12 + $0x160] sm:$0xff]  }
 0x554   :  { %9828 = vmatprep.subr.bf16.mxu1 %v10022_v9  ;;  %v10063_v62 = vld [vmem:[#allocation12 + $0x118] sm:$0xff]  }
 0x555   :  { %9807 = vmatpush3.bf16.msra.mxu0 %v10023_v25  ;;  %v7974_v63 = vmax.f32 %v7966_v34, 0.0  ;;  %v10064_v9 = vld [vmem:[#allocation12 + $0x198] sm:$0xff]   ;;  %v10066_v25 = vld [vmem:[#allocation12 + $0x1e0] sm:$0xff]  }
 0x556   :  { %9829 = vmatpush3.bf16.msra.mxu1 %v10024_v13  ;;  %9808 = vmatprep.subr.bf16.mxu0 %v10025_v17  ;;  %v10068_v13 = vld [vmem:[#allocation12 + $0x1a0] sm:$0xff]   ;;  %v10069_v17 = vld [vmem:[#allocation12 + $0x168] sm:$0xff]   ;;  %v10079_v34 = vld [vmem:[#allocation12 + $0x138] sm:$0xff]  }
 0x557   :  { %9830 = vmatprep.subr.bf16.mxu1 %v10026_v31  ;;  %v7982_v42 = vmin.f32 %v7974_v63, 6.0  ;;  %v10071_v31 = vld [vmem:[#allocation12 + $0x128] sm:$0xff]  }
 0x559   :  { %9809 = vmatpush3.bf16.msra.mxu0 %v10027_v22  ;;  %v7990_v20 = vmul.f32 %v9900_v55, %v7982_v42  ;;  %v10072_v22 = vld [vmem:[#allocation12 + $0x1a8] sm:$0xff]   ;;  %v10073_v55 = vld [vmem:[#allocation12 + $0x170] sm:$0xff]  }
 0x55a   :  { %9831 = vmatpush3.bf16.msra.mxu1 %v10028_v32  ;;  %9810 = vmatprep.subr.bf16.mxu0 %v10029_v39  ;;  %v10074_v32 = vld [vmem:[#allocation12 + $0x1f0] sm:$0xff]  }
 0x55b   :  { %9832 = vmatprep.subr.bf16.mxu1 %v10030_v14  ;;  %v7998_v11 = vmul.f32 0.16666667, %v7990_v20  ;;  %v10075_v39 = vld [vmem:[#allocation12 + $0x130] sm:$0xff]   ;;  %v10077_v14 = vld [vmem:[#allocation12 + $0x178] sm:$0xff]  }
 0x55d   :  { %9811 = vmatpush3.bf16.msra.mxu0 %v10031_v54  ;;  %v8006_v58 = vpack.c.bf16 %v7998_v11, %v7998_v11  ;;  %v10078_v54 = vld [vmem:[#allocation12 + $0x1f8] sm:$0xff]  }
 0x55e   :  { %9833 = vmatpush3.bf16.msra.mxu1 %v10032_v44  ;;  %9812 = vmatprep.subr.bf16.mxu0 %v10033_v0  ;;  %v10080_v44 = vld [vmem:[#allocation12 + $0x1b8] sm:$0xff]   ;;  %v4729_v0 = vrot.slane %v10653_v16, %v10520_v26 }
 0x55f   :  { %9834 = vmatprep.subr.bf16.mxu1 %v10034_v6  ;;  %v4733_v6 = vrot.slane %v10653_v16, %v10503_v57 }
 0x561   :  { %9813 = vmatpush3.bf16.msra.mxu0 %v10035_v21  ;;  %v4741_v21 = vrot.slane %v10653_v16, %v10523_v41 }
 0x562   :  { %9835 = vmatpush3.bf16.msra.mxu1 %v10036_v24  ;;  %9814 = vmatprep.subr.bf16.mxu0 %v10037_v28 }
 0x563   :  { %9836 = vmatprep.subr.bf16.mxu1 %v10038_v33 }
 0x565   :  { %9815 = vmatpush3.bf16.msra.mxu0 %v10039_v36 }
 0x566   :  { %9837 = vmatpush3.bf16.msra.mxu1 %v10040_v37  ;;  %9816 = vmatprep.subr.bf16.mxu0 %v10041_v38 }
 0x567   :  { %9838 = vmatprep.subr.bf16.mxu1 %v10042_v45 }
 0x569   :  { %9817 = vmatpush3.bf16.msra.mxu0 %v10043_v46 }
 0x56a   :  { %9839 = vmatpush3.bf16.msra.mxu1 %v10044_v50  ;;  %9818 = vmatprep.subr.bf16.mxu0 %v10045_v48 }
 0x56b   :  { %9840 = vmatprep.subr.bf16.mxu1 %v10046_v52 }
 0x56d   :  { %9819 = vmatpush3.bf16.msra.mxu0 %v10047_v53 }
 0x56e   :  { %9841 = vmatpush3.bf16.msra.mxu1 %v10048_v56  ;;  %9848 = vmatprep.subr.bf16.mxu0 %v10049_v27 }
 0x56f   :  { %9870 = vmatprep.subr.bf16.mxu1 %v10050_v60 }
 0x570   :  { %8566 = vmatmul.mubr.bf16.vlgmr.msra.gmra.mrb[24].mxu0 %v8006_v58 }
 0x571   :  { %8606 = vmatmul.mubr.bf16.vlgmr.msra.gmra.mrb[24].mxu1 %v8008_v3  ;;  %9849 = vmatpush3.bf16.msra.mxu0 %v10051_v1 }
 0x572   :  { %9871 = vmatpush3.bf16.msra.mxu1 %v10052_v19  ;;  %9850 = vmatprep.subr.bf16.mxu0 %v10053_v2 }
 0x573   :  { %9872 = vmatprep.subr.bf16.mxu1 %v10054_v23 }
 0x575   :  { %9851 = vmatpush3.bf16.msra.mxu0 %v10055_v47 }
 0x576   :  { %9873 = vmatpush3.bf16.msra.mxu1 %v10056_v4  ;;  %9852 = vmatprep.subr.bf16.mxu0 %v10057_v61 }
 0x577   :  { %9874 = vmatprep.subr.bf16.mxu1 %v10058_v5 }
 0x579   :  { %9853 = vmatpush3.bf16.msra.mxu0 %v10059_v7  ;;  %v9739_v7 = vld [vmem:[#allocation13] ss:$0 sm:$0xff] }
 0x57a   :  { %9875 = vmatpush3.bf16.msra.mxu1 %v10060_v8  ;;  %9854 = vmatprep.subr.bf16.mxu0 %v10061_v43 }
 0x57b   :  { %9876 = vmatprep.subr.bf16.mxu1 %v10062_v30 }
 0x57d   :  { %9855 = vmatpush3.bf16.msra.mxu0 %v10063_v62 }
 0x57e   :  { %9877 = vmatpush3.bf16.msra.mxu1 %v10064_v9  ;;  %9856 = vmatprep.subr.bf16.mxu0 %v10065_v10 }
 0x57f   :  { %9878 = vmatprep.subr.bf16.mxu1 %v10066_v25 }
 0x581   :  { %9857 = vmatpush3.bf16.msra.mxu0 %v10067_v12 }
 0x582   :  { %9879 = vmatpush3.bf16.msra.mxu1 %v10068_v13  ;;  %9858 = vmatprep.subr.bf16.mxu0 %v10069_v17 }
 0x583   :  { %9880 = vmatprep.subr.bf16.mxu1 %v10070_v51 }
 0x585   :  { %9859 = vmatpush3.bf16.msra.mxu0 %v10071_v31 }
 0x586   :  { %9881 = vmatpush3.bf16.msra.mxu1 %v10072_v22  ;;  %9860 = vmatprep.subr.bf16.mxu0 %v10073_v55 }
 0x587   :  { %9882 = vmatprep.subr.bf16.mxu1 %v10074_v32 }
 0x589   :  { %9861 = vmatpush3.bf16.msra.mxu0 %v10075_v39 }
 0x58a   :  { %9883 = vmatpush3.bf16.msra.mxu1 %v10076_v29  ;;  %9862 = vmatprep.subr.bf16.mxu0 %v10077_v14 }
 0x58b   :  { %9884 = vmatprep.subr.bf16.mxu1 %v10078_v54 }
 0x58d   :  { %9863 = vmatpush3.bf16.msra.mxu0 %v10079_v34 }
 0x58e   :  { %9885 = vmatpush3.bf16.msra.mxu1 %v10080_v44 }
 0x623   :  { %v7795_v63 = vpop.f32.mrb[20].mxu0 }
 0x624   :  { %v9904_v24 = vadd.f32 %v7795_v63, %v4729_v0  ;;  %v7959_v28 = vpop.f32.mrb[20].mxu1  ;;  %v7797_v15 = vpop.f32.mrb[21].mxu0 }
 0x625   :  { %v9906_v33 = vadd.f32 %v7959_v28, %v4737_v35  ;;  %v9905_v36 = vadd.f32 %v7797_v15, %v4733_v6  ;;  %v7961_v42 = vpop.f32.mrb[21].mxu1  ;;  %v7799_v37 = vpop.f32.mrb[22].mxu0 }
 0x626   :  { %v7970_v38 = vadd.f32 3.0, %v9904_v24  ;;  %v9907_v40 = vadd.f32 %v7961_v42, %v4741_v21  ;;  %v7963_v26 = vpop.f32.mrb[22].mxu1  ;;  %v7800_v45 = vpop.f32.mrb[23].mxu0 }
 0x627   :  { %v7972_v46 = vadd.f32 3.0, %v9906_v33  ;;  %v7971_v18 = vadd.f32 3.0, %v9905_v36  ;;  %v7964_v20 = vpop.f32.mrb[23].mxu1 }
 0x628   :  { %v7978_v50 = vmax.f32 %v7970_v38, 0.0  ;;  %v7973_v57 = vadd.f32 3.0, %v9907_v40 }
 0x629   :  { %v7980_v48 = vmax.f32 %v7972_v46, 0.0  ;;  %v7979_v49 = vmax.f32 %v7971_v18, 0.0 }
 0x62a   :  { %v7986_v41 = vmin.f32 %v7978_v50, 6.0  ;;  %v7981_v16 = vmax.f32 %v7973_v57, 0.0 }
 0x62b   :  { %v7988_v52 = vmin.f32 %v7980_v48, 6.0  ;;  %v7987_v53 = vmin.f32 %v7979_v49, 6.0 }
 0x62c   :  { %v7994_v11 = vmul.f32 %v9904_v24, %v7986_v41  ;;  %v7989_v56 = vmin.f32 %v7981_v16, 6.0 }
 0x62d   :  { %v7996_v27 = vmul.f32 %v9906_v33, %v7988_v52  ;;  %v7995_v59 = vmul.f32 %v9905_v36, %v7987_v53 }
 0x62e   :  { %v8002_v60 = vmul.f32 0.16666667, %v7994_v11  ;;  %v7997_v1 = vmul.f32 %v9907_v40, %v7989_v56 }
 0x62f   :  { %v8004_v58 = vmul.f32 0.16666667, %v7996_v27  ;;  %v8003_v19 = vmul.f32 0.16666667, %v7995_v59 }
 0x630   :  { %v8005_v2 = vmul.f32 0.16666667, %v7997_v1  ;;  %v8010_v23 = vpack.c.bf16 %v8002_v60, %v8002_v60 }
 0x631   :  { %v8011_v3 = vpack.c.bf16 %v8003_v19, %v8003_v19  ;;  %v8012_v4 = vpack.c.bf16 %v8004_v58, %v8004_v58 }
 0x632   :  { %v8013_v47 = vpack.c.bf16 %v8005_v2, %v8005_v2 }
 0x633   :  { %8645 = vmatprep.mubr.bf16.mxu0 %v8011_v3 }
 0x634   :  { %8685 = vmatprep.mubr.bf16.mxu1 %v8013_v47  ;;  %8646 = vmatmul.mubr.bf16.vlgmr.msra.gmra.mrb[28].mxu0 %v8010_v23 }
 0x635   :  { %8686 = vmatmul.mubr.bf16.vlgmr.msra.gmra.mrb[28].mxu1 %v8012_v4 }
 0x643   :  { %v9820_v61 = vpop.f32.mrb[24].mxu0 }
 0x644   :  { %v9842_v5 = vpop.f32.mrb[24].mxu1  ;;  %v9821_v8 = vpop.f32.mrb[25].mxu0 }
 0x645   :  { %v9822_v43 = vadd.f32 %v9821_v8, %v9820_v61  ;;  %v9843_v30 = vpop.f32.mrb[25].mxu1  ;;  %v9823_v62 = vpop.f32.mrb[26].mxu0 }
 0x646   :  { %v9844_v9 = vadd.f32 %v9843_v30, %v9842_v5  ;;  %v9845_v10 = vpop.f32.mrb[26].mxu1  ;;  %v9824_v25 = vpop.f32.mrb[27].mxu0 }
 0x647   :  { %v8568_v12 = vadd.f32 %v9822_v43, %v9739_v7  ;;  %v9846_v13 = vpop.f32.mrb[27].mxu1 }
 0x649   :  { %v8608_v17 = vadd.f32 %v9844_v9, %v8568_v12 }
 0x707   :  { %v9864_v51 = vpop.f32.mrb[28].mxu0 }
 0x708   :  { %v9886_v31 = vpop.f32.mrb[28].mxu1  ;;  %v9865_v22 = vpop.f32.mrb[29].mxu0 }
 0x709   :  { %v9866_v55 = vadd.f32 %v9865_v22, %v9864_v51  ;;  %v9887_v32 = vpop.f32.mrb[29].mxu1  ;;  %v9867_v39 = vpop.f32.mrb[30].mxu0 }
 0x70a   :  { %v9888_v29 = vadd.f32 %v9887_v32, %v9886_v31  ;;  %v9889_v14 = vpop.f32.mrb[30].mxu1  ;;  %v9868_v54 = vpop.f32.mrb[31].mxu0 }
 0x70b   :  { %v8648_v34 = vadd.f32 %v9866_v55, %v8608_v17  ;;  %v9890_v44 = vpop.f32.mrb[31].mxu1 }
 0x70d   :  { %v8688_v0 = vadd.f32 %v9888_v29, %v8648_v34 }
 0x70f   :  { %8693 = vst [vmem:[%s10689_s9] sm:$0xff] %v8688_v0 }
 0x710   :  { %8698 = vsyncpa [#allocation3], 1 }
 0x711   :  { %8699 = vsyncpa [#allocation5], 1 }
 0x712   :  { %8700 = vsyncpa [#allocation8], 1 }
 0x713   :  { %8701 = vsyncpa [#allocation11], 1 }
 0x714   :  { %8702 = vsyncpa [#allocation14], 1 }

</bundles_post_ra>
